<compile_context>
chip_gen: v5e
topology: v5e:2x2
jax: 0.10.0
libtpu: 0.0.40
codegen_flags: <defaults>
</compile_context>

<pallas_src>
import functools

import jax
import jax.numpy as jnp
from jax.experimental import pallas as pl
from jax.experimental.pallas import tpu as pltpu


# ----------------------------------------------------------------------------
# Pallas kernels
# ----------------------------------------------------------------------------
def _conv1_kernel(x_ref, w_ref, b_ref, o_ref):
    # x: (tm, K) bf16 (lossless for 0..255 pixel ints), w: (K, 30) f32 with the
    # /255 already folded in, b: (1, 30) -> o: (tm, 30)
    x = x_ref[...].astype(jnp.float32)
    acc = jnp.dot(x, w_ref[...], preferred_element_type=jnp.float32)
    o_ref[...] = jnp.maximum(acc + b_ref[...], 0.0)


def _tail_kernel(x2_ref, w2_ref, b2_ref, w3_ref, b3_ref,
                 w4_ref, b4_ref, w5_ref, b5_ref, w6_ref, b6_ref,
                 o_ref, p2_ref, h3_ref, *, batch):
    # Fused conv2 -> pool2 -> conv3 -> pool3 -> flatten -> fc1 -> fc2 -> fc3.
    f32 = jnp.float32

    # ---- conv2 + maxpool2 + relu -------------------------------------------
    # x2_ref: (4, 36*B, 270); leading axis = the 2x2 pool2 window position, so the
    # pool is just an elementwise max over four matmul results (bias and relu
    # commute with the max, so they are applied once afterwards).
    acc = jnp.dot(x2_ref[0], w2_ref[...], preferred_element_type=f32)
    for par in range(1, 4):
        acc = jnp.maximum(
            acc, jnp.dot(x2_ref[par], w2_ref[...], preferred_element_type=f32))
    p2_ref[...] = jnp.maximum(acc + b2_ref[...], 0.0)            # (36*B, 60)

    # ---- conv3 + relu --------------------------------------------------------
    # Rows of p2 are grouped t-major (t = 3x3 window offset), so each offset owns
    # one aligned 4*B-row block; conv3 = sum of 9 per-offset matmuls.
    g = 4 * batch
    acc3 = jnp.dot(p2_ref[0:g, :], w3_ref[0], preferred_element_type=f32)
    for t in range(1, 9):
        acc3 = acc3 + jnp.dot(p2_ref[t * g:(t + 1) * g, :], w3_ref[t],
                              preferred_element_type=f32)
    h3_ref[...] = jnp.maximum(acc3 + b3_ref[...], 0.0)           # (4*B, 90), rows = (s, b)

    # ---- maxpool3 + flatten --------------------------------------------------
    # conv3 output is 2x2 spatial -> pool3 is a max over the 4 spatial positions
    # s; rows within each block are ordered (s, b), so this is a max of 4 B-row
    # slices and the result is already in batch order / channel-flatten order.
    pooled = h3_ref[0:batch, :]
    for s in range(1, 4):
        pooled = jnp.maximum(pooled, h3_ref[s * batch:(s + 1) * batch, :])

    # ---- fc1 + relu, fc2 + relu, fc3 ----------------------------------------
    h = jnp.maximum(
        jnp.dot(pooled, w4_ref[...], preferred_element_type=f32) + b4_ref[...], 0.0)
    h = jnp.maximum(
        jnp.dot(h, w5_ref[...], preferred_element_type=f32) + b5_ref[...], 0.0)
    o_ref[...] = jnp.dot(h, w6_ref[...], preferred_element_type=f32) + b6_ref[...]


# ----------------------------------------------------------------------------
# Wrappers (glue: reshapes / patch extraction / padding only)
# ----------------------------------------------------------------------------
def _round_up(x, m):
    return ((x + m - 1) // m) * m


def _conv1_patches(x):
    # stride == kernel == 3 -> non-overlapping windows, pure reshape/transpose.
    B, H, W, C = x.shape
    Ho, Wo = H // 3, W // 3
    p = x[:, : Ho * 3, : Wo * 3, :].reshape(B, Ho, 3, Wo, 3, C)
    p = p.transpose(0, 1, 3, 2, 4, 5)                 # (B, Ho, Wo, kh, kw, C)
    return p.reshape(B * Ho * Wo, 9 * C), (B, Ho, Wo)


def _conv1_matmul(patches, w, b):
    # patches: (M, K) bf16, w: (K, N) f32, b: (1, N) f32 -> (M, N) f32
    M, K = patches.shape
    N = w.shape[1]
    # Right-sized tiles: >=2 parallel grid steps (v7x has 2 TensorCores), each as
    # large as possible so per-step pipeline overhead is amortized.
    nblk = max(2, pl.cdiv(M, 2048))
    tm = _round_up(pl.cdiv(M, nblk), 16)              # 16: bf16 sublane tile
    Mp = nblk * tm
    patches = jnp.pad(patches, ((0, Mp - M), (0, 0)))
    out = pl.pallas_call(
        _conv1_kernel,
        out_shape=jax.ShapeDtypeStruct((Mp, N), jnp.float32),
        grid=(nblk,),
        in_specs=[
            pl.BlockSpec((tm, K), lambda i: (i, 0)),
            pl.BlockSpec((K, N), lambda i: (0, 0)),
            pl.BlockSpec((1, N), lambda i: (0, 0)),
        ],
        out_specs=pl.BlockSpec((tm, N), lambda i: (i, 0)),
        compiler_params=pltpu.CompilerParams(dimension_semantics=("parallel",)),
    )(patches, w, b)
    return out[:M]


def _tail_inputs(p1):
    # p1: pool1 output, (B, Sh, Sw, 30).  Build the conv2 im2col patches and
    # regroup them so that:
    #   axis 0 = pool2 window position (di, dj)           -> pool2 is a leading-axis max
    #   axis 1 = (t = conv3 window offset, s = conv3 output position, b)
    #            -> conv3 reads aligned contiguous row blocks per offset t.
    B, Sh, Sw, C = p1.shape
    n2h, n2w = (Sh - 3) // 3 + 1, (Sw - 3) // 3 + 1
    # TODO(synk): the fused tail is specialized to the 12x12 conv2 output the
    # reference shape-chain produces (input spatial 111..119, pool3 output 1x1);
    # larger inputs would need a gridded tail over conv3-output tiles.
    assert n2h == 12 and n2w == 12, "fused tail expects a 12x12 conv2 output"
    p1 = p1[:, : n2h * 3, : n2w * 3, :]
    K2 = 9 * C
    # conv2 im2col patches, window order (kh, kw, Cin): (B, 12, 12, 270)
    P = (p1.reshape(B, n2h, 3, n2w, 3, C).transpose(0, 1, 3, 2, 4, 5)
           .reshape(B, n2h, n2w, K2))
    # conv2-output index i = 6*ci + 2*u + di  (ci: conv3 output pos, u: conv3
    # window offset, di: pool2 window offset); same decomposition for j.
    P8 = P.reshape(B, 2, 3, 2, 2, 3, 2, K2)           # (b, ci, u, di, cj, v, dj, K)
    x2 = P8.transpose(3, 6, 2, 5, 1, 4, 0, 7)         # (di, dj, u, v, ci, cj, b, K)
    return x2.reshape(4, 36 * B, K2)


def _tail_call(x2, params, batch, n_actions):
    vspec = pl.BlockSpec(memory_space=pltpu.MemorySpace.VMEM)
    c2in = params["conv2_w"].shape[1]                 # 30
    w2 = jnp.transpose(params["conv2_w"], (2, 3, 1, 0)).reshape(9 * c2in, 60)
    w3 = jnp.transpose(params["conv3_w"], (2, 3, 1, 0)).reshape(9, 60, 90)
    return pl.pallas_call(
        functools.partial(_tail_kernel, batch=batch),
        out_shape=jax.ShapeDtypeStruct((batch, n_actions), jnp.float32),
        in_specs=[vspec] * 11,
        out_specs=vspec,
        scratch_shapes=[
            pltpu.VMEM((36 * batch, 60), jnp.float32),   # pool2 output
            pltpu.VMEM((4 * batch, 90), jnp.float32),    # conv3 output
        ],
    )(
        x2,
        w2, params["conv2_b"].reshape(1, 60),
        w3, params["conv3_b"].reshape(1, 90),
        params["fc1_w"], params["fc1_b"].reshape(1, -1),
        params["fc2_w"], params["fc2_b"].reshape(1, -1),
        params["fc3_w"], params["fc3_b"].reshape(1, -1),
    )


# ----------------------------------------------------------------------------
# DQN forward
# ----------------------------------------------------------------------------
def dqn_forward(params, screenshot):
    # screenshot: (B, WIDTH, HEIGHT, CHANNELS) with 0..255 pixel values; the torch
    # module permutes to NCHW — we keep NHWC and convolve over (WIDTH, HEIGHT).
    B = screenshot.shape[0]
    cin = screenshot.shape[-1]
    n_actions = params["fc3_w"].shape[1]

    # conv1: patches kept in bf16 (exact for 0..255 ints -> halves the DMA),
    # /255 folded into the f32 weights at trace time, relu fused in-kernel.
    x = screenshot.astype(jnp.bfloat16)
    patches, (_, Ho, Wo) = _conv1_patches(x)
    w1 = (jnp.transpose(params["conv1_w"], (2, 3, 1, 0)).reshape(9 * cin, -1)
          .astype(jnp.float32)) * jnp.float32(1.0 / 255.0)
    b1 = params["conv1_b"].reshape(1, -1).astype(jnp.float32)
    a1 = _conv1_matmul(patches, w1, b1).reshape(B, Ho, Wo, -1)

    # maxpool1 (2x2, stride 1): elementwise max of 4 shifted views — XLA fuses
    # this; no stacked HBM array, no extra kernel launch.
    Sh, Sw = Ho - 1, Wo - 1
    p1 = jnp.maximum(
        jnp.maximum(a1[:, :Sh, :Sw, :], a1[:, :Sh, 1:Sw + 1, :]),
        jnp.maximum(a1[:, 1:Sh + 1, :Sw, :], a1[:, 1:Sh + 1, 1:Sw + 1, :]),
    )

    # Everything downstream of pool1 runs in a single fused Pallas kernel.
    x2 = _tail_inputs(p1)
    return _tail_call(x2, params, B, n_actions)


# ----------------------------------------------------------------------------
# Deterministic parameter init (shapes from the torch __init__)
# ----------------------------------------------------------------------------
def _conv_out(n, k, s):
    return (n - k) // s + 1


def infer_fc_in(width, height):
    def chain(n):
        n = _conv_out(n, 3, 3)   # conv1
        n = _conv_out(n, 2, 1)   # maxpool1
        n = _conv_out(n, 3, 3)   # conv2
        n = _conv_out(n, 2, 2)   # maxpool2
        n = _conv_out(n, 3, 3)   # conv3
        n = _conv_out(n, 2, 2)   # maxpool3
        return n
    return 90 * chain(width) * chain(height)


def init_params(key, channels, n_actions, fc_in):
    ks = jax.random.split(key, 12)

    def uni(k, shape, fan_in):
        bound = 1.0 / jnp.sqrt(jnp.float32(fan_in))
        return jax.random.uniform(k, shape, jnp.float32, -bound, bound)

    p = {}
    p["conv1_w"] = uni(ks[0], (30, channels, 3, 3), channels * 9)
    p["conv1_b"] = uni(ks[1], (30,), channels * 9)
    p["conv2_w"] = uni(ks[2], (60, 30, 3, 3), 30 * 9)
    p["conv2_b"] = uni(ks[3], (60,), 30 * 9)
    p["conv3_w"] = uni(ks[4], (90, 60, 3, 3), 60 * 9)
    p["conv3_b"] = uni(ks[5], (90,), 60 * 9)
    p["fc1_w"] = uni(ks[6], (fc_in, 128), fc_in)
    p["fc1_b"] = uni(ks[7], (128,), fc_in)
    p["fc2_w"] = uni(ks[8], (128, 64), 128)
    p["fc2_b"] = uni(ks[9], (64,), 128)
    p["fc3_w"] = uni(ks[10], (64, n_actions), 64)
    p["fc3_b"] = uni(ks[11], (n_actions,), 64)
    return p


if __name__ == "__main__":
    BATCH, WIDTH, HEIGHT, CHANNELS = 2, 111, 111, 3   # 111 is the minimum valid spatial size
    N_ACTIONS = 4

    key = jax.random.PRNGKey(0)
    k_img, k_par = jax.random.split(key)

    fc_in = infer_fc_in(WIDTH, HEIGHT)                 # = 90
    params = init_params(k_par, CHANNELS, N_ACTIONS, fc_in)

    screenshot = jax.random.randint(
        k_img, (BATCH, WIDTH, HEIGHT, CHANNELS), 0, 256, dtype=jnp.int32
    ).astype(jnp.float32)

    actions = jax.jit(dqn_forward)(params, screenshot)
    jax.block_until_ready(actions)
    assert actions.shape == (BATCH, N_ACTIONS)
    print("KERNEL_OK")
</pallas_src>

<mosaic_0001>
module attributes {stable_mosaic.version = 11 : i64} {
  func.func @_conv1_kernel(%arg0: i32, %arg1: memref<1376x27xbf16, #tpu.memory_space<vmem>>, %arg2: memref<27x30xf32, #tpu.memory_space<vmem>>, %arg3: memref<1x30xf32, #tpu.memory_space<vmem>>, %arg4: memref<1376x30xf32, #tpu.memory_space<vmem>>) attributes {dimension_semantics = [#tpu.dimension_semantics<parallel>], iteration_bounds = array<i64: 2>, scalar_prefetch = 0 : i64, scratch_operands = 0 : i64, tpu.core_type = #tpu.core_type<tc>, window_params = [{transform_indices = @transform_0, window_bounds = array<i64: 1376, 27>}, {pipeline_mode = #tpu.pipeline_mode<synchronous>, transform_indices = @transform_1, window_bounds = array<i64: 27, 30>}, {pipeline_mode = #tpu.pipeline_mode<synchronous>, transform_indices = @transform_2, window_bounds = array<i64: 1, 30>}, {transform_indices = @transform_3, window_bounds = array<i64: 1376, 30>}]} {
    %c0 = arith.constant 0 : index
    %c0_0 = arith.constant 0 : index
    %0 = vector.load %arg1[%c0, %c0_0] : memref<1376x27xbf16, #tpu.memory_space<vmem>>, vector<1376x27xbf16>
    %1 = arith.extf %0 : vector<1376x27xbf16> to vector<1376x27xf32>
    %c0_1 = arith.constant 0 : index
    %c0_2 = arith.constant 0 : index
    %2 = vector.load %arg2[%c0_1, %c0_2] : memref<27x30xf32, #tpu.memory_space<vmem>>, vector<27x30xf32>
    %cst = arith.constant dense<0.000000e+00> : vector<1376x30xf32>
    %3 = tpu.matmul %1, %2, %cst {dimension_numbers = #tpu.dot_dimension_numbers<[1], [0], [0], [1], [0, 0, 1, 1], [], []>} : vector<1376x27xf32>, vector<27x30xf32>, vector<1376x30xf32> -> vector<1376x30xf32>
    %c0_3 = arith.constant 0 : index
    %c0_4 = arith.constant 0 : index
    %4 = vector.load %arg3[%c0_3, %c0_4] : memref<1x30xf32, #tpu.memory_space<vmem>>, vector<1x30xf32>
    %5 = vector.broadcast %4 : vector<1x30xf32> to vector<1376x30xf32>
    %6 = arith.addf %3, %5 : vector<1376x30xf32>
    %cst_5 = arith.constant 0.000000e+00 : f32
    %7 = vector.broadcast %cst_5 : f32 to vector<1376x30xf32>
    %8 = arith.maximumf %6, %7 : vector<1376x30xf32>
    %c0_6 = arith.constant 0 : index
    %c0_7 = arith.constant 0 : index
    %9 = vector.load %arg4[%c0_6, %c0_7] : memref<1376x30xf32, #tpu.memory_space<vmem>>, vector<1376x30xf32>
    tpu.vector_store %arg4[%c0_6, %c0_7], %8 {strides = array<i32>} : memref<1376x30xf32, #tpu.memory_space<vmem>>, vector<1376x30xf32>,
    return
  }
  func.func @transform_0(%arg0: i32) -> (i32, i32) {
    %c0_i32 = arith.constant 0 : i32
    %c0_i32_0 = arith.constant 0 : i32
    return %arg0, %c0_i32 : i32, i32
  }
  func.func @transform_1(%arg0: i32) -> (i32, i32) {
    %c0_i32 = arith.constant 0 : i32
    %c0_i32_0 = arith.constant 0 : i32
    %c0_i32_1 = arith.constant 0 : i32
    return %c0_i32, %c0_i32_0 : i32, i32
  }
  func.func @transform_2(%arg0: i32) -> (i32, i32) {
    %c0_i32 = arith.constant 0 : i32
    %c0_i32_0 = arith.constant 0 : i32
    %c0_i32_1 = arith.constant 0 : i32
    return %c0_i32, %c0_i32_0 : i32, i32
  }
  func.func @transform_3(%arg0: i32) -> (i32, i32) {
    %c0_i32 = arith.constant 0 : i32
    %c0_i32_0 = arith.constant 0 : i32
    return %arg0, %c0_i32 : i32, i32
  }
}

module attributes {stable_mosaic.version = 11 : i64} {
  func.func @_tail_kernel(%arg0: memref<4x72x270xf32, #tpu.memory_space<vmem>>, %arg1: memref<270x60xf32, #tpu.memory_space<vmem>>, %arg2: memref<1x60xf32, #tpu.memory_space<vmem>>, %arg3: memref<9x60x90xf32, #tpu.memory_space<vmem>>, %arg4: memref<1x90xf32, #tpu.memory_space<vmem>>, %arg5: memref<90x128xf32, #tpu.memory_space<vmem>>, %arg6: memref<1x128xf32, #tpu.memory_space<vmem>>, %arg7: memref<128x64xf32, #tpu.memory_space<vmem>>, %arg8: memref<1x64xf32, #tpu.memory_space<vmem>>, %arg9: memref<64x4xf32, #tpu.memory_space<vmem>>, %arg10: memref<1x4xf32, #tpu.memory_space<vmem>>, %arg11: memref<2x4xf32, #tpu.memory_space<vmem>>, %arg12: memref<72x60xf32, #tpu.memory_space<vmem>>, %arg13: memref<8x90xf32, #tpu.memory_space<vmem>>) attributes {dimension_semantics = [], scalar_prefetch = 0 : i64, scratch_operands = 2 : i64, tpu.core_type = #tpu.core_type<tc>} {
    %c0 = arith.constant 0 : index
    %c0_0 = arith.constant 0 : index
    %c0_1 = arith.constant 0 : index
    %0 = vector.load %arg0[%c0, %c0_0, %c0_1] : memref<4x72x270xf32, #tpu.memory_space<vmem>>, vector<1x72x270xf32>
    %1 = vector.shape_cast %0 : vector<1x72x270xf32> to vector<72x270xf32>
    %c0_2 = arith.constant 0 : index
    %c0_3 = arith.constant 0 : index
    %2 = vector.load %arg1[%c0_2, %c0_3] : memref<270x60xf32, #tpu.memory_space<vmem>>, vector<270x60xf32>
    %cst = arith.constant dense<0.000000e+00> : vector<72x60xf32>
    %3 = tpu.matmul %1, %2, %cst {dimension_numbers = #tpu.dot_dimension_numbers<[1], [0], [0], [1], [0, 0, 1, 1], [], []>} : vector<72x270xf32>, vector<270x60xf32>, vector<72x60xf32> -> vector<72x60xf32>
    %c1 = arith.constant 1 : index
    %c0_4 = arith.constant 0 : index
    %c0_5 = arith.constant 0 : index
    %4 = vector.load %arg0[%c1, %c0_4, %c0_5] : memref<4x72x270xf32, #tpu.memory_space<vmem>>, vector<1x72x270xf32>
    %5 = vector.shape_cast %4 : vector<1x72x270xf32> to vector<72x270xf32>
    %c0_6 = arith.constant 0 : index
    %c0_7 = arith.constant 0 : index
    %6 = vector.load %arg1[%c0_6, %c0_7] : memref<270x60xf32, #tpu.memory_space<vmem>>, vector<270x60xf32>
    %cst_8 = arith.constant dense<0.000000e+00> : vector<72x60xf32>
    %7 = tpu.matmul %5, %6, %cst_8 {dimension_numbers = #tpu.dot_dimension_numbers<[1], [0], [0], [1], [0, 0, 1, 1], [], []>} : vector<72x270xf32>, vector<270x60xf32>, vector<72x60xf32> -> vector<72x60xf32>
    %8 = arith.maximumf %3, %7 : vector<72x60xf32>
    %c2 = arith.constant 2 : index
    %c0_9 = arith.constant 0 : index
    %c0_10 = arith.constant 0 : index
    %9 = vector.load %arg0[%c2, %c0_9, %c0_10] : memref<4x72x270xf32, #tpu.memory_space<vmem>>, vector<1x72x270xf32>
    %10 = vector.shape_cast %9 : vector<1x72x270xf32> to vector<72x270xf32>
    %c0_11 = arith.constant 0 : index
    %c0_12 = arith.constant 0 : index
    %11 = vector.load %arg1[%c0_11, %c0_12] : memref<270x60xf32, #tpu.memory_space<vmem>>, vector<270x60xf32>
    %cst_13 = arith.constant dense<0.000000e+00> : vector<72x60xf32>
    %12 = tpu.matmul %10, %11, %cst_13 {dimension_numbers = #tpu.dot_dimension_numbers<[1], [0], [0], [1], [0, 0, 1, 1], [], []>} : vector<72x270xf32>, vector<270x60xf32>, vector<72x60xf32> -> vector<72x60xf32>
    %13 = arith.maximumf %8, %12 : vector<72x60xf32>
    %c3 = arith.constant 3 : index
    %c0_14 = arith.constant 0 : index
    %c0_15 = arith.constant 0 : index
    %14 = vector.load %arg0[%c3, %c0_14, %c0_15] : memref<4x72x270xf32, #tpu.memory_space<vmem>>, vector<1x72x270xf32>
    %15 = vector.shape_cast %14 : vector<1x72x270xf32> to vector<72x270xf32>
    %c0_16 = arith.constant 0 : index
    %c0_17 = arith.constant 0 : index
    %16 = vector.load %arg1[%c0_16, %c0_17] : memref<270x60xf32, #tpu.memory_space<vmem>>, vector<270x60xf32>
    %cst_18 = arith.constant dense<0.000000e+00> : vector<72x60xf32>
    %17 = tpu.matmul %15, %16, %cst_18 {dimension_numbers = #tpu.dot_dimension_numbers<[1], [0], [0], [1], [0, 0, 1, 1], [], []>} : vector<72x270xf32>, vector<270x60xf32>, vector<72x60xf32> -> vector<72x60xf32>
    %18 = arith.maximumf %13, %17 : vector<72x60xf32>
    %c0_19 = arith.constant 0 : index
    %c0_20 = arith.constant 0 : index
    %19 = vector.load %arg2[%c0_19, %c0_20] : memref<1x60xf32, #tpu.memory_space<vmem>>, vector<1x60xf32>
    %20 = vector.broadcast %19 : vector<1x60xf32> to vector<72x60xf32>
    %21 = arith.addf %18, %20 : vector<72x60xf32>
    %cst_21 = arith.constant 0.000000e+00 : f32
    %22 = vector.broadcast %cst_21 : f32 to vector<72x60xf32>
    %23 = arith.maximumf %21, %22 : vector<72x60xf32>
    %c0_22 = arith.constant 0 : index
    %c0_23 = arith.constant 0 : index
    %24 = vector.load %arg12[%c0_22, %c0_23] : memref<72x60xf32, #tpu.memory_space<vmem>>, vector<72x60xf32>
    tpu.vector_store %arg12[%c0_22, %c0_23], %23 {strides = array<i32>} : memref<72x60xf32, #tpu.memory_space<vmem>>, vector<72x60xf32>,
    %c0_24 = arith.constant 0 : index
    %c0_25 = arith.constant 0 : index
    %25 = vector.load %arg12[%c0_24, %c0_25] : memref<72x60xf32, #tpu.memory_space<vmem>>, vector<8x60xf32>
    %c0_26 = arith.constant 0 : index
    %c0_27 = arith.constant 0 : index
    %c0_28 = arith.constant 0 : index
    %26 = vector.load %arg3[%c0_26, %c0_27, %c0_28] : memref<9x60x90xf32, #tpu.memory_space<vmem>>, vector<1x60x90xf32>
    %27 = vector.shape_cast %26 : vector<1x60x90xf32> to vector<60x90xf32>
    %cst_29 = arith.constant dense<0.000000e+00> : vector<8x90xf32>
    %28 = tpu.matmul %25, %27, %cst_29 {dimension_numbers = #tpu.dot_dimension_numbers<[1], [0], [0], [1], [0, 0, 1, 1], [], []>} : vector<8x60xf32>, vector<60x90xf32>, vector<8x90xf32> -> vector<8x90xf32>
    %c8 = arith.constant 8 : index
    %c0_30 = arith.constant 0 : index
    %29 = vector.load %arg12[%c8, %c0_30] : memref<72x60xf32, #tpu.memory_space<vmem>>, vector<8x60xf32>
    %c1_31 = arith.constant 1 : index
    %c0_32 = arith.constant 0 : index
    %c0_33 = arith.constant 0 : index
    %30 = vector.load %arg3[%c1_31, %c0_32, %c0_33] : memref<9x60x90xf32, #tpu.memory_space<vmem>>, vector<1x60x90xf32>
    %31 = vector.shape_cast %30 : vector<1x60x90xf32> to vector<60x90xf32>
    %cst_34 = arith.constant dense<0.000000e+00> : vector<8x90xf32>
    %32 = tpu.matmul %29, %31, %cst_34 {dimension_numbers = #tpu.dot_dimension_numbers<[1], [0], [0], [1], [0, 0, 1, 1], [], []>} : vector<8x60xf32>, vector<60x90xf32>, vector<8x90xf32> -> vector<8x90xf32>
    %33 = arith.addf %28, %32 : vector<8x90xf32>
    %c16 = arith.constant 16 : index
    %c0_35 = arith.constant 0 : index
    %34 = vector.load %arg12[%c16, %c0_35] : memref<72x60xf32, #tpu.memory_space<vmem>>, vector<8x60xf32>
    %c2_36 = arith.constant 2 : index
    %c0_37 = arith.constant 0 : index
    %c0_38 = arith.constant 0 : index
    %35 = vector.load %arg3[%c2_36, %c0_37, %c0_38] : memref<9x60x90xf32, #tpu.memory_space<vmem>>, vector<1x60x90xf32>
    %36 = vector.shape_cast %35 : vector<1x60x90xf32> to vector<60x90xf32>
    %cst_39 = arith.constant dense<0.000000e+00> : vector<8x90xf32>
    %37 = tpu.matmul %34, %36, %cst_39 {dimension_numbers = #tpu.dot_dimension_numbers<[1], [0], [0], [1], [0, 0, 1, 1], [], []>} : vector<8x60xf32>, vector<60x90xf32>, vector<8x90xf32> -> vector<8x90xf32>
    %38 = arith.addf %33, %37 : vector<8x90xf32>
    %c24 = arith.constant 24 : index
    %c0_40 = arith.constant 0 : index
    %39 = vector.load %arg12[%c24, %c0_40] : memref<72x60xf32, #tpu.memory_space<vmem>>, vector<8x60xf32>
    %c3_41 = arith.constant 3 : index
    %c0_42 = arith.constant 0 : index
    %c0_43 = arith.constant 0 : index
    %40 = vector.load %arg3[%c3_41, %c0_42, %c0_43] : memref<9x60x90xf32, #tpu.memory_space<vmem>>, vector<1x60x90xf32>
    %41 = vector.shape_cast %40 : vector<1x60x90xf32> to vector<60x90xf32>
    %cst_44 = arith.constant dense<0.000000e+00> : vector<8x90xf32>
    %42 = tpu.matmul %39, %41, %cst_44 {dimension_numbers = #tpu.dot_dimension_numbers<[1], [0], [0], [1], [0, 0, 1, 1], [], []>} : vector<8x60xf32>, vector<60x90xf32>, vector<8x90xf32> -> vector<8x90xf32>
    %43 = arith.addf %38, %42 : vector<8x90xf32>
    %c32 = arith.constant 32 : index
    %c0_45 = arith.constant 0 : index
    %44 = vector.load %arg12[%c32, %c0_45] : memref<72x60xf32, #tpu.memory_space<vmem>>, vector<8x60xf32>
    %c4 = arith.constant 4 : index
    %c0_46 = arith.constant 0 : index
    %c0_47 = arith.constant 0 : index
    %45 = vector.load %arg3[%c4, %c0_46, %c0_47] : memref<9x60x90xf32, #tpu.memory_space<vmem>>, vector<1x60x90xf32>
    %46 = vector.shape_cast %45 : vector<1x60x90xf32> to vector<60x90xf32>
    %cst_48 = arith.constant dense<0.000000e+00> : vector<8x90xf32>
    %47 = tpu.matmul %44, %46, %cst_48 {dimension_numbers = #tpu.dot_dimension_numbers<[1], [0], [0], [1], [0, 0, 1, 1], [], []>} : vector<8x60xf32>, vector<60x90xf32>, vector<8x90xf32> -> vector<8x90xf32>
    %48 = arith.addf %43, %47 : vector<8x90xf32>
    %c40 = arith.constant 40 : index
    %c0_49 = arith.constant 0 : index
    %49 = vector.load %arg12[%c40, %c0_49] : memref<72x60xf32, #tpu.memory_space<vmem>>, vector<8x60xf32>
    %c5 = arith.constant 5 : index
    %c0_50 = arith.constant 0 : index
    %c0_51 = arith.constant 0 : index
    %50 = vector.load %arg3[%c5, %c0_50, %c0_51] : memref<9x60x90xf32, #tpu.memory_space<vmem>>, vector<1x60x90xf32>
    %51 = vector.shape_cast %50 : vector<1x60x90xf32> to vector<60x90xf32>
    %cst_52 = arith.constant dense<0.000000e+00> : vector<8x90xf32>
    %52 = tpu.matmul %49, %51, %cst_52 {dimension_numbers = #tpu.dot_dimension_numbers<[1], [0], [0], [1], [0, 0, 1, 1], [], []>} : vector<8x60xf32>, vector<60x90xf32>, vector<8x90xf32> -> vector<8x90xf32>
    %53 = arith.addf %48, %52 : vector<8x90xf32>
    %c48 = arith.constant 48 : index
    %c0_53 = arith.constant 0 : index
    %54 = vector.load %arg12[%c48, %c0_53] : memref<72x60xf32, #tpu.memory_space<vmem>>, vector<8x60xf32>
    %c6 = arith.constant 6 : index
    %c0_54 = arith.constant 0 : index
    %c0_55 = arith.constant 0 : index
    %55 = vector.load %arg3[%c6, %c0_54, %c0_55] : memref<9x60x90xf32, #tpu.memory_space<vmem>>, vector<1x60x90xf32>
    %56 = vector.shape_cast %55 : vector<1x60x90xf32> to vector<60x90xf32>
    %cst_56 = arith.constant dense<0.000000e+00> : vector<8x90xf32>
    %57 = tpu.matmul %54, %56, %cst_56 {dimension_numbers = #tpu.dot_dimension_numbers<[1], [0], [0], [1], [0, 0, 1, 1], [], []>} : vector<8x60xf32>, vector<60x90xf32>, vector<8x90xf32> -> vector<8x90xf32>
    %58 = arith.addf %53, %57 : vector<8x90xf32>
    %c56 = arith.constant 56 : index
    %c0_57 = arith.constant 0 : index
    %59 = vector.load %arg12[%c56, %c0_57] : memref<72x60xf32, #tpu.memory_space<vmem>>, vector<8x60xf32>
    %c7 = arith.constant 7 : index
    %c0_58 = arith.constant 0 : index
    %c0_59 = arith.constant 0 : index
    %60 = vector.load %arg3[%c7, %c0_58, %c0_59] : memref<9x60x90xf32, #tpu.memory_space<vmem>>, vector<1x60x90xf32>
    %61 = vector.shape_cast %60 : vector<1x60x90xf32> to vector<60x90xf32>
    %cst_60 = arith.constant dense<0.000000e+00> : vector<8x90xf32>
    %62 = tpu.matmul %59, %61, %cst_60 {dimension_numbers = #tpu.dot_dimension_numbers<[1], [0], [0], [1], [0, 0, 1, 1], [], []>} : vector<8x60xf32>, vector<60x90xf32>, vector<8x90xf32> -> vector<8x90xf32>
    %63 = arith.addf %58, %62 : vector<8x90xf32>
    %c64 = arith.constant 64 : index
    %c0_61 = arith.constant 0 : index
    %64 = vector.load %arg12[%c64, %c0_61] : memref<72x60xf32, #tpu.memory_space<vmem>>, vector<8x60xf32>
    %c8_62 = arith.constant 8 : index
    %c0_63 = arith.constant 0 : index
    %c0_64 = arith.constant 0 : index
    %65 = vector.load %arg3[%c8_62, %c0_63, %c0_64] : memref<9x60x90xf32, #tpu.memory_space<vmem>>, vector<1x60x90xf32>
    %66 = vector.shape_cast %65 : vector<1x60x90xf32> to vector<60x90xf32>
    %cst_65 = arith.constant dense<0.000000e+00> : vector<8x90xf32>
    %67 = tpu.matmul %64, %66, %cst_65 {dimension_numbers = #tpu.dot_dimension_numbers<[1], [0], [0], [1], [0, 0, 1, 1], [], []>} : vector<8x60xf32>, vector<60x90xf32>, vector<8x90xf32> -> vector<8x90xf32>
    %68 = arith.addf %63, %67 : vector<8x90xf32>
    %c0_66 = arith.constant 0 : index
    %c0_67 = arith.constant 0 : index
    %69 = vector.load %arg4[%c0_66, %c0_67] : memref<1x90xf32, #tpu.memory_space<vmem>>, vector<1x90xf32>
    %70 = vector.broadcast %69 : vector<1x90xf32> to vector<8x90xf32>
    %71 = arith.addf %68, %70 : vector<8x90xf32>
    %cst_68 = arith.constant 0.000000e+00 : f32
    %72 = vector.broadcast %cst_68 : f32 to vector<8x90xf32>
    %73 = arith.maximumf %71, %72 : vector<8x90xf32>
    %c0_69 = arith.constant 0 : index
    %c0_70 = arith.constant 0 : index
    %74 = vector.load %arg13[%c0_69, %c0_70] : memref<8x90xf32, #tpu.memory_space<vmem>>, vector<8x90xf32>
    tpu.vector_store %arg13[%c0_69, %c0_70], %73 {strides = array<i32>} : memref<8x90xf32, #tpu.memory_space<vmem>>, vector<8x90xf32>,
    %c0_71 = arith.constant 0 : index
    %c0_72 = arith.constant 0 : index
    %75 = vector.load %arg13[%c0_71, %c0_72] : memref<8x90xf32, #tpu.memory_space<vmem>>, vector<2x90xf32>
    %c2_73 = arith.constant 2 : index
    %c0_74 = arith.constant 0 : index
    %76 = vector.load %arg13[%c2_73, %c0_74] : memref<8x90xf32, #tpu.memory_space<vmem>>, vector<2x90xf32>
    %77 = arith.maximumf %75, %76 : vector<2x90xf32>
    %c4_75 = arith.constant 4 : index
    %c0_76 = arith.constant 0 : index
    %78 = vector.load %arg13[%c4_75, %c0_76] : memref<8x90xf32, #tpu.memory_space<vmem>>, vector<2x90xf32>
    %79 = arith.maximumf %77, %78 : vector<2x90xf32>
    %c6_77 = arith.constant 6 : index
    %c0_78 = arith.constant 0 : index
    %80 = vector.load %arg13[%c6_77, %c0_78] : memref<8x90xf32, #tpu.memory_space<vmem>>, vector<2x90xf32>
    %81 = arith.maximumf %79, %80 : vector<2x90xf32>
    %c0_79 = arith.constant 0 : index
    %c0_80 = arith.constant 0 : index
    %82 = vector.load %arg5[%c0_79, %c0_80] : memref<90x128xf32, #tpu.memory_space<vmem>>, vector<90x128xf32>
    %cst_81 = arith.constant dense<0.000000e+00> : vector<2x128xf32>
    %83 = tpu.matmul %81, %82, %cst_81 {dimension_numbers = #tpu.dot_dimension_numbers<[1], [0], [0], [1], [0, 0, 1, 1], [], []>} : vector<2x90xf32>, vector<90x128xf32>, vector<2x128xf32> -> vector<2x128xf32>
    %c0_82 = arith.constant 0 : index
    %c0_83 = arith.constant 0 : index
    %84 = vector.load %arg6[%c0_82, %c0_83] : memref<1x128xf32, #tpu.memory_space<vmem>>, vector<1x128xf32>
    %85 = vector.broadcast %84 : vector<1x128xf32> to vector<2x128xf32>
    %86 = arith.addf %83, %85 : vector<2x128xf32>
    %cst_84 = arith.constant 0.000000e+00 : f32
    %87 = vector.broadcast %cst_84 : f32 to vector<2x128xf32>
    %88 = arith.maximumf %86, %87 : vector<2x128xf32>
    %c0_85 = arith.constant 0 : index
    %c0_86 = arith.constant 0 : index
    %89 = vector.load %arg7[%c0_85, %c0_86] : memref<128x64xf32, #tpu.memory_space<vmem>>, vector<128x64xf32>
    %cst_87 = arith.constant dense<0.000000e+00> : vector<2x64xf32>
    %90 = tpu.matmul %88, %89, %cst_87 {dimension_numbers = #tpu.dot_dimension_numbers<[1], [0], [0], [1], [0, 0, 1, 1], [], []>} : vector<2x128xf32>, vector<128x64xf32>, vector<2x64xf32> -> vector<2x64xf32>
    %c0_88 = arith.constant 0 : index
    %c0_89 = arith.constant 0 : index
    %91 = vector.load %arg8[%c0_88, %c0_89] : memref<1x64xf32, #tpu.memory_space<vmem>>, vector<1x64xf32>
    %92 = vector.broadcast %91 : vector<1x64xf32> to vector<2x64xf32>
    %93 = arith.addf %90, %92 : vector<2x64xf32>
    %cst_90 = arith.constant 0.000000e+00 : f32
    %94 = vector.broadcast %cst_90 : f32 to vector<2x64xf32>
    %95 = arith.maximumf %93, %94 : vector<2x64xf32>
    %c0_91 = arith.constant 0 : index
    %c0_92 = arith.constant 0 : index
    %96 = vector.load %arg9[%c0_91, %c0_92] : memref<64x4xf32, #tpu.memory_space<vmem>>, vector<64x4xf32>
    %cst_93 = arith.constant dense<0.000000e+00> : vector<2x4xf32>
    %97 = tpu.matmul %95, %96, %cst_93 {dimension_numbers = #tpu.dot_dimension_numbers<[1], [0], [0], [1], [0, 0, 1, 1], [], []>} : vector<2x64xf32>, vector<64x4xf32>, vector<2x4xf32> -> vector<2x4xf32>
    %c0_94 = arith.constant 0 : index
    %c0_95 = arith.constant 0 : index
    %98 = vector.load %arg10[%c0_94, %c0_95] : memref<1x4xf32, #tpu.memory_space<vmem>>, vector<1x4xf32>
    %99 = vector.broadcast %98 : vector<1x4xf32> to vector<2x4xf32>
    %100 = arith.addf %97, %99 : vector<2x4xf32>
    %c0_96 = arith.constant 0 : index
    %c0_97 = arith.constant 0 : index
    %101 = vector.load %arg11[%c0_96, %c0_97] : memref<2x4xf32, #tpu.memory_space<vmem>>, vector<2x4xf32>
    tpu.vector_store %arg11[%c0_96, %c0_97], %100 {strides = array<i32>} : memref<2x4xf32, #tpu.memory_space<vmem>>, vector<2x4xf32>,
    return
  }
}

</mosaic_0001>

<bundles_post_ra>
// kernel: dqn_forward.2
= control target key start
LH: loop header
LB: loop body
LE: loop exit
PB: predicated region body
PF: predicated region fallthrough
CT: control target
= control target key end

     0   :  { %s2644_s12 = smov 0   ;;  %s3467_s0 = inlined_call_operand.vmem [shape: bf16[2752,27], index: 0, kind: input, shape index: {}]   ;;  %s3468_s1 = inlined_call_operand.vmem [shape: f32[27,30], index: 1, kind: input, shape index: {}]   ;;  %s3469_s2 = inlined_call_operand.vmem [shape: f32[1,30], index: 2, kind: input, shape index: {}]   ;;  %s3470_s3 = inlined_call_operand.vmem [shape: f32[2752,30], index: 3, kind: output, shape index: {}]  }
   0x1 LB: > { %s1981_s13 = sadd.s32 4294967295, %s2622_s12   ;;  %p1985_p0 = scmp.ge.s32.totalorder %s2622_s12, 1  ;;  %s2622_s12 = sphi %s2644_s12, %s13_s12  }
   0x2   : > { %p138_p1 = scmp.lt.s32.totalorder %s2622_s12, 3 }
   0x4   : > { %p139_p2 = pnand %p1985_p0, %p138_p1 }
   0x5   : > { %s162_s18 = smul.u32 (!%p139_p2), 172, %s1981_s13 }
   0x6   : > { %142 = sbr.rel (%p139_p2) target bundleno = 494 (0x1ee), region = 32 }
   0x7   : > { %p163_p3 = scmp.lt.s32.totalorder (!%p139_p2), %s162_s18, 343 }
   0xb   : > { %v521_v0 = vld [vmem:[%s3468_s1 + $0x18] sm:$0x7]  ;;  %vm1043_vm0 = vcmask 1042432   ;;  %v520_v1 = vld [vmem:[%s3468_s1 + $0x10] sm:$0xff]  ;;  %v519_v2 = vld [vmem:[%s3468_s1 + $0x8] sm:$0xff]  ;;  %s3472_s18 = smov (!%p163_p3, %s162_s18), 343 }
   0xc   : > { %2593 = vmatpush.msk.msra.mxu2 %vm1043_vm0, %v521_v0  ;;  %2594 = vmatpush.msk.msra.mxu3 %vm1043_vm0, %v521_v0  ;;  %v518_v3 = vld [vmem:[%s3468_s1] sm:$0xff]  ;;  %s1986_s23 = sshll.u32 %s3472_s18, 2  ;;  %vm526_vm1 = vcmask 220160   ;;  %s1987_s29 = sshll.u32 %s3472_s18, 3  ;;  %vm1752_vm2 = vcmask 244736  }
   0xd   : > { %1988 = vmatpush.msk.msra.mxu0 %vm1043_vm0, %v521_v0  ;;  %2592 = vmatpush.msk.msra.mxu1 %vm1043_vm0, %v521_v0  ;;  %s2670_s26 = scalar_lea.vmem %s3467_s0, %s1986_s23  ;;  %s2783_s5 = scalar_lea.vmem %s3470_s3, %s1987_s29 }
   0xe   : > { %2596 = vmatpush.msra.mxu2 %v520_v1  ;;  %2597 = vmatpush.msra.mxu3 %v520_v1  ;;  %v2549_v4 = vld [vmem:[%s2670_s26 + $0x158] sm:$0xff]   ;;  %v2570_v5 = vld [vmem:[%s2670_s26 + $0x200] sm:$0xff]   ;;  %v2527_v10 = vld [vmem:[%s2670_s26 + $0xa8] sm:$0xff]  }
   0xf   : > { %1060 = vmatpush.msra.mxu0 %v520_v1  ;;  %2595 = vmatpush.msra.mxu1 %v520_v1  ;;  %v2164_v6 = vld [vmem:[%s2670_s26] sm:$0xff]   ;;  %v2337_v7 = vunpack.c.l.bf16 %v2549_v4  ;;  %v2422_v8 = vunpack.c.h.bf16 %v2570_v5  ;;  %v2250_v11 = vunpack.c.h.bf16 %v2527_v10  ;;  %v2571_v12 = vld [vmem:[%s2670_s26 + $0x208] sm:$0xff]   ;;  %v2528_v13 = vld [vmem:[%s2670_s26 + $0xb0] sm:$0xff]   ;;  %v2338_v14 = vunpack.c.h.bf16 %v2549_v4 }
  0x10   : > { %2599 = vmatpush.msra.mxu2 %v519_v2  ;;  %2600 = vmatpush.msra.mxu3 %v519_v2  ;;  %v2165_v9 = vunpack.c.l.bf16 %v2164_v6  ;;  %v2425_v15 = vunpack.c.l.bf16 %v2571_v12  ;;  %v2166_v16 = vunpack.c.h.bf16 %v2164_v6  ;;  %v2253_v17 = vunpack.c.l.bf16 %v2528_v13  ;;  %v2550_v18 = vld [vmem:[%s2670_s26 + $0x160] sm:$0xff]   ;;  %v2507_v19 = vld [vmem:[%s2670_s26 + $0x8] sm:$0xff]   ;;  %v2572_v24 = vld [vmem:[%s2670_s26 + $0x210] sm:$0xff]  }
  0x11   : > { %1061 = vmatpush.msra.mxu0 %v519_v2  ;;  %2598 = vmatpush.msra.mxu1 %v519_v2  ;;  %v2341_v20 = vunpack.c.l.bf16 %v2550_v18  ;;  %v2426_v21 = vunpack.c.h.bf16 %v2571_v12  ;;  %v2169_v22 = vunpack.c.l.bf16 %v2507_v19  ;;  %v2254_v23 = vunpack.c.h.bf16 %v2528_v13  ;;  %v2529_v25 = vld [vmem:[%s2670_s26 + $0xb8] sm:$0xff]   ;;  %v2551_v30 = vld [vmem:[%s2670_s26 + $0x168] sm:$0xff]   ;;  %v2508_v31 = vld [vmem:[%s2670_s26 + $0x10] sm:$0xff]  }
  0x12   : > { %2602 = vmatpush.msra.mxu2 %v518_v3  ;;  %2603 = vmatpush.msra.mxu3 %v518_v3  ;;  %v2342_v26 = vunpack.c.h.bf16 %v2550_v18  ;;  %v2429_v27 = vunpack.c.l.bf16 %v2572_v24  ;;  %v2170_v28 = vunpack.c.h.bf16 %v2507_v19  ;;  %v2257_v29 = vunpack.c.l.bf16 %v2529_v25  ;;  %v2573_v36 = vld [vmem:[%s2670_s26 + $0x218] sm:$0xff]   ;;  %v2530_v37 = vld [vmem:[%s2670_s26 + $0xc0] sm:$0xff]   ;;  %v2552_v42 = vld [vmem:[%s2670_s26 + $0x170] sm:$0xff]  }
  0x13   : > { %1062 = vmatpush.msra.mxu0 %v518_v3  ;;  %2601 = vmatpush.msra.mxu1 %v518_v3  ;;  %v2345_v32 = vunpack.c.l.bf16 %v2551_v30  ;;  %v2430_v33 = vunpack.c.h.bf16 %v2572_v24  ;;  %v2173_v34 = vunpack.c.l.bf16 %v2508_v31  ;;  %v2258_v35 = vunpack.c.h.bf16 %v2529_v25  ;;  %v2509_v43 = vld [vmem:[%s2670_s26 + $0x18] sm:$0xff]   ;;  %v2574_v48 = vld [vmem:[%s2670_s26 + $0x220] sm:$0xff]   ;;  %v2531_v49 = vld [vmem:[%s2670_s26 + $0xc8] sm:$0xff]  }
  0x14   : > { %2075 = vmatmul.msk.f32.vlgmr.msra.gmra.mxu2 %vm526_vm1, %v2337_v7  ;;  %2118 = vmatmul.msk.f32.vlgmr.msra.gmra.mxu3 %vm526_vm1, %v2422_v8  ;;  %v2346_v38 = vunpack.c.h.bf16 %v2551_v30  ;;  %v2433_v39 = vunpack.c.l.bf16 %v2573_v36  ;;  %v2174_v40 = vunpack.c.h.bf16 %v2508_v31  ;;  %v2261_v41 = vunpack.c.l.bf16 %v2530_v37  ;;  %v2553_v54 = vld [vmem:[%s2670_s26 + $0x178] sm:$0xff]   ;;  %v2510_v55 = vld [vmem:[%s2670_s26 + $0x20] sm:$0xff]   ;;  %v2575_v60 = vld [vmem:[%s2670_s26 + $0x228] sm:$0xff]  }
  0x15   : > { %1989 = vmatmul.msk.f32.vlgmr.msra.gmra.mxu0 %vm526_vm1, %v2165_v9  ;;  %2032 = vmatmul.msk.f32.vlgmr.msra.gmra.mxu1 %vm526_vm1, %v2250_v11  ;;  %v2349_v44 = vunpack.c.l.bf16 %v2552_v42  ;;  %v2434_v45 = vunpack.c.h.bf16 %v2573_v36  ;;  %v2177_v46 = vunpack.c.l.bf16 %v2509_v43  ;;  %v2262_v47 = vunpack.c.h.bf16 %v2530_v37  ;;  %v2532_v61 = vld [vmem:[%s2670_s26 + $0xd0] sm:$0xff]   ;;  %v2554_v2 = vld [vmem:[%s2670_s26 + $0x180] sm:$0xff]   ;;  %v2511_v3 = vld [vmem:[%s2670_s26 + $0x28] sm:$0xff]  }
  0x16   : > { %v2350_v50 = vunpack.c.h.bf16 %v2552_v42  ;;  %v2437_v51 = vunpack.c.l.bf16 %v2574_v48  ;;  %v2178_v52 = vunpack.c.h.bf16 %v2509_v43  ;;  %v2265_v53 = vunpack.c.l.bf16 %v2531_v49  ;;  %v2576_v8 = vld [vmem:[%s2670_s26 + $0x230] sm:$0xff]   ;;  %v2533_v9 = vld [vmem:[%s2670_s26 + $0xd8] sm:$0xff]  }
  0x17   : > { %v2353_v56 = vunpack.c.l.bf16 %v2553_v54  ;;  %v2438_v57 = vunpack.c.h.bf16 %v2574_v48  ;;  %v2181_v58 = vunpack.c.l.bf16 %v2510_v55  ;;  %v2266_v59 = vunpack.c.h.bf16 %v2531_v49 }
  0x18   : > { %v2354_v62 = vunpack.c.h.bf16 %v2553_v54  ;;  %v2441_v63 = vunpack.c.l.bf16 %v2575_v60  ;;  %v2182_v0 = vunpack.c.h.bf16 %v2510_v55  ;;  %v2269_v1 = vunpack.c.l.bf16 %v2532_v61 }
  0x19   : > { %v2357_v4 = vunpack.c.l.bf16 %v2554_v2  ;;  %v2442_v5 = vunpack.c.h.bf16 %v2575_v60  ;;  %v2185_v6 = vunpack.c.l.bf16 %v2511_v3  ;;  %v2270_v7 = vunpack.c.h.bf16 %v2532_v61 }
  0x1a   : > { %v2358_v10 = vunpack.c.h.bf16 %v2554_v2  ;;  %v2445_v11 = vunpack.c.l.bf16 %v2576_v8  ;;  %v2186_v12 = vunpack.c.h.bf16 %v2511_v3  ;;  %v2273_v13 = vunpack.c.l.bf16 %v2533_v9 }
  0x1b   : > { %v2274_v19 = vunpack.c.h.bf16 %v2533_v9 }
  0x1c   : > { %2076 = vmatmul.msk.f32.gmra.mxu2 %vm526_vm1, %v2338_v14  ;;  %2119 = vmatmul.msk.f32.gmra.mxu3 %vm526_vm1, %v2425_v15  ;;  %v2555_v14 = vld [vmem:[%s2670_s26 + $0x188] sm:$0xff]   ;;  %v2512_v15 = vld [vmem:[%s2670_s26 + $0x30] sm:$0xff]  }
  0x1d   : > { %1990 = vmatmul.msk.f32.gmra.mxu0 %vm526_vm1, %v2166_v16  ;;  %2033 = vmatmul.msk.f32.gmra.mxu1 %vm526_vm1, %v2253_v17  ;;  %v2361_v16 = vunpack.c.l.bf16 %v2555_v14  ;;  %v2446_v17 = vunpack.c.h.bf16 %v2576_v8  ;;  %v2189_v18 = vunpack.c.l.bf16 %v2512_v15  ;;  %v2190_v24 = vunpack.c.h.bf16 %v2512_v15 }
  0x24   : > { %2077 = vmatmul.msk.f32.gmra.mxu2 %vm526_vm1, %v2341_v20  ;;  %2120 = vmatmul.msk.f32.gmra.mxu3 %vm526_vm1, %v2426_v21  ;;  %v2577_v20 = vld [vmem:[%s2670_s26 + $0x238] sm:$0xff]   ;;  %v2534_v21 = vld [vmem:[%s2670_s26 + $0xe0] sm:$0xff]  }
  0x25   : > { %1991 = vmatmul.msk.f32.gmra.mxu0 %vm526_vm1, %v2169_v22  ;;  %2034 = vmatmul.msk.f32.gmra.mxu1 %vm526_vm1, %v2254_v23  ;;  %v2362_v22 = vunpack.c.h.bf16 %v2555_v14  ;;  %v2449_v23 = vunpack.c.l.bf16 %v2577_v20  ;;  %v2277_v25 = vunpack.c.l.bf16 %v2534_v21  ;;  %v2278_v31 = vunpack.c.h.bf16 %v2534_v21 }
  0x2c   : > { %2078 = vmatmul.msk.f32.gmra.mxu2 %vm526_vm1, %v2342_v26  ;;  %2121 = vmatmul.msk.f32.gmra.mxu3 %vm526_vm1, %v2429_v27  ;;  %v2556_v26 = vld [vmem:[%s2670_s26 + $0x190] sm:$0xff]   ;;  %v2513_v27 = vld [vmem:[%s2670_s26 + $0x38] sm:$0xff]  }
  0x2d   : > { %1992 = vmatmul.msk.f32.gmra.mxu0 %vm526_vm1, %v2170_v28  ;;  %2035 = vmatmul.msk.f32.gmra.mxu1 %vm526_vm1, %v2257_v29  ;;  %v2365_v28 = vunpack.c.l.bf16 %v2556_v26  ;;  %v2450_v29 = vunpack.c.h.bf16 %v2577_v20  ;;  %v2193_v30 = vunpack.c.l.bf16 %v2513_v27  ;;  %v2194_v36 = vunpack.c.h.bf16 %v2513_v27 }
  0x34   : > { %2079 = vmatmul.msk.f32.gmra.mxu2 %vm526_vm1, %v2345_v32  ;;  %2122 = vmatmul.msk.f32.gmra.mxu3 %vm526_vm1, %v2430_v33  ;;  %v2578_v32 = vld [vmem:[%s2670_s26 + $0x240] sm:$0xff]   ;;  %v2535_v33 = vld [vmem:[%s2670_s26 + $0xe8] sm:$0xff]  }
  0x35   : > { %1993 = vmatmul.msk.f32.gmra.mxu0 %vm526_vm1, %v2173_v34  ;;  %2036 = vmatmul.msk.f32.gmra.mxu1 %vm526_vm1, %v2258_v35  ;;  %v2366_v34 = vunpack.c.h.bf16 %v2556_v26  ;;  %v2453_v35 = vunpack.c.l.bf16 %v2578_v32  ;;  %v2281_v37 = vunpack.c.l.bf16 %v2535_v33  ;;  %v2454_v42 = vunpack.c.h.bf16 %v2578_v32 }
  0x3c   : > { %2080 = vmatmul.msk.f32.gmra.mxu2 %vm526_vm1, %v2346_v38  ;;  %2123 = vmatmul.msk.f32.gmra.mxu3 %vm526_vm1, %v2433_v39  ;;  %v2557_v38 = vld [vmem:[%s2670_s26 + $0x198] sm:$0xff]   ;;  %v2514_v39 = vld [vmem:[%s2670_s26 + $0x40] sm:$0xff]  }
  0x3d   : > { %1994 = vmatmul.msk.f32.gmra.mxu0 %vm526_vm1, %v2174_v40  ;;  %2037 = vmatmul.msk.f32.gmra.mxu1 %vm526_vm1, %v2261_v41  ;;  %v2775_v40 = vld [vmem:[%s3469_s2] ss:$0 sm:$0xff]  ;;  %v2369_v41 = vunpack.c.l.bf16 %v2557_v38  ;;  %v2197_v43 = vunpack.c.l.bf16 %v2514_v39 }
  0x44   : > { %2081 = vmatmul.msk.f32.gmra.mxu2 %vm526_vm1, %v2349_v44  ;;  %2124 = vmatmul.msk.f32.gmra.mxu3 %vm526_vm1, %v2434_v45  ;;  %v2282_v44 = vunpack.c.h.bf16 %v2535_v33 }
  0x45   : > { %1995 = vmatmul.msk.f32.gmra.mxu0 %vm526_vm1, %v2177_v46  ;;  %2038 = vmatmul.msk.f32.gmra.mxu1 %vm526_vm1, %v2262_v47 }
  0x4c   : > { %2082 = vmatmul.msk.f32.gmra.mxu2 %vm526_vm1, %v2350_v50  ;;  %2125 = vmatmul.msk.f32.gmra.mxu3 %vm526_vm1, %v2437_v51  ;;  %v2579_v51 = vld [vmem:[%s2670_s26 + $0x248] sm:$0xff]  }
  0x4d   : > { %1996 = vmatmul.msk.f32.gmra.mxu0 %vm526_vm1, %v2178_v52  ;;  %2039 = vmatmul.msk.f32.gmra.mxu1 %vm526_vm1, %v2265_v53  ;;  %v2536_v52 = vld [vmem:[%s2670_s26 + $0xf0] sm:$0xff]  }
  0x4e   : > { %v2285_v60 = vunpack.c.l.bf16 %v2536_v52  ;;  %v2286_v14 = vunpack.c.h.bf16 %v2536_v52 }
  0x54   : > { %2083 = vmatmul.msk.f32.gmra.mxu2 %vm526_vm1, %v2353_v56  ;;  %2126 = vmatmul.msk.f32.gmra.mxu3 %vm526_vm1, %v2438_v57  ;;  %v2370_v57 = vunpack.c.h.bf16 %v2557_v38 }
  0x55   : > { %1997 = vmatmul.msk.f32.gmra.mxu0 %vm526_vm1, %v2181_v58  ;;  %2040 = vmatmul.msk.f32.gmra.mxu1 %vm526_vm1, %v2266_v59  ;;  %v2457_v58 = vunpack.c.l.bf16 %v2579_v51  ;;  %v2198_v59 = vunpack.c.h.bf16 %v2514_v39 }
  0x5c   : > { %2084 = vmatmul.msk.f32.gmra.mxu2 %vm526_vm1, %v2354_v62  ;;  %2127 = vmatmul.msk.f32.gmra.mxu3 %vm526_vm1, %v2441_v63 }
  0x5d   : > { %1998 = vmatmul.msk.f32.gmra.mxu0 %vm526_vm1, %v2182_v0  ;;  %2041 = vmatmul.msk.f32.gmra.mxu1 %vm526_vm1, %v2269_v1 }
  0x64   : > { %2085 = vmatmul.msk.f32.gmra.mxu2 %vm526_vm1, %v2357_v4  ;;  %2128 = vmatmul.msk.f32.gmra.mxu3 %vm526_vm1, %v2442_v5  ;;  %v2558_v5 = vld [vmem:[%s2670_s26 + $0x1a0] sm:$0xff]  }
  0x65   : > { %1999 = vmatmul.msk.f32.gmra.mxu0 %vm526_vm1, %v2185_v6  ;;  %2042 = vmatmul.msk.f32.gmra.mxu1 %vm526_vm1, %v2270_v7  ;;  %v2515_v6 = vld [vmem:[%s2670_s26 + $0x48] sm:$0xff]  }
  0x6c   : > { %2086 = vmatmul.msk.f32.gmra.mxu2 %vm526_vm1, %v2358_v10  ;;  %2129 = vmatmul.msk.f32.gmra.mxu3 %vm526_vm1, %v2445_v11  ;;  %v2373_v11 = vunpack.c.l.bf16 %v2558_v5 }
  0x6d   : > { %2000 = vmatmul.msk.f32.gmra.mxu0 %vm526_vm1, %v2186_v12  ;;  %2043 = vmatmul.msk.f32.gmra.mxu1 %vm526_vm1, %v2273_v13  ;;  %v2458_v12 = vunpack.c.h.bf16 %v2579_v51  ;;  %v2201_v13 = vunpack.c.l.bf16 %v2515_v6 }
  0x74   : > { %2087 = vmatmul.msk.f32.gmra.mxu2 %vm526_vm1, %v2361_v16  ;;  %2130 = vmatmul.msk.f32.gmra.mxu3 %vm526_vm1, %v2446_v17 }
  0x75   : > { %2001 = vmatmul.msk.f32.gmra.mxu0 %vm526_vm1, %v2189_v18  ;;  %2044 = vmatmul.msk.f32.gmra.mxu1 %vm526_vm1, %v2274_v19 }
  0x7c   : > { %2088 = vmatmul.msk.f32.gmra.mxu2 %vm526_vm1, %v2362_v22  ;;  %2131 = vmatmul.msk.f32.gmra.mxu3 %vm526_vm1, %v2449_v23  ;;  %v2580_v23 = vld [vmem:[%s2670_s26 + $0x250] sm:$0xff]  }
  0x7d   : > { %2002 = vmatmul.msk.f32.gmra.mxu0 %vm526_vm1, %v2190_v24  ;;  %2045 = vmatmul.msk.f32.gmra.mxu1 %vm526_vm1, %v2277_v25  ;;  %v2537_v24 = vld [vmem:[%s2670_s26 + $0xf8] sm:$0xff]  }
  0x7e   : > { %v2289_v32 = vunpack.c.l.bf16 %v2537_v24  ;;  %v2290_v51 = vunpack.c.h.bf16 %v2537_v24 }
  0x84   : > { %2089 = vmatmul.msk.f32.gmra.mxu2 %vm526_vm1, %v2365_v28  ;;  %2132 = vmatmul.msk.f32.gmra.mxu3 %vm526_vm1, %v2450_v29  ;;  %v2374_v29 = vunpack.c.h.bf16 %v2558_v5 }
  0x85   : > { %2003 = vmatmul.msk.f32.gmra.mxu0 %vm526_vm1, %v2193_v30  ;;  %2046 = vmatmul.msk.f32.gmra.mxu1 %vm526_vm1, %v2278_v31  ;;  %v2461_v30 = vunpack.c.l.bf16 %v2580_v23  ;;  %v2202_v31 = vunpack.c.h.bf16 %v2515_v6 }
  0x8c   : > { %2090 = vmatmul.msk.f32.gmra.mxu2 %vm526_vm1, %v2366_v34  ;;  %2133 = vmatmul.msk.f32.gmra.mxu3 %vm526_vm1, %v2453_v35 }
  0x8d   : > { %2004 = vmatmul.msk.f32.gmra.mxu0 %vm526_vm1, %v2194_v36  ;;  %2047 = vmatmul.msk.f32.gmra.mxu1 %vm526_vm1, %v2281_v37 }
  0x92   : > { %v1064_v45 = vpop.f32.mrf.mxu0  ;;  %v1193_v46 = vpop.f32.mrf.mxu1 }
  0x93   : > { %v1065_v47 = vadd.f32 %v2775_v40, %v1064_v45  ;;  %v1194_v48 = vadd.f32 %v2775_v40, %v1193_v46 }
  0x94   : > { %2091 = vmatmul.msk.f32.gmra.mxu2 %vm526_vm1, %v2369_v41  ;;  %2134 = vmatmul.msk.f32.gmra.mxu3 %vm526_vm1, %v2454_v42  ;;  %v2559_v42 = vld [vmem:[%s2670_s26 + $0x1a8] sm:$0xff]  }
  0x95   : > { %v1580_v49 = vmax.f32 %v1065_v47, 0.0  ;;  %v1623_v50 = vmax.f32 %v1194_v48, 0.0  ;;  %2005 = vmatmul.msk.f32.gmra.mxu0 %vm526_vm1, %v2197_v43  ;;  %2048 = vmatmul.msk.f32.gmra.mxu1 %vm526_vm1, %v2282_v44  ;;  %v2516_v43 = vld [vmem:[%s2670_s26 + $0x50] sm:$0xff]   ;;  %v2377_v48 = vunpack.c.l.bf16 %v2559_v42 }
  0x97   : > { %1753 = vst.msk [vmem:[%s2783_s5] sm:$0xff] %vm1752_vm2, %v1580_v49  ;;  %v1322_v53 = vpop.f32.mrf.mxu2  ;;  %v1451_v54 = vpop.f32.mrf.mxu3  ;;  %v2462_v49 = vunpack.c.h.bf16 %v2580_v23 }
  0x98   : > { %1796 = vst.msk [vmem:[%s2783_s5 + $0x158] sm:$0xff] %vm1752_vm2, %v1623_v50  ;;  %v1323_v55 = vadd.f32 %v2775_v40, %v1322_v53  ;;  %v1452_v56 = vadd.f32 %v2775_v40, %v1451_v54  ;;  %v2205_v50 = vunpack.c.l.bf16 %v2516_v43 }
  0x9a   : > { %v1666_v61 = vmax.f32 %v1323_v55, 0.0  ;;  %v1709_v62 = vmax.f32 %v1452_v56, 0.0  ;;  %v1067_v63 = vpop.f32.mrf.mxu0  ;;  %v1196_v0 = vpop.f32.mrf.mxu1 }
  0x9b   : > { %v1068_v1 = vadd.f32 %v2775_v40, %v1067_v63  ;;  %v1197_v2 = vadd.f32 %v2775_v40, %v1196_v0 }
  0x9c   : > { %1839 = vst.msk [vmem:[%s2783_s5 + $0x2b0] sm:$0xff] %vm1752_vm2, %v1666_v61  ;;  %2092 = vmatmul.msk.f32.gmra.mxu2 %vm526_vm1, %v2370_v57  ;;  %2135 = vmatmul.msk.f32.gmra.mxu3 %vm526_vm1, %v2457_v58  ;;  %v2538_v61 = vld [vmem:[%s2670_s26 + $0x100] sm:$0xff]  }
  0x9d   : > { %1882 = vst.msk [vmem:[%s2783_s5 + $0x408] sm:$0xff] %vm1752_vm2, %v1709_v62  ;;  %v1581_v3 = vmax.f32 %v1068_v1, 0.0  ;;  %v1624_v4 = vmax.f32 %v1197_v2, 0.0  ;;  %2006 = vmatmul.msk.f32.gmra.mxu0 %vm526_vm1, %v2198_v59  ;;  %2049 = vmatmul.msk.f32.gmra.mxu1 %vm526_vm1, %v2285_v60  ;;  %v2581_v60 = vld [vmem:[%s2670_s26 + $0x258] sm:$0xff]   ;;  %v2378_v2 = vunpack.c.h.bf16 %v2559_v42  ;;  %v2293_v5 = vunpack.c.l.bf16 %v2538_v61 }
  0x9e   : > { %v2294_v23 = vunpack.c.h.bf16 %v2538_v61 }
  0x9f   : > { %1754 = vst.msk [vmem:[%s2783_s5 + $0x8] sm:$0xff] %vm1752_vm2, %v1581_v3  ;;  %v1325_v7 = vpop.f32.mrf.mxu2  ;;  %v1454_v8 = vpop.f32.mrf.mxu3  ;;  %v2465_v3 = vunpack.c.l.bf16 %v2581_v60 }
  0xa0   : > { %1797 = vst.msk [vmem:[%s2783_s5 + $0x160] sm:$0xff] %vm1752_vm2, %v1624_v4  ;;  %v1326_v9 = vadd.f32 %v2775_v40, %v1325_v7  ;;  %v1455_v10 = vadd.f32 %v2775_v40, %v1454_v8  ;;  %v2206_v4 = vunpack.c.h.bf16 %v2516_v43 }
  0xa2   : > { %v1667_v15 = vmax.f32 %v1326_v9, 0.0  ;;  %v1710_v16 = vmax.f32 %v1455_v10, 0.0  ;;  %v1070_v17 = vpop.f32.mrf.mxu0  ;;  %v1199_v18 = vpop.f32.mrf.mxu1 }
  0xa3   : > { %v1071_v19 = vadd.f32 %v2775_v40, %v1070_v17  ;;  %v1200_v20 = vadd.f32 %v2775_v40, %v1199_v18 }
  0xa4   : > { %1840 = vst.msk [vmem:[%s2783_s5 + $0x2b8] sm:$0xff] %vm1752_vm2, %v1667_v15  ;;  %2093 = vmatmul.msk.f32.gmra.mxu2 %vm526_vm1, %v2373_v11  ;;  %2136 = vmatmul.msk.f32.gmra.mxu3 %vm526_vm1, %v2458_v12  ;;  %v2517_v15 = vld [vmem:[%s2670_s26 + $0x58] sm:$0xff]  }
  0xa5   : > { %1883 = vst.msk [vmem:[%s2783_s5 + $0x410] sm:$0xff] %vm1752_vm2, %v1710_v16  ;;  %v1582_v21 = vmax.f32 %v1071_v19, 0.0  ;;  %v1625_v22 = vmax.f32 %v1200_v20, 0.0  ;;  %2007 = vmatmul.msk.f32.gmra.mxu0 %vm526_vm1, %v2201_v13  ;;  %2050 = vmatmul.msk.f32.gmra.mxu1 %vm526_vm1, %v2286_v14  ;;  %v2560_v14 = vld [vmem:[%s2670_s26 + $0x1b0] sm:$0xff]  }
  0xa6   : > { %v2381_v20 = vunpack.c.l.bf16 %v2560_v14 }
  0xa7   : > { %1755 = vst.msk [vmem:[%s2783_s5 + $0x10] sm:$0xff] %vm1752_vm2, %v1582_v21  ;;  %v1328_v25 = vpop.f32.mrf.mxu2  ;;  %v1457_v26 = vpop.f32.mrf.mxu3  ;;  %v2466_v21 = vunpack.c.h.bf16 %v2581_v60 }
  0xa8   : > { %1798 = vst.msk [vmem:[%s2783_s5 + $0x168] sm:$0xff] %vm1752_vm2, %v1625_v22  ;;  %v1329_v27 = vadd.f32 %v2775_v40, %v1328_v25  ;;  %v1458_v28 = vadd.f32 %v2775_v40, %v1457_v26  ;;  %v2209_v22 = vunpack.c.l.bf16 %v2517_v15 }
  0xaa   : > { %v1668_v33 = vmax.f32 %v1329_v27, 0.0  ;;  %v1711_v34 = vmax.f32 %v1458_v28, 0.0  ;;  %v1073_v35 = vpop.f32.mrf.mxu0  ;;  %v1202_v36 = vpop.f32.mrf.mxu1 }
  0xab   : > { %v1074_v37 = vadd.f32 %v2775_v40, %v1073_v35  ;;  %v1203_v38 = vadd.f32 %v2775_v40, %v1202_v36 }
  0xac   : > { %1841 = vst.msk [vmem:[%s2783_s5 + $0x2c0] sm:$0xff] %vm1752_vm2, %v1668_v33  ;;  %2094 = vmatmul.msk.f32.gmra.mxu2 %vm526_vm1, %v2374_v29  ;;  %2137 = vmatmul.msk.f32.gmra.mxu3 %vm526_vm1, %v2461_v30  ;;  %v2539_v33 = vld [vmem:[%s2670_s26 + $0x108] sm:$0xff]  }
  0xad   : > { %1884 = vst.msk [vmem:[%s2783_s5 + $0x418] sm:$0xff] %vm1752_vm2, %v1711_v34  ;;  %v1583_v39 = vmax.f32 %v1074_v37, 0.0  ;;  %v1626_v41 = vmax.f32 %v1203_v38, 0.0  ;;  %2008 = vmatmul.msk.f32.gmra.mxu0 %vm526_vm1, %v2202_v31  ;;  %2051 = vmatmul.msk.f32.gmra.mxu1 %vm526_vm1, %v2289_v32  ;;  %v2582_v32 = vld [vmem:[%s2670_s26 + $0x260] sm:$0xff]   ;;  %v2382_v38 = vunpack.c.h.bf16 %v2560_v14  ;;  %v2297_v42 = vunpack.c.l.bf16 %v2539_v33 }
  0xaf   : > { %1756 = vst.msk [vmem:[%s2783_s5 + $0x18] sm:$0xff] %vm1752_vm2, %v1583_v39  ;;  %v1331_v44 = vpop.f32.mrf.mxu2  ;;  %v1460_v45 = vpop.f32.mrf.mxu3  ;;  %v2469_v39 = vunpack.c.l.bf16 %v2582_v32 }
  0xb0   : > { %1799 = vst.msk [vmem:[%s2783_s5 + $0x170] sm:$0xff] %vm1752_vm2, %v1626_v41  ;;  %v1332_v46 = vadd.f32 %v2775_v40, %v1331_v44  ;;  %v1461_v47 = vadd.f32 %v2775_v40, %v1460_v45  ;;  %v2210_v41 = vunpack.c.h.bf16 %v2517_v15 }
  0xb2   : > { %v1669_v52 = vmax.f32 %v1332_v46, 0.0  ;;  %v1712_v53 = vmax.f32 %v1461_v47, 0.0  ;;  %v1076_v54 = vpop.f32.mrf.mxu0  ;;  %v1205_v55 = vpop.f32.mrf.mxu1 }
  0xb3   : > { %v1077_v56 = vadd.f32 %v2775_v40, %v1076_v54  ;;  %v1206_v57 = vadd.f32 %v2775_v40, %v1205_v55  ;;  %v2470_v55 = vunpack.c.h.bf16 %v2582_v32 }
  0xb4   : > { %1842 = vst.msk [vmem:[%s2783_s5 + $0x2c8] sm:$0xff] %vm1752_vm2, %v1669_v52  ;;  %2095 = vmatmul.msk.f32.gmra.mxu2 %vm526_vm1, %v2377_v48  ;;  %2138 = vmatmul.msk.f32.gmra.mxu3 %vm526_vm1, %v2462_v49  ;;  %v2518_v52 = vld [vmem:[%s2670_s26 + $0x60] sm:$0xff]  }
  0xb5   : > { %1885 = vst.msk [vmem:[%s2783_s5 + $0x420] sm:$0xff] %vm1752_vm2, %v1712_v53  ;;  %v1584_v58 = vmax.f32 %v1077_v56, 0.0  ;;  %v1627_v59 = vmax.f32 %v1206_v57, 0.0  ;;  %2009 = vmatmul.msk.f32.gmra.mxu0 %vm526_vm1, %v2205_v50  ;;  %2052 = vmatmul.msk.f32.gmra.mxu1 %vm526_vm1, %v2290_v51  ;;  %v2561_v51 = vld [vmem:[%s2670_s26 + $0x1b8] sm:$0xff]   ;;  %v2213_v60 = vunpack.c.l.bf16 %v2518_v52 }
  0xb7   : > { %1757 = vst.msk [vmem:[%s2783_s5 + $0x20] sm:$0xff] %vm1752_vm2, %v1584_v58  ;;  %v1334_v62 = vpop.f32.mrf.mxu2  ;;  %v1463_v63 = vpop.f32.mrf.mxu3  ;;  %v2385_v58 = vunpack.c.l.bf16 %v2561_v51 }
  0xb8   : > { %1800 = vst.msk [vmem:[%s2783_s5 + $0x178] sm:$0xff] %vm1752_vm2, %v1627_v59  ;;  %v1335_v0 = vadd.f32 %v2775_v40, %v1334_v62  ;;  %v1464_v1 = vadd.f32 %v2775_v40, %v1463_v63  ;;  %v2298_v59 = vunpack.c.h.bf16 %v2539_v33 }
  0xba   : > { %v1670_v6 = vmax.f32 %v1335_v0, 0.0  ;;  %v1713_v7 = vmax.f32 %v1464_v1, 0.0  ;;  %v1079_v8 = vpop.f32.mrf.mxu0  ;;  %v1208_v9 = vpop.f32.mrf.mxu1 }
  0xbb   : > { %v1080_v10 = vadd.f32 %v2775_v40, %v1079_v8  ;;  %v1209_v11 = vadd.f32 %v2775_v40, %v1208_v9 }
  0xbc   : > { %1843 = vst.msk [vmem:[%s2783_s5 + $0x2d0] sm:$0xff] %vm1752_vm2, %v1670_v6  ;;  %2096 = vmatmul.msk.f32.gmra.mxu2 %vm526_vm1, %v2378_v2  ;;  %2139 = vmatmul.msk.f32.gmra.mxu3 %vm526_vm1, %v2465_v3  ;;  %v2540_v6 = vld [vmem:[%s2670_s26 + $0x110] sm:$0xff]  }
  0xbd   : > { %1886 = vst.msk [vmem:[%s2783_s5 + $0x428] sm:$0xff] %vm1752_vm2, %v1713_v7  ;;  %v1585_v12 = vmax.f32 %v1080_v10, 0.0  ;;  %v1628_v13 = vmax.f32 %v1209_v11, 0.0  ;;  %2010 = vmatmul.msk.f32.gmra.mxu0 %vm526_vm1, %v2206_v4  ;;  %2053 = vmatmul.msk.f32.gmra.mxu1 %vm526_vm1, %v2293_v5  ;;  %v2583_v5 = vld [vmem:[%s2670_s26 + $0x268] sm:$0xff]   ;;  %v2386_v11 = vunpack.c.h.bf16 %v2561_v51  ;;  %v2301_v14 = vunpack.c.l.bf16 %v2540_v6 }
  0xbe   : > { %v2302_v32 = vunpack.c.h.bf16 %v2540_v6 }
  0xbf   : > { %1758 = vst.msk [vmem:[%s2783_s5 + $0x28] sm:$0xff] %vm1752_vm2, %v1585_v12  ;;  %v1337_v16 = vpop.f32.mrf.mxu2  ;;  %v1466_v17 = vpop.f32.mrf.mxu3  ;;  %v2473_v12 = vunpack.c.l.bf16 %v2583_v5 }
  0xc0   : > { %1801 = vst.msk [vmem:[%s2783_s5 + $0x180] sm:$0xff] %vm1752_vm2, %v1628_v13  ;;  %v1338_v18 = vadd.f32 %v2775_v40, %v1337_v16  ;;  %v1467_v19 = vadd.f32 %v2775_v40, %v1466_v17  ;;  %v2214_v13 = vunpack.c.h.bf16 %v2518_v52 }
  0xc2   : > { %v1671_v24 = vmax.f32 %v1338_v18, 0.0  ;;  %v1714_v25 = vmax.f32 %v1467_v19, 0.0  ;;  %v1082_v26 = vpop.f32.mrf.mxu0  ;;  %v1211_v27 = vpop.f32.mrf.mxu1 }
  0xc3   : > { %v1083_v28 = vadd.f32 %v2775_v40, %v1082_v26  ;;  %v1212_v29 = vadd.f32 %v2775_v40, %v1211_v27 }
  0xc4   : > { %1844 = vst.msk [vmem:[%s2783_s5 + $0x2d8] sm:$0xff] %vm1752_vm2, %v1671_v24  ;;  %2097 = vmatmul.msk.f32.gmra.mxu2 %vm526_vm1, %v2381_v20  ;;  %2140 = vmatmul.msk.f32.gmra.mxu3 %vm526_vm1, %v2466_v21  ;;  %v2519_v24 = vld [vmem:[%s2670_s26 + $0x68] sm:$0xff]  }
  0xc5   : > { %1887 = vst.msk [vmem:[%s2783_s5 + $0x430] sm:$0xff] %vm1752_vm2, %v1714_v25  ;;  %v1586_v30 = vmax.f32 %v1083_v28, 0.0  ;;  %v1629_v31 = vmax.f32 %v1212_v29, 0.0  ;;  %2011 = vmatmul.msk.f32.gmra.mxu0 %vm526_vm1, %v2209_v22  ;;  %2054 = vmatmul.msk.f32.gmra.mxu1 %vm526_vm1, %v2294_v23  ;;  %v2562_v23 = vld [vmem:[%s2670_s26 + $0x1c0] sm:$0xff]  }
  0xc6   : > { %v2389_v29 = vunpack.c.l.bf16 %v2562_v23 }
  0xc7   : > { %1759 = vst.msk [vmem:[%s2783_s5 + $0x30] sm:$0xff] %vm1752_vm2, %v1586_v30  ;;  %v1340_v34 = vpop.f32.mrf.mxu2  ;;  %v1469_v35 = vpop.f32.mrf.mxu3  ;;  %v2474_v30 = vunpack.c.h.bf16 %v2583_v5 }
  0xc8   : > { %1802 = vst.msk [vmem:[%s2783_s5 + $0x188] sm:$0xff] %vm1752_vm2, %v1629_v31  ;;  %v1341_v36 = vadd.f32 %v2775_v40, %v1340_v34  ;;  %v1470_v37 = vadd.f32 %v2775_v40, %v1469_v35  ;;  %v2217_v31 = vunpack.c.l.bf16 %v2519_v24 }
  0xca   : > { %v1672_v43 = vmax.f32 %v1341_v36, 0.0  ;;  %v1715_v44 = vmax.f32 %v1470_v37, 0.0  ;;  %v1085_v45 = vpop.f32.mrf.mxu0  ;;  %v1214_v46 = vpop.f32.mrf.mxu1 }
  0xcb   : > { %v1086_v47 = vadd.f32 %v2775_v40, %v1085_v45  ;;  %v1215_v48 = vadd.f32 %v2775_v40, %v1214_v46 }
  0xcc   : > { %1845 = vst.msk [vmem:[%s2783_s5 + $0x2e0] sm:$0xff] %vm1752_vm2, %v1672_v43  ;;  %2098 = vmatmul.msk.f32.gmra.mxu2 %vm526_vm1, %v2382_v38  ;;  %2141 = vmatmul.msk.f32.gmra.mxu3 %vm526_vm1, %v2469_v39  ;;  %v2541_v43 = vld [vmem:[%s2670_s26 + $0x118] sm:$0xff]  }
  0xcd   : > { %1888 = vst.msk [vmem:[%s2783_s5 + $0x438] sm:$0xff] %vm1752_vm2, %v1715_v44  ;;  %v1587_v49 = vmax.f32 %v1086_v47, 0.0  ;;  %v1630_v50 = vmax.f32 %v1215_v48, 0.0  ;;  %2012 = vmatmul.msk.f32.gmra.mxu0 %vm526_vm1, %v2210_v41  ;;  %2055 = vmatmul.msk.f32.gmra.mxu1 %vm526_vm1, %v2297_v42  ;;  %v2584_v42 = vld [vmem:[%s2670_s26 + $0x270] sm:$0xff]   ;;  %v2390_v48 = vunpack.c.h.bf16 %v2562_v23  ;;  %v2305_v51 = vunpack.c.l.bf16 %v2541_v43 }
  0xce   : > { %v2306_v5 = vunpack.c.h.bf16 %v2541_v43 }
  0xcf   : > { %1760 = vst.msk [vmem:[%s2783_s5 + $0x38] sm:$0xff] %vm1752_vm2, %v1587_v49  ;;  %v1343_v53 = vpop.f32.mrf.mxu2  ;;  %v1472_v54 = vpop.f32.mrf.mxu3  ;;  %v2477_v49 = vunpack.c.l.bf16 %v2584_v42 }
  0xd0   : > { %1803 = vst.msk [vmem:[%s2783_s5 + $0x190] sm:$0xff] %vm1752_vm2, %v1630_v50  ;;  %v1344_v56 = vadd.f32 %v2775_v40, %v1343_v53  ;;  %v1473_v57 = vadd.f32 %v2775_v40, %v1472_v54  ;;  %v2218_v50 = vunpack.c.h.bf16 %v2519_v24 }
  0xd2   : > { %v1673_v61 = vmax.f32 %v1344_v56, 0.0  ;;  %v1716_v62 = vmax.f32 %v1473_v57, 0.0  ;;  %v1088_v63 = vpop.f32.mrf.mxu0  ;;  %v1217_v0 = vpop.f32.mrf.mxu1 }
  0xd3   : > { %v1089_v1 = vadd.f32 %v2775_v40, %v1088_v63  ;;  %v1218_v2 = vadd.f32 %v2775_v40, %v1217_v0 }
  0xd4   : > { %1846 = vst.msk [vmem:[%s2783_s5 + $0x2e8] sm:$0xff] %vm1752_vm2, %v1673_v61  ;;  %2099 = vmatmul.msk.f32.gmra.mxu2 %vm526_vm1, %v2385_v58  ;;  %2142 = vmatmul.msk.f32.gmra.mxu3 %vm526_vm1, %v2470_v55  ;;  %v2520_v61 = vld [vmem:[%s2670_s26 + $0x70] sm:$0xff]  }
  0xd5   : > { %1889 = vst.msk [vmem:[%s2783_s5 + $0x440] sm:$0xff] %vm1752_vm2, %v1716_v62  ;;  %v1588_v3 = vmax.f32 %v1089_v1, 0.0  ;;  %v1631_v4 = vmax.f32 %v1218_v2, 0.0  ;;  %2013 = vmatmul.msk.f32.gmra.mxu0 %vm526_vm1, %v2213_v60  ;;  %2056 = vmatmul.msk.f32.gmra.mxu1 %vm526_vm1, %v2298_v59  ;;  %v2563_v60 = vld [vmem:[%s2670_s26 + $0x1c8] sm:$0xff]  }
  0xd6   : > { %v2393_v2 = vunpack.c.l.bf16 %v2563_v60 }
  0xd7   : > { %1761 = vst.msk [vmem:[%s2783_s5 + $0x40] sm:$0xff] %vm1752_vm2, %v1588_v3  ;;  %v1346_v7 = vpop.f32.mrf.mxu2  ;;  %v1475_v8 = vpop.f32.mrf.mxu3  ;;  %v2478_v3 = vunpack.c.h.bf16 %v2584_v42 }
  0xd8   : > { %1804 = vst.msk [vmem:[%s2783_s5 + $0x198] sm:$0xff] %vm1752_vm2, %v1631_v4  ;;  %v1347_v9 = vadd.f32 %v2775_v40, %v1346_v7  ;;  %v1476_v10 = vadd.f32 %v2775_v40, %v1475_v8  ;;  %v2221_v4 = vunpack.c.l.bf16 %v2520_v61 }
  0xda   : > { %v1674_v15 = vmax.f32 %v1347_v9, 0.0  ;;  %v1717_v16 = vmax.f32 %v1476_v10, 0.0  ;;  %v1091_v17 = vpop.f32.mrf.mxu0  ;;  %v1220_v18 = vpop.f32.mrf.mxu1 }
  0xdb   : > { %v1092_v19 = vadd.f32 %v2775_v40, %v1091_v17  ;;  %v1221_v20 = vadd.f32 %v2775_v40, %v1220_v18 }
  0xdc   : > { %1847 = vst.msk [vmem:[%s2783_s5 + $0x2f0] sm:$0xff] %vm1752_vm2, %v1674_v15  ;;  %2100 = vmatmul.msk.f32.gmra.mxu2 %vm526_vm1, %v2386_v11  ;;  %2143 = vmatmul.msk.f32.gmra.mxu3 %vm526_vm1, %v2473_v12  ;;  %v2542_v15 = vld [vmem:[%s2670_s26 + $0x120] sm:$0xff]  }
  0xdd   : > { %1890 = vst.msk [vmem:[%s2783_s5 + $0x448] sm:$0xff] %vm1752_vm2, %v1717_v16  ;;  %v1589_v21 = vmax.f32 %v1092_v19, 0.0  ;;  %v1632_v22 = vmax.f32 %v1221_v20, 0.0  ;;  %2014 = vmatmul.msk.f32.gmra.mxu0 %vm526_vm1, %v2214_v13  ;;  %2057 = vmatmul.msk.f32.gmra.mxu1 %vm526_vm1, %v2301_v14  ;;  %v2585_v14 = vld [vmem:[%s2670_s26 + $0x278] sm:$0xff]   ;;  %v2394_v20 = vunpack.c.h.bf16 %v2563_v60  ;;  %v2309_v23 = vunpack.c.l.bf16 %v2542_v15 }
  0xde   : > { %v2310_v42 = vunpack.c.h.bf16 %v2542_v15 }
  0xdf   : > { %1762 = vst.msk [vmem:[%s2783_s5 + $0x48] sm:$0xff] %vm1752_vm2, %v1589_v21  ;;  %v1349_v25 = vpop.f32.mrf.mxu2  ;;  %v1478_v26 = vpop.f32.mrf.mxu3  ;;  %v2481_v21 = vunpack.c.l.bf16 %v2585_v14 }
  0xe0   : > { %1805 = vst.msk [vmem:[%s2783_s5 + $0x1a0] sm:$0xff] %vm1752_vm2, %v1632_v22  ;;  %v1350_v27 = vadd.f32 %v2775_v40, %v1349_v25  ;;  %v1479_v28 = vadd.f32 %v2775_v40, %v1478_v26  ;;  %v2222_v22 = vunpack.c.h.bf16 %v2520_v61 }
  0xe2   : > { %v1675_v33 = vmax.f32 %v1350_v27, 0.0  ;;  %v1718_v34 = vmax.f32 %v1479_v28, 0.0  ;;  %v1094_v35 = vpop.f32.mrf.mxu0  ;;  %v1223_v36 = vpop.f32.mrf.mxu1 }
  0xe3   : > { %v1095_v37 = vadd.f32 %v2775_v40, %v1094_v35  ;;  %v1224_v38 = vadd.f32 %v2775_v40, %v1223_v36 }
  0xe4   : > { %1848 = vst.msk [vmem:[%s2783_s5 + $0x2f8] sm:$0xff] %vm1752_vm2, %v1675_v33  ;;  %2101 = vmatmul.msk.f32.gmra.mxu2 %vm526_vm1, %v2389_v29  ;;  %2144 = vmatmul.msk.f32.gmra.mxu3 %vm526_vm1, %v2474_v30  ;;  %v2521_v33 = vld [vmem:[%s2670_s26 + $0x78] sm:$0xff]  }
  0xe5   : > { %1891 = vst.msk [vmem:[%s2783_s5 + $0x450] sm:$0xff] %vm1752_vm2, %v1718_v34  ;;  %v1590_v39 = vmax.f32 %v1095_v37, 0.0  ;;  %v1633_v41 = vmax.f32 %v1224_v38, 0.0  ;;  %2015 = vmatmul.msk.f32.gmra.mxu0 %vm526_vm1, %v2217_v31  ;;  %2058 = vmatmul.msk.f32.gmra.mxu1 %vm526_vm1, %v2302_v32  ;;  %v2564_v32 = vld [vmem:[%s2670_s26 + $0x1d0] sm:$0xff]  }
  0xe6   : > { %v2397_v38 = vunpack.c.l.bf16 %v2564_v32 }
  0xe7   : > { %1763 = vst.msk [vmem:[%s2783_s5 + $0x50] sm:$0xff] %vm1752_vm2, %v1590_v39  ;;  %v1352_v44 = vpop.f32.mrf.mxu2  ;;  %v1481_v45 = vpop.f32.mrf.mxu3  ;;  %v2482_v39 = vunpack.c.h.bf16 %v2585_v14 }
  0xe8   : > { %1806 = vst.msk [vmem:[%s2783_s5 + $0x1a8] sm:$0xff] %vm1752_vm2, %v1633_v41  ;;  %v1353_v46 = vadd.f32 %v2775_v40, %v1352_v44  ;;  %v1482_v47 = vadd.f32 %v2775_v40, %v1481_v45  ;;  %v2225_v41 = vunpack.c.l.bf16 %v2521_v33 }
  0xea   : > { %v1676_v52 = vmax.f32 %v1353_v46, 0.0  ;;  %v1719_v53 = vmax.f32 %v1482_v47, 0.0  ;;  %v1097_v54 = vpop.f32.mrf.mxu0  ;;  %v1226_v55 = vpop.f32.mrf.mxu1 }
  0xeb   : > { %v1098_v56 = vadd.f32 %v2775_v40, %v1097_v54  ;;  %v1227_v57 = vadd.f32 %v2775_v40, %v1226_v55 }
  0xec   : > { %1849 = vst.msk [vmem:[%s2783_s5 + $0x300] sm:$0xff] %vm1752_vm2, %v1676_v52  ;;  %2102 = vmatmul.msk.f32.gmra.mxu2 %vm526_vm1, %v2390_v48  ;;  %2145 = vmatmul.msk.f32.gmra.mxu3 %vm526_vm1, %v2477_v49  ;;  %v2543_v52 = vld [vmem:[%s2670_s26 + $0x128] sm:$0xff]  }
  0xed   : > { %1892 = vst.msk [vmem:[%s2783_s5 + $0x458] sm:$0xff] %vm1752_vm2, %v1719_v53  ;;  %v1591_v58 = vmax.f32 %v1098_v56, 0.0  ;;  %v1634_v59 = vmax.f32 %v1227_v57, 0.0  ;;  %2016 = vmatmul.msk.f32.gmra.mxu0 %vm526_vm1, %v2218_v50  ;;  %2059 = vmatmul.msk.f32.gmra.mxu1 %vm526_vm1, %v2305_v51  ;;  %v2586_v51 = vld [vmem:[%s2670_s26 + $0x280] sm:$0xff]   ;;  %v2398_v57 = vunpack.c.h.bf16 %v2564_v32  ;;  %v2313_v60 = vunpack.c.l.bf16 %v2543_v52 }
  0xee   : > { %v2314_v14 = vunpack.c.h.bf16 %v2543_v52 }
  0xef   : > { %1764 = vst.msk [vmem:[%s2783_s5 + $0x58] sm:$0xff] %vm1752_vm2, %v1591_v58  ;;  %v1355_v62 = vpop.f32.mrf.mxu2  ;;  %v1484_v63 = vpop.f32.mrf.mxu3  ;;  %v2485_v58 = vunpack.c.l.bf16 %v2586_v51 }
  0xf0   : > { %1807 = vst.msk [vmem:[%s2783_s5 + $0x1b0] sm:$0xff] %vm1752_vm2, %v1634_v59  ;;  %v1356_v0 = vadd.f32 %v2775_v40, %v1355_v62  ;;  %v1485_v1 = vadd.f32 %v2775_v40, %v1484_v63  ;;  %v2226_v59 = vunpack.c.h.bf16 %v2521_v33 }
  0xf2   : > { %v1677_v6 = vmax.f32 %v1356_v0, 0.0  ;;  %v1720_v7 = vmax.f32 %v1485_v1, 0.0  ;;  %v1100_v8 = vpop.f32.mrf.mxu0  ;;  %v1229_v9 = vpop.f32.mrf.mxu1 }
  0xf3   : > { %v1101_v10 = vadd.f32 %v2775_v40, %v1100_v8  ;;  %v1230_v11 = vadd.f32 %v2775_v40, %v1229_v9 }
  0xf4   : > { %1850 = vst.msk [vmem:[%s2783_s5 + $0x308] sm:$0xff] %vm1752_vm2, %v1677_v6  ;;  %2103 = vmatmul.msk.f32.gmra.mxu2 %vm526_vm1, %v2393_v2  ;;  %2146 = vmatmul.msk.f32.gmra.mxu3 %vm526_vm1, %v2478_v3  ;;  %v2522_v6 = vld [vmem:[%s2670_s26 + $0x80] sm:$0xff]  }
  0xf5   : > { %1893 = vst.msk [vmem:[%s2783_s5 + $0x460] sm:$0xff] %vm1752_vm2, %v1720_v7  ;;  %v1592_v12 = vmax.f32 %v1101_v10, 0.0  ;;  %v1635_v13 = vmax.f32 %v1230_v11, 0.0  ;;  %2017 = vmatmul.msk.f32.gmra.mxu0 %vm526_vm1, %v2221_v4  ;;  %2060 = vmatmul.msk.f32.gmra.mxu1 %vm526_vm1, %v2306_v5  ;;  %v2565_v5 = vld [vmem:[%s2670_s26 + $0x1d8] sm:$0xff]  }
  0xf6   : > { %v2401_v11 = vunpack.c.l.bf16 %v2565_v5 }
  0xf7   : > { %1765 = vst.msk [vmem:[%s2783_s5 + $0x60] sm:$0xff] %vm1752_vm2, %v1592_v12  ;;  %v1358_v16 = vpop.f32.mrf.mxu2  ;;  %v1487_v17 = vpop.f32.mrf.mxu3  ;;  %v2486_v12 = vunpack.c.h.bf16 %v2586_v51 }
  0xf8   : > { %1808 = vst.msk [vmem:[%s2783_s5 + $0x1b8] sm:$0xff] %vm1752_vm2, %v1635_v13  ;;  %v1359_v18 = vadd.f32 %v2775_v40, %v1358_v16  ;;  %v1488_v19 = vadd.f32 %v2775_v40, %v1487_v17  ;;  %v2229_v13 = vunpack.c.l.bf16 %v2522_v6 }
  0xfa   : > { %v1678_v24 = vmax.f32 %v1359_v18, 0.0  ;;  %v1721_v25 = vmax.f32 %v1488_v19, 0.0  ;;  %v1103_v26 = vpop.f32.mrf.mxu0  ;;  %v1232_v27 = vpop.f32.mrf.mxu1 }
  0xfb   : > { %v1104_v28 = vadd.f32 %v2775_v40, %v1103_v26  ;;  %v1233_v29 = vadd.f32 %v2775_v40, %v1232_v27 }
  0xfc   : > { %1851 = vst.msk [vmem:[%s2783_s5 + $0x310] sm:$0xff] %vm1752_vm2, %v1678_v24  ;;  %2104 = vmatmul.msk.f32.gmra.mxu2 %vm526_vm1, %v2394_v20  ;;  %2147 = vmatmul.msk.f32.gmra.mxu3 %vm526_vm1, %v2481_v21  ;;  %v2544_v24 = vld [vmem:[%s2670_s26 + $0x130] sm:$0xff]  }
  0xfd   : > { %1894 = vst.msk [vmem:[%s2783_s5 + $0x468] sm:$0xff] %vm1752_vm2, %v1721_v25  ;;  %v1593_v30 = vmax.f32 %v1104_v28, 0.0  ;;  %v1636_v31 = vmax.f32 %v1233_v29, 0.0  ;;  %2018 = vmatmul.msk.f32.gmra.mxu0 %vm526_vm1, %v2222_v22  ;;  %2061 = vmatmul.msk.f32.gmra.mxu1 %vm526_vm1, %v2309_v23  ;;  %v2587_v23 = vld [vmem:[%s2670_s26 + $0x288] sm:$0xff]   ;;  %v2402_v29 = vunpack.c.h.bf16 %v2565_v5  ;;  %v2317_v32 = vunpack.c.l.bf16 %v2544_v24 }
  0xfe   : > { %v2318_v51 = vunpack.c.h.bf16 %v2544_v24 }
  0xff   : > { %1766 = vst.msk [vmem:[%s2783_s5 + $0x68] sm:$0xff] %vm1752_vm2, %v1593_v30  ;;  %v1361_v34 = vpop.f32.mrf.mxu2  ;;  %v1490_v35 = vpop.f32.mrf.mxu3  ;;  %v2489_v30 = vunpack.c.l.bf16 %v2587_v23 }
 0x100   : > { %1809 = vst.msk [vmem:[%s2783_s5 + $0x1c0] sm:$0xff] %vm1752_vm2, %v1636_v31  ;;  %v1362_v36 = vadd.f32 %v2775_v40, %v1361_v34  ;;  %v1491_v37 = vadd.f32 %v2775_v40, %v1490_v35  ;;  %v2230_v31 = vunpack.c.h.bf16 %v2522_v6 }
 0x102   : > { %v1679_v43 = vmax.f32 %v1362_v36, 0.0  ;;  %v1722_v44 = vmax.f32 %v1491_v37, 0.0  ;;  %v1106_v45 = vpop.f32.mrf.mxu0  ;;  %v1235_v46 = vpop.f32.mrf.mxu1 }
 0x103   : > { %v1107_v47 = vadd.f32 %v2775_v40, %v1106_v45  ;;  %v1236_v48 = vadd.f32 %v2775_v40, %v1235_v46 }
 0x104   : > { %1852 = vst.msk [vmem:[%s2783_s5 + $0x318] sm:$0xff] %vm1752_vm2, %v1679_v43  ;;  %2105 = vmatmul.msk.f32.gmra.mxu2 %vm526_vm1, %v2397_v38  ;;  %2148 = vmatmul.msk.f32.gmra.mxu3 %vm526_vm1, %v2482_v39  ;;  %v2523_v43 = vld [vmem:[%s2670_s26 + $0x88] sm:$0xff]  }
 0x105   : > { %1895 = vst.msk [vmem:[%s2783_s5 + $0x470] sm:$0xff] %vm1752_vm2, %v1722_v44  ;;  %v1594_v49 = vmax.f32 %v1107_v47, 0.0  ;;  %v1637_v50 = vmax.f32 %v1236_v48, 0.0  ;;  %2019 = vmatmul.msk.f32.gmra.mxu0 %vm526_vm1, %v2225_v41  ;;  %2062 = vmatmul.msk.f32.gmra.mxu1 %vm526_vm1, %v2310_v42  ;;  %v2566_v42 = vld [vmem:[%s2670_s26 + $0x1e0] sm:$0xff]  }
 0x106   : > { %v2405_v48 = vunpack.c.l.bf16 %v2566_v42 }
 0x107   : > { %1767 = vst.msk [vmem:[%s2783_s5 + $0x70] sm:$0xff] %vm1752_vm2, %v1594_v49  ;;  %v1364_v53 = vpop.f32.mrf.mxu2  ;;  %v1493_v54 = vpop.f32.mrf.mxu3  ;;  %v2490_v49 = vunpack.c.h.bf16 %v2587_v23 }
 0x108   : > { %1810 = vst.msk [vmem:[%s2783_s5 + $0x1c8] sm:$0xff] %vm1752_vm2, %v1637_v50  ;;  %v1365_v55 = vadd.f32 %v2775_v40, %v1364_v53  ;;  %v1494_v56 = vadd.f32 %v2775_v40, %v1493_v54  ;;  %v2233_v50 = vunpack.c.l.bf16 %v2523_v43 }
 0x10a   : > { %v1680_v61 = vmax.f32 %v1365_v55, 0.0  ;;  %v1723_v62 = vmax.f32 %v1494_v56, 0.0  ;;  %v1109_v63 = vpop.f32.mrf.mxu0  ;;  %v1238_v0 = vpop.f32.mrf.mxu1 }
 0x10b   : > { %v1110_v1 = vadd.f32 %v2775_v40, %v1109_v63  ;;  %v1239_v2 = vadd.f32 %v2775_v40, %v1238_v0 }
 0x10c   : > { %1853 = vst.msk [vmem:[%s2783_s5 + $0x320] sm:$0xff] %vm1752_vm2, %v1680_v61  ;;  %2106 = vmatmul.msk.f32.gmra.mxu2 %vm526_vm1, %v2398_v57  ;;  %2149 = vmatmul.msk.f32.gmra.mxu3 %vm526_vm1, %v2485_v58  ;;  %v2545_v61 = vld [vmem:[%s2670_s26 + $0x138] sm:$0xff]  }
 0x10d   : > { %1896 = vst.msk [vmem:[%s2783_s5 + $0x478] sm:$0xff] %vm1752_vm2, %v1723_v62  ;;  %v1595_v3 = vmax.f32 %v1110_v1, 0.0  ;;  %v1638_v4 = vmax.f32 %v1239_v2, 0.0  ;;  %2020 = vmatmul.msk.f32.gmra.mxu0 %vm526_vm1, %v2226_v59  ;;  %2063 = vmatmul.msk.f32.gmra.mxu1 %vm526_vm1, %v2313_v60  ;;  %v2588_v60 = vld [vmem:[%s2670_s26 + $0x290] sm:$0xff]   ;;  %v2406_v2 = vunpack.c.h.bf16 %v2566_v42  ;;  %v2321_v5 = vunpack.c.l.bf16 %v2545_v61 }
 0x10e   : > { %v2322_v23 = vunpack.c.h.bf16 %v2545_v61 }
 0x10f   : > { %1768 = vst.msk [vmem:[%s2783_s5 + $0x78] sm:$0xff] %vm1752_vm2, %v1595_v3  ;;  %v1367_v7 = vpop.f32.mrf.mxu2  ;;  %v1496_v8 = vpop.f32.mrf.mxu3  ;;  %v2493_v3 = vunpack.c.l.bf16 %v2588_v60 }
 0x110   : > { %1811 = vst.msk [vmem:[%s2783_s5 + $0x1d0] sm:$0xff] %vm1752_vm2, %v1638_v4  ;;  %v1368_v9 = vadd.f32 %v2775_v40, %v1367_v7  ;;  %v1497_v10 = vadd.f32 %v2775_v40, %v1496_v8  ;;  %v2234_v4 = vunpack.c.h.bf16 %v2523_v43 }
 0x112   : > { %v1681_v15 = vmax.f32 %v1368_v9, 0.0  ;;  %v1724_v16 = vmax.f32 %v1497_v10, 0.0  ;;  %v1112_v17 = vpop.f32.mrf.mxu0  ;;  %v1241_v18 = vpop.f32.mrf.mxu1 }
 0x113   : > { %v1113_v19 = vadd.f32 %v2775_v40, %v1112_v17  ;;  %v1242_v20 = vadd.f32 %v2775_v40, %v1241_v18  ;;  %v3140_v17 = vld [vmem:[%s3469_s2] ss:$0 sm:$0xff] }
 0x114   : > { %1854 = vst.msk [vmem:[%s2783_s5 + $0x328] sm:$0xff] %vm1752_vm2, %v1681_v15  ;;  %2107 = vmatmul.msk.f32.gmra.mxu2 %vm526_vm1, %v2401_v11  ;;  %2150 = vmatmul.msk.f32.gmra.mxu3 %vm526_vm1, %v2486_v12  ;;  %v2524_v15 = vld [vmem:[%s2670_s26 + $0x90] sm:$0xff]  }
 0x115   : > { %1897 = vst.msk [vmem:[%s2783_s5 + $0x480] sm:$0xff] %vm1752_vm2, %v1724_v16  ;;  %v1596_v21 = vmax.f32 %v1113_v19, 0.0  ;;  %v1639_v22 = vmax.f32 %v1242_v20, 0.0  ;;  %2021 = vmatmul.msk.f32.gmra.mxu0 %vm526_vm1, %v2229_v13  ;;  %2064 = vmatmul.msk.f32.gmra.mxu1 %vm526_vm1, %v2314_v14  ;;  %v2567_v14 = vld [vmem:[%s2670_s26 + $0x1e8] sm:$0xff]  }
 0x116   : > { %v2409_v20 = vunpack.c.l.bf16 %v2567_v14 }
 0x117   : > { %1769 = vst.msk [vmem:[%s2783_s5 + $0x80] sm:$0xff] %vm1752_vm2, %v1596_v21  ;;  %v1370_v25 = vpop.f32.mrf.mxu2  ;;  %v1499_v26 = vpop.f32.mrf.mxu3  ;;  %v2494_v21 = vunpack.c.h.bf16 %v2588_v60 }
 0x118   : > { %1812 = vst.msk [vmem:[%s2783_s5 + $0x1d8] sm:$0xff] %vm1752_vm2, %v1639_v22  ;;  %v1371_v27 = vadd.f32 %v2775_v40, %v1370_v25  ;;  %v1500_v28 = vadd.f32 %v2775_v40, %v1499_v26  ;;  %v2237_v22 = vunpack.c.l.bf16 %v2524_v15 }
 0x11a   : > { %v1682_v33 = vmax.f32 %v1371_v27, 0.0  ;;  %v1725_v34 = vmax.f32 %v1500_v28, 0.0  ;;  %v1115_v35 = vpop.f32.mrf.mxu0  ;;  %v1244_v36 = vpop.f32.mrf.mxu1 }
 0x11b   : > { %v1116_v37 = vadd.f32 %v2775_v40, %v1115_v35  ;;  %v1245_v38 = vadd.f32 %v2775_v40, %v1244_v36 }
 0x11c   : > { %1855 = vst.msk [vmem:[%s2783_s5 + $0x330] sm:$0xff] %vm1752_vm2, %v1682_v33  ;;  %2108 = vmatmul.msk.f32.gmra.mxu2 %vm526_vm1, %v2402_v29  ;;  %2151 = vmatmul.msk.f32.gmra.mxu3 %vm526_vm1, %v2489_v30  ;;  %v2546_v33 = vld [vmem:[%s2670_s26 + $0x140] sm:$0xff]  }
 0x11d   : > { %1898 = vst.msk [vmem:[%s2783_s5 + $0x488] sm:$0xff] %vm1752_vm2, %v1725_v34  ;;  %v1597_v39 = vmax.f32 %v1116_v37, 0.0  ;;  %v1640_v41 = vmax.f32 %v1245_v38, 0.0  ;;  %2022 = vmatmul.msk.f32.gmra.mxu0 %vm526_vm1, %v2230_v31  ;;  %2065 = vmatmul.msk.f32.gmra.mxu1 %vm526_vm1, %v2317_v32  ;;  %v2589_v32 = vld [vmem:[%s2670_s26 + $0x298] sm:$0xff]   ;;  %v2410_v38 = vunpack.c.h.bf16 %v2567_v14  ;;  %v2325_v42 = vunpack.c.l.bf16 %v2546_v33 }
 0x11e   : > { %v2326_v60 = vunpack.c.h.bf16 %v2546_v33 }
 0x11f   : > { %1770 = vst.msk [vmem:[%s2783_s5 + $0x88] sm:$0xff] %vm1752_vm2, %v1597_v39  ;;  %v1373_v44 = vpop.f32.mrf.mxu2  ;;  %v1502_v45 = vpop.f32.mrf.mxu3  ;;  %v2497_v39 = vunpack.c.l.bf16 %v2589_v32 }
 0x120   : > { %1813 = vst.msk [vmem:[%s2783_s5 + $0x1e0] sm:$0xff] %vm1752_vm2, %v1640_v41  ;;  %v1374_v46 = vadd.f32 %v2775_v40, %v1373_v44  ;;  %v1503_v47 = vadd.f32 %v2775_v40, %v1502_v45  ;;  %v2238_v41 = vunpack.c.h.bf16 %v2524_v15 }
 0x122   : > { %v1683_v52 = vmax.f32 %v1374_v46, 0.0  ;;  %v1726_v53 = vmax.f32 %v1503_v47, 0.0  ;;  %v1118_v54 = vpop.f32.mrf.mxu0  ;;  %v1247_v55 = vpop.f32.mrf.mxu1 }
 0x123   : > { %v1119_v56 = vadd.f32 %v2775_v40, %v1118_v54  ;;  %v1248_v57 = vadd.f32 %v2775_v40, %v1247_v55 }
 0x124   : > { %1856 = vst.msk [vmem:[%s2783_s5 + $0x338] sm:$0xff] %vm1752_vm2, %v1683_v52  ;;  %2109 = vmatmul.msk.f32.gmra.mxu2 %vm526_vm1, %v2405_v48  ;;  %2152 = vmatmul.msk.f32.gmra.mxu3 %vm526_vm1, %v2490_v49  ;;  %v2525_v52 = vld [vmem:[%s2670_s26 + $0x98] sm:$0xff]  }
 0x125   : > { %1899 = vst.msk [vmem:[%s2783_s5 + $0x490] sm:$0xff] %vm1752_vm2, %v1726_v53  ;;  %v1598_v58 = vmax.f32 %v1119_v56, 0.0  ;;  %v1641_v59 = vmax.f32 %v1248_v57, 0.0  ;;  %2023 = vmatmul.msk.f32.gmra.mxu0 %vm526_vm1, %v2233_v50  ;;  %2066 = vmatmul.msk.f32.gmra.mxu1 %vm526_vm1, %v2318_v51  ;;  %v2568_v51 = vld [vmem:[%s2670_s26 + $0x1f0] sm:$0xff]  }
 0x126   : > { %v2413_v57 = vunpack.c.l.bf16 %v2568_v51 }
 0x127   : > { %1771 = vst.msk [vmem:[%s2783_s5 + $0x90] sm:$0xff] %vm1752_vm2, %v1598_v58  ;;  %v1376_v62 = vpop.f32.mrf.mxu2  ;;  %v1505_v63 = vpop.f32.mrf.mxu3  ;;  %v2498_v58 = vunpack.c.h.bf16 %v2589_v32 }
 0x128   : > { %1814 = vst.msk [vmem:[%s2783_s5 + $0x1e8] sm:$0xff] %vm1752_vm2, %v1641_v59  ;;  %v1377_v0 = vadd.f32 %v2775_v40, %v1376_v62  ;;  %v1506_v1 = vadd.f32 %v2775_v40, %v1505_v63  ;;  %v2241_v59 = vunpack.c.l.bf16 %v2525_v52 }
 0x12a   : > { %v1684_v6 = vmax.f32 %v1377_v0, 0.0  ;;  %v1727_v7 = vmax.f32 %v1506_v1, 0.0  ;;  %v1121_v8 = vpop.f32.mrf.mxu0  ;;  %v1250_v9 = vpop.f32.mrf.mxu1 }
 0x12b   : > { %v1122_v10 = vadd.f32 %v2775_v40, %v1121_v8  ;;  %v1251_v11 = vadd.f32 %v2775_v40, %v1250_v9 }
 0x12c   : > { %1857 = vst.msk [vmem:[%s2783_s5 + $0x340] sm:$0xff] %vm1752_vm2, %v1684_v6  ;;  %2110 = vmatmul.msk.f32.gmra.mxu2 %vm526_vm1, %v2406_v2  ;;  %2153 = vmatmul.msk.f32.gmra.mxu3 %vm526_vm1, %v2493_v3  ;;  %v2547_v6 = vld [vmem:[%s2670_s26 + $0x148] sm:$0xff]  }
 0x12d   : > { %1900 = vst.msk [vmem:[%s2783_s5 + $0x498] sm:$0xff] %vm1752_vm2, %v1727_v7  ;;  %v1599_v12 = vmax.f32 %v1122_v10, 0.0  ;;  %v1642_v13 = vmax.f32 %v1251_v11, 0.0  ;;  %2024 = vmatmul.msk.f32.gmra.mxu0 %vm526_vm1, %v2234_v4  ;;  %2067 = vmatmul.msk.f32.gmra.mxu1 %vm526_vm1, %v2321_v5  ;;  %v2590_v5 = vld [vmem:[%s2670_s26 + $0x2a0] sm:$0xff]   ;;  %v2414_v11 = vunpack.c.h.bf16 %v2568_v51  ;;  %v2329_v14 = vunpack.c.l.bf16 %v2547_v6 }
 0x12e   : > { %v2330_v32 = vunpack.c.h.bf16 %v2547_v6 }
 0x12f   : > { %1772 = vst.msk [vmem:[%s2783_s5 + $0x98] sm:$0xff] %vm1752_vm2, %v1599_v12  ;;  %v1379_v16 = vpop.f32.mrf.mxu2  ;;  %v1508_v40 = vpop.f32.mrf.mxu3  ;;  %v2501_v12 = vunpack.c.l.bf16 %v2590_v5 }
 0x130   : > { %1815 = vst.msk [vmem:[%s2783_s5 + $0x1f0] sm:$0xff] %vm1752_vm2, %v1642_v13  ;;  %v1380_v18 = vadd.f32 %v3140_v17, %v1379_v16  ;;  %v1509_v19 = vadd.f32 %v3140_v17, %v1508_v40  ;;  %v2242_v13 = vunpack.c.h.bf16 %v2525_v52 }
 0x132   : > { %v1685_v24 = vmax.f32 %v1380_v18, 0.0  ;;  %v1728_v25 = vmax.f32 %v1509_v19, 0.0  ;;  %v1124_v26 = vpop.f32.mrf.mxu0  ;;  %v1253_v27 = vpop.f32.mrf.mxu1 }
 0x133   : > { %v1125_v28 = vadd.f32 %v3140_v17, %v1124_v26  ;;  %v1254_v29 = vadd.f32 %v3140_v17, %v1253_v27 }
 0x134   : > { %1858 = vst.msk [vmem:[%s2783_s5 + $0x348] sm:$0xff] %vm1752_vm2, %v1685_v24  ;;  %2111 = vmatmul.msk.f32.gmra.mxu2 %vm526_vm1, %v2409_v20  ;;  %2154 = vmatmul.msk.f32.gmra.mxu3 %vm526_vm1, %v2494_v21  ;;  %v2526_v24 = vld [vmem:[%s2670_s26 + $0xa0] sm:$0xff]  }
 0x135   : > { %1901 = vst.msk [vmem:[%s2783_s5 + $0x4a0] sm:$0xff] %vm1752_vm2, %v1728_v25  ;;  %v1600_v30 = vmax.f32 %v1125_v28, 0.0  ;;  %v1643_v31 = vmax.f32 %v1254_v29, 0.0  ;;  %2025 = vmatmul.msk.f32.gmra.mxu0 %vm526_vm1, %v2237_v22  ;;  %2068 = vmatmul.msk.f32.gmra.mxu1 %vm526_vm1, %v2322_v23  ;;  %v2569_v23 = vld [vmem:[%s2670_s26 + $0x1f8] sm:$0xff]  }
 0x136   : > { %v2417_v29 = vunpack.c.l.bf16 %v2569_v23 }
 0x137   : > { %1773 = vst.msk [vmem:[%s2783_s5 + $0xa0] sm:$0xff] %vm1752_vm2, %v1600_v30  ;;  %v1382_v34 = vpop.f32.mrf.mxu2  ;;  %v1511_v35 = vpop.f32.mrf.mxu3  ;;  %v2502_v30 = vunpack.c.h.bf16 %v2590_v5 }
 0x138   : > { %1816 = vst.msk [vmem:[%s2783_s5 + $0x1f8] sm:$0xff] %vm1752_vm2, %v1643_v31  ;;  %v1383_v36 = vadd.f32 %v3140_v17, %v1382_v34  ;;  %v1512_v37 = vadd.f32 %v3140_v17, %v1511_v35  ;;  %v2245_v31 = vunpack.c.l.bf16 %v2526_v24 }
 0x13a   : > { %v1686_v43 = vmax.f32 %v1383_v36, 0.0  ;;  %v1729_v44 = vmax.f32 %v1512_v37, 0.0  ;;  %v1127_v45 = vpop.f32.mrf.mxu0  ;;  %v1256_v46 = vpop.f32.mrf.mxu1 }
 0x13b   : > { %v1128_v47 = vadd.f32 %v3140_v17, %v1127_v45  ;;  %v1257_v48 = vadd.f32 %v3140_v17, %v1256_v46 }
 0x13c   : > { %1859 = vst.msk [vmem:[%s2783_s5 + $0x350] sm:$0xff] %vm1752_vm2, %v1686_v43  ;;  %2112 = vmatmul.msk.f32.gmra.mxu2 %vm526_vm1, %v2410_v38  ;;  %2155 = vmatmul.msk.f32.gmra.mxu3 %vm526_vm1, %v2497_v39  ;;  %v2548_v43 = vld [vmem:[%s2670_s26 + $0x150] sm:$0xff]  }
 0x13d   : > { %1902 = vst.msk [vmem:[%s2783_s5 + $0x4a8] sm:$0xff] %vm1752_vm2, %v1729_v44  ;;  %v1601_v49 = vmax.f32 %v1128_v47, 0.0  ;;  %v1644_v50 = vmax.f32 %v1257_v48, 0.0  ;;  %2026 = vmatmul.msk.f32.gmra.mxu0 %vm526_vm1, %v2238_v41  ;;  %2069 = vmatmul.msk.f32.gmra.mxu1 %vm526_vm1, %v2325_v42  ;;  %v2591_v42 = vld [vmem:[%s2670_s26 + $0x2a8] sm:$0xff]   ;;  %v2418_v48 = vunpack.c.h.bf16 %v2569_v23  ;;  %v2333_v51 = vunpack.c.l.bf16 %v2548_v43 }
 0x13e   : > { %v2334_v5 = vunpack.c.h.bf16 %v2548_v43 }
 0x13f   : > { %1774 = vst.msk [vmem:[%s2783_s5 + $0xa8] sm:$0xff] %vm1752_vm2, %v1601_v49  ;;  %v1385_v53 = vpop.f32.mrf.mxu2  ;;  %v1514_v54 = vpop.f32.mrf.mxu3  ;;  %v2505_v49 = vunpack.c.l.bf16 %v2591_v42 }
 0x140   : > { %1817 = vst.msk [vmem:[%s2783_s5 + $0x200] sm:$0xff] %vm1752_vm2, %v1644_v50  ;;  %v1386_v55 = vadd.f32 %v3140_v17, %v1385_v53  ;;  %v1515_v56 = vadd.f32 %v3140_v17, %v1514_v54  ;;  %v2246_v50 = vunpack.c.h.bf16 %v2526_v24 }
 0x142   : > { %v1687_v61 = vmax.f32 %v1386_v55, 0.0  ;;  %v1730_v62 = vmax.f32 %v1515_v56, 0.0  ;;  %v1130_v63 = vpop.f32.mrf.mxu0  ;;  %v1259_v0 = vpop.f32.mrf.mxu1 }
 0x143   : > { %v1131_v1 = vadd.f32 %v3140_v17, %v1130_v63  ;;  %v1260_v2 = vadd.f32 %v3140_v17, %v1259_v0 }
 0x144   : > { %1860 = vst.msk [vmem:[%s2783_s5 + $0x358] sm:$0xff] %vm1752_vm2, %v1687_v61  ;;  %2113 = vmatmul.msk.f32.gmra.mxu2 %vm526_vm1, %v2413_v57  ;;  %2156 = vmatmul.msk.f32.gmra.mxu3 %vm526_vm1, %v2498_v58 }
 0x145   : > { %1903 = vst.msk [vmem:[%s2783_s5 + $0x4b0] sm:$0xff] %vm1752_vm2, %v1730_v62  ;;  %v1602_v3 = vmax.f32 %v1131_v1, 0.0  ;;  %v1645_v4 = vmax.f32 %v1260_v2, 0.0  ;;  %2027 = vmatmul.msk.f32.gmra.mxu0 %vm526_vm1, %v2241_v59  ;;  %2070 = vmatmul.msk.f32.gmra.mxu1 %vm526_vm1, %v2326_v60  ;;  %v2614_v62 = vld [vmem:[%s2670_s26 + $0x200] sm:$0xff]   ;;  %v2506_v2 = vunpack.c.h.bf16 %v2591_v42 }
 0x146   : > { %v2421_v63 = vunpack.c.l.bf16 %v2614_v62 }
 0x147   : > { %1775 = vst.msk [vmem:[%s2783_s5 + $0xb0] sm:$0xff] %vm1752_vm2, %v1602_v3  ;;  %v1388_v7 = vpop.f32.mrf.mxu2  ;;  %v1517_v8 = vpop.f32.mrf.mxu3  ;;  %v2615_v3 = vld [vmem:[%s2670_s26 + $0xa8] sm:$0xff]  }
 0x148   : > { %1818 = vst.msk [vmem:[%s2783_s5 + $0x208] sm:$0xff] %vm1752_vm2, %v1645_v4  ;;  %v1389_v9 = vadd.f32 %v3140_v17, %v1388_v7  ;;  %v1518_v10 = vadd.f32 %v3140_v17, %v1517_v8  ;;  %v2249_v4 = vunpack.c.l.bf16 %v2615_v3 }
 0x14a   : > { %v1688_v15 = vmax.f32 %v1389_v9, 0.0  ;;  %v1731_v16 = vmax.f32 %v1518_v10, 0.0  ;;  %v1133_v40 = vpop.f32.mrf.mxu0  ;;  %v1262_v18 = vpop.f32.mrf.mxu1 }
 0x14b   : > { %v1134_v19 = vadd.f32 %v3140_v17, %v1133_v40  ;;  %v1263_v20 = vadd.f32 %v3140_v17, %v1262_v18 }
 0x14c   : > { %1861 = vst.msk [vmem:[%s2783_s5 + $0x360] sm:$0xff] %vm1752_vm2, %v1688_v15  ;;  %2114 = vmatmul.msk.f32.gmra.mxu2 %vm526_vm1, %v2414_v11  ;;  %2157 = vmatmul.msk.f32.gmra.mxu3 %vm526_vm1, %v2501_v12 }
 0x14d   : > { %1904 = vst.msk [vmem:[%s2783_s5 + $0x4b8] sm:$0xff] %vm1752_vm2, %v1731_v16  ;;  %v1603_v21 = vmax.f32 %v1134_v19, 0.0  ;;  %v1646_v22 = vmax.f32 %v1263_v20, 0.0  ;;  %2028 = vmatmul.msk.f32.gmra.mxu0 %vm526_vm1, %v2242_v13  ;;  %2071 = vmatmul.msk.f32.gmra.mxu1 %vm526_vm1, %v2329_v14 }
 0x14f   : > { %1776 = vst.msk [vmem:[%s2783_s5 + $0xb8] sm:$0xff] %vm1752_vm2, %v1603_v21  ;;  %v1391_v25 = vpop.f32.mrf.mxu2  ;;  %v1520_v26 = vpop.f32.mrf.mxu3 }
 0x150   : > { %1819 = vst.msk [vmem:[%s2783_s5 + $0x210] sm:$0xff] %vm1752_vm2, %v1646_v22  ;;  %v1392_v27 = vadd.f32 %v3140_v17, %v1391_v25  ;;  %v1521_v28 = vadd.f32 %v3140_v17, %v1520_v26 }
 0x152   : > { %v1689_v33 = vmax.f32 %v1392_v27, 0.0  ;;  %v1732_v34 = vmax.f32 %v1521_v28, 0.0  ;;  %v1136_v35 = vpop.f32.mrf.mxu0  ;;  %v1265_v36 = vpop.f32.mrf.mxu1 }
 0x153   : > { %v1137_v37 = vadd.f32 %v3140_v17, %v1136_v35  ;;  %v1266_v38 = vadd.f32 %v3140_v17, %v1265_v36 }
 0x154   : > { %1862 = vst.msk [vmem:[%s2783_s5 + $0x368] sm:$0xff] %vm1752_vm2, %v1689_v33  ;;  %2115 = vmatmul.msk.f32.gmra.mxu2 %vm526_vm1, %v2417_v29  ;;  %2158 = vmatmul.msk.f32.gmra.mxu3 %vm526_vm1, %v2502_v30 }
 0x155   : > { %1905 = vst.msk [vmem:[%s2783_s5 + $0x4c0] sm:$0xff] %vm1752_vm2, %v1732_v34  ;;  %v1604_v39 = vmax.f32 %v1137_v37, 0.0  ;;  %v1647_v41 = vmax.f32 %v1266_v38, 0.0  ;;  %2029 = vmatmul.msk.f32.gmra.mxu0 %vm526_vm1, %v2245_v31  ;;  %2072 = vmatmul.msk.f32.gmra.mxu1 %vm526_vm1, %v2330_v32 }
 0x157   : > { %1777 = vst.msk [vmem:[%s2783_s5 + $0xc0] sm:$0xff] %vm1752_vm2, %v1604_v39  ;;  %v1394_v44 = vpop.f32.mrf.mxu2  ;;  %v1523_v45 = vpop.f32.mrf.mxu3 }
 0x158   : > { %1820 = vst.msk [vmem:[%s2783_s5 + $0x218] sm:$0xff] %vm1752_vm2, %v1647_v41  ;;  %v1395_v46 = vadd.f32 %v3140_v17, %v1394_v44  ;;  %v1524_v47 = vadd.f32 %v3140_v17, %v1523_v45 }
 0x15a   : > { %v1690_v52 = vmax.f32 %v1395_v46, 0.0  ;;  %v1733_v53 = vmax.f32 %v1524_v47, 0.0  ;;  %v1139_v54 = vpop.f32.mrf.mxu0  ;;  %v1268_v55 = vpop.f32.mrf.mxu1 }
 0x15b   : > { %v1140_v56 = vadd.f32 %v3140_v17, %v1139_v54  ;;  %v1269_v57 = vadd.f32 %v3140_v17, %v1268_v55 }
 0x15c   : > { %1863 = vst.msk [vmem:[%s2783_s5 + $0x370] sm:$0xff] %vm1752_vm2, %v1690_v52  ;;  %2116 = vmatmul.msk.f32.gmra.mxu2 %vm526_vm1, %v2418_v48  ;;  %2159 = vmatmul.msk.f32.gmra.mxu3 %vm526_vm1, %v2505_v49 }
 0x15d   : > { %1906 = vst.msk [vmem:[%s2783_s5 + $0x4c8] sm:$0xff] %vm1752_vm2, %v1733_v53  ;;  %v1605_v58 = vmax.f32 %v1140_v56, 0.0  ;;  %v1648_v59 = vmax.f32 %v1269_v57, 0.0  ;;  %2030 = vmatmul.msk.f32.gmra.mxu0 %vm526_vm1, %v2246_v50  ;;  %2073 = vmatmul.msk.f32.gmra.mxu1 %vm526_vm1, %v2333_v51 }
 0x15f   : > { %1778 = vst.msk [vmem:[%s2783_s5 + $0xc8] sm:$0xff] %vm1752_vm2, %v1605_v58  ;;  %v1397_v60 = vpop.f32.mrf.mxu2  ;;  %v1526_v61 = vpop.f32.mrf.mxu3 }
 0x160   : > { %1821 = vst.msk [vmem:[%s2783_s5 + $0x220] sm:$0xff] %vm1752_vm2, %v1648_v59  ;;  %v1398_v0 = vadd.f32 %v3140_v17, %v1397_v60  ;;  %v1527_v1 = vadd.f32 %v3140_v17, %v1526_v61 }
 0x162   : > { %v1691_v6 = vmax.f32 %v1398_v0, 0.0  ;;  %v1734_v7 = vmax.f32 %v1527_v1, 0.0  ;;  %v1142_v8 = vpop.f32.mrf.mxu0  ;;  %v1271_v9 = vpop.f32.mrf.mxu1 }
 0x163   : > { %v1143_v10 = vadd.f32 %v3140_v17, %v1142_v8  ;;  %v1272_v11 = vadd.f32 %v3140_v17, %v1271_v9 }
 0x164   : > { %1864 = vst.msk [vmem:[%s2783_s5 + $0x378] sm:$0xff] %vm1752_vm2, %v1691_v6  ;;  %2117 = vmatmul.msk.f32.gmra.mxu2 %vm526_vm1, %v2421_v63  ;;  %2160 = vmatmul.msk.f32.gmra.mxu3 %vm526_vm1, %v2506_v2 }
 0x165   : > { %1907 = vst.msk [vmem:[%s2783_s5 + $0x4d0] sm:$0xff] %vm1752_vm2, %v1734_v7  ;;  %v1606_v12 = vmax.f32 %v1143_v10, 0.0  ;;  %v1649_v13 = vmax.f32 %v1272_v11, 0.0  ;;  %2031 = vmatmul.msk.f32.gmra.mxu0 %vm526_vm1, %v2249_v4  ;;  %2074 = vmatmul.msk.f32.gmra.mxu1 %vm526_vm1, %v2334_v5 }
 0x167   : > { %1779 = vst.msk [vmem:[%s2783_s5 + $0xd0] sm:$0xff] %vm1752_vm2, %v1606_v12  ;;  %v1400_v14 = vpop.f32.mrf.mxu2  ;;  %v1529_v15 = vpop.f32.mrf.mxu3 }
 0x168   : > { %1822 = vst.msk [vmem:[%s2783_s5 + $0x228] sm:$0xff] %vm1752_vm2, %v1649_v13  ;;  %v1401_v16 = vadd.f32 %v3140_v17, %v1400_v14  ;;  %v1530_v40 = vadd.f32 %v3140_v17, %v1529_v15 }
 0x16a   : > { %v1692_v18 = vmax.f32 %v1401_v16, 0.0  ;;  %v1735_v19 = vmax.f32 %v1530_v40, 0.0  ;;  %v1145_v20 = vpop.f32.mrf.mxu0  ;;  %v1274_v21 = vpop.f32.mrf.mxu1 }
 0x16b   : > { %v1146_v22 = vadd.f32 %v3140_v17, %v1145_v20  ;;  %v1275_v23 = vadd.f32 %v3140_v17, %v1274_v21 }
 0x16c   : > { %1865 = vst.msk [vmem:[%s2783_s5 + $0x380] sm:$0xff] %vm1752_vm2, %v1692_v18 }
 0x16d   : > { %1908 = vst.msk [vmem:[%s2783_s5 + $0x4d8] sm:$0xff] %vm1752_vm2, %v1735_v19  ;;  %v1607_v24 = vmax.f32 %v1146_v22, 0.0  ;;  %v1650_v25 = vmax.f32 %v1275_v23, 0.0 }
 0x16f   : > { %1780 = vst.msk [vmem:[%s2783_s5 + $0xd8] sm:$0xff] %vm1752_vm2, %v1607_v24  ;;  %v1403_v26 = vpop.f32.mrf.mxu2  ;;  %v1532_v27 = vpop.f32.mrf.mxu3 }
 0x170   : > { %1823 = vst.msk [vmem:[%s2783_s5 + $0x230] sm:$0xff] %vm1752_vm2, %v1650_v25  ;;  %v1404_v28 = vadd.f32 %v3140_v17, %v1403_v26  ;;  %v1533_v29 = vadd.f32 %v3140_v17, %v1532_v27 }
 0x172   : > { %v1693_v30 = vmax.f32 %v1404_v28, 0.0  ;;  %v1736_v31 = vmax.f32 %v1533_v29, 0.0  ;;  %v1148_v32 = vpop.f32.mrf.mxu0  ;;  %v1277_v33 = vpop.f32.mrf.mxu1 }
 0x173   : > { %v1149_v34 = vadd.f32 %v3140_v17, %v1148_v32  ;;  %v1278_v35 = vadd.f32 %v3140_v17, %v1277_v33 }
 0x174   : > { %1866 = vst.msk [vmem:[%s2783_s5 + $0x388] sm:$0xff] %vm1752_vm2, %v1693_v30 }
 0x175   : > { %1909 = vst.msk [vmem:[%s2783_s5 + $0x4e0] sm:$0xff] %vm1752_vm2, %v1736_v31  ;;  %v1608_v36 = vmax.f32 %v1149_v34, 0.0  ;;  %v1651_v37 = vmax.f32 %v1278_v35, 0.0 }
 0x177   : > { %1781 = vst.msk [vmem:[%s2783_s5 + $0xe0] sm:$0xff] %vm1752_vm2, %v1608_v36  ;;  %v1406_v38 = vpop.f32.mrf.mxu2  ;;  %v1535_v39 = vpop.f32.mrf.mxu3 }
 0x178   : > { %1824 = vst.msk [vmem:[%s2783_s5 + $0x238] sm:$0xff] %vm1752_vm2, %v1651_v37  ;;  %v1407_v41 = vadd.f32 %v3140_v17, %v1406_v38  ;;  %v1536_v42 = vadd.f32 %v3140_v17, %v1535_v39 }
 0x17a   : > { %v1694_v43 = vmax.f32 %v1407_v41, 0.0  ;;  %v1737_v44 = vmax.f32 %v1536_v42, 0.0  ;;  %v1151_v45 = vpop.f32.mrf.mxu0  ;;  %v1280_v46 = vpop.f32.mrf.mxu1 }
 0x17b   : > { %v1152_v47 = vadd.f32 %v3140_v17, %v1151_v45  ;;  %v1281_v48 = vadd.f32 %v3140_v17, %v1280_v46 }
 0x17c   : > { %1867 = vst.msk [vmem:[%s2783_s5 + $0x390] sm:$0xff] %vm1752_vm2, %v1694_v43 }
 0x17d   : > { %1910 = vst.msk [vmem:[%s2783_s5 + $0x4e8] sm:$0xff] %vm1752_vm2, %v1737_v44  ;;  %v1609_v49 = vmax.f32 %v1152_v47, 0.0  ;;  %v1652_v50 = vmax.f32 %v1281_v48, 0.0 }
 0x17f   : > { %1782 = vst.msk [vmem:[%s2783_s5 + $0xe8] sm:$0xff] %vm1752_vm2, %v1609_v49  ;;  %v1409_v51 = vpop.f32.mrf.mxu2  ;;  %v1538_v52 = vpop.f32.mrf.mxu3 }
 0x180   : > { %1825 = vst.msk [vmem:[%s2783_s5 + $0x240] sm:$0xff] %vm1752_vm2, %v1652_v50  ;;  %v1410_v53 = vadd.f32 %v3140_v17, %v1409_v51  ;;  %v1539_v54 = vadd.f32 %v3140_v17, %v1538_v52 }
 0x182   : > { %v1695_v55 = vmax.f32 %v1410_v53, 0.0  ;;  %v1738_v56 = vmax.f32 %v1539_v54, 0.0  ;;  %v1154_v57 = vpop.f32.mrf.mxu0  ;;  %v1283_v58 = vpop.f32.mrf.mxu1 }
 0x183   : > { %v1155_v59 = vadd.f32 %v3140_v17, %v1154_v57  ;;  %v1284_v60 = vadd.f32 %v3140_v17, %v1283_v58 }
 0x184   : > { %1868 = vst.msk [vmem:[%s2783_s5 + $0x398] sm:$0xff] %vm1752_vm2, %v1695_v55 }
 0x185   : > { %1911 = vst.msk [vmem:[%s2783_s5 + $0x4f0] sm:$0xff] %vm1752_vm2, %v1738_v56  ;;  %v1610_v61 = vmax.f32 %v1155_v59, 0.0  ;;  %v1653_v62 = vmax.f32 %v1284_v60, 0.0 }
 0x187   : > { %1783 = vst.msk [vmem:[%s2783_s5 + $0xf0] sm:$0xff] %vm1752_vm2, %v1610_v61  ;;  %v1412_v63 = vpop.f32.mrf.mxu2  ;;  %v1541_v0 = vpop.f32.mrf.mxu3 }
 0x188   : > { %1826 = vst.msk [vmem:[%s2783_s5 + $0x248] sm:$0xff] %vm1752_vm2, %v1653_v62  ;;  %v1413_v1 = vadd.f32 %v3140_v17, %v1412_v63  ;;  %v1542_v2 = vadd.f32 %v3140_v17, %v1541_v0 }
 0x18a   : > { %v1696_v3 = vmax.f32 %v1413_v1, 0.0  ;;  %v1739_v4 = vmax.f32 %v1542_v2, 0.0  ;;  %v1157_v5 = vpop.f32.mrf.mxu0  ;;  %v1286_v6 = vpop.f32.mrf.mxu1 }
 0x18b   : > { %v1158_v7 = vadd.f32 %v3140_v17, %v1157_v5  ;;  %v1287_v8 = vadd.f32 %v3140_v17, %v1286_v6 }
 0x18c   : > { %1869 = vst.msk [vmem:[%s2783_s5 + $0x3a0] sm:$0xff] %vm1752_vm2, %v1696_v3 }
 0x18d   : > { %1912 = vst.msk [vmem:[%s2783_s5 + $0x4f8] sm:$0xff] %vm1752_vm2, %v1739_v4  ;;  %v1611_v9 = vmax.f32 %v1158_v7, 0.0  ;;  %v1654_v10 = vmax.f32 %v1287_v8, 0.0 }
 0x18f   : > { %1784 = vst.msk [vmem:[%s2783_s5 + $0xf8] sm:$0xff] %vm1752_vm2, %v1611_v9  ;;  %v1415_v11 = vpop.f32.mrf.mxu2  ;;  %v1544_v12 = vpop.f32.mrf.mxu3 }
 0x190   : > { %1827 = vst.msk [vmem:[%s2783_s5 + $0x250] sm:$0xff] %vm1752_vm2, %v1654_v10  ;;  %v1416_v13 = vadd.f32 %v3140_v17, %v1415_v11  ;;  %v1545_v14 = vadd.f32 %v3140_v17, %v1544_v12 }
 0x192   : > { %v1697_v15 = vmax.f32 %v1416_v13, 0.0  ;;  %v1740_v16 = vmax.f32 %v1545_v14, 0.0  ;;  %v1160_v40 = vpop.f32.mrf.mxu0  ;;  %v1289_v18 = vpop.f32.mrf.mxu1 }
 0x193   : > { %v1161_v19 = vadd.f32 %v3140_v17, %v1160_v40  ;;  %v1290_v20 = vadd.f32 %v3140_v17, %v1289_v18 }
 0x194   : > { %1870 = vst.msk [vmem:[%s2783_s5 + $0x3a8] sm:$0xff] %vm1752_vm2, %v1697_v15 }
 0x195   : > { %1913 = vst.msk [vmem:[%s2783_s5 + $0x500] sm:$0xff] %vm1752_vm2, %v1740_v16  ;;  %v1612_v21 = vmax.f32 %v1161_v19, 0.0  ;;  %v1655_v22 = vmax.f32 %v1290_v20, 0.0 }
 0x197   : > { %1785 = vst.msk [vmem:[%s2783_s5 + $0x100] sm:$0xff] %vm1752_vm2, %v1612_v21  ;;  %v1418_v23 = vpop.f32.mrf.mxu2  ;;  %v1547_v24 = vpop.f32.mrf.mxu3 }
 0x198   : > { %1828 = vst.msk [vmem:[%s2783_s5 + $0x258] sm:$0xff] %vm1752_vm2, %v1655_v22  ;;  %v1419_v25 = vadd.f32 %v3140_v17, %v1418_v23  ;;  %v1548_v26 = vadd.f32 %v3140_v17, %v1547_v24 }
 0x19a   : > { %v1698_v27 = vmax.f32 %v1419_v25, 0.0  ;;  %v1741_v28 = vmax.f32 %v1548_v26, 0.0  ;;  %v1163_v29 = vpop.f32.mrf.mxu0  ;;  %v1292_v30 = vpop.f32.mrf.mxu1 }
 0x19b   : > { %v1164_v31 = vadd.f32 %v3140_v17, %v1163_v29  ;;  %v1293_v32 = vadd.f32 %v3140_v17, %v1292_v30 }
 0x19c   : > { %1871 = vst.msk [vmem:[%s2783_s5 + $0x3b0] sm:$0xff] %vm1752_vm2, %v1698_v27 }
 0x19d   : > { %1914 = vst.msk [vmem:[%s2783_s5 + $0x508] sm:$0xff] %vm1752_vm2, %v1741_v28  ;;  %v1613_v33 = vmax.f32 %v1164_v31, 0.0  ;;  %v1656_v34 = vmax.f32 %v1293_v32, 0.0 }
 0x19f   : > { %1786 = vst.msk [vmem:[%s2783_s5 + $0x108] sm:$0xff] %vm1752_vm2, %v1613_v33  ;;  %v1421_v35 = vpop.f32.mrf.mxu2  ;;  %v1550_v36 = vpop.f32.mrf.mxu3 }
 0x1a0   : > { %1829 = vst.msk [vmem:[%s2783_s5 + $0x260] sm:$0xff] %vm1752_vm2, %v1656_v34  ;;  %v1422_v37 = vadd.f32 %v3140_v17, %v1421_v35  ;;  %v1551_v38 = vadd.f32 %v3140_v17, %v1550_v36 }
 0x1a2   : > { %v1699_v39 = vmax.f32 %v1422_v37, 0.0  ;;  %v1742_v41 = vmax.f32 %v1551_v38, 0.0  ;;  %v1166_v42 = vpop.f32.mrf.mxu0  ;;  %v1295_v43 = vpop.f32.mrf.mxu1 }
 0x1a3   : > { %v1167_v44 = vadd.f32 %v3140_v17, %v1166_v42  ;;  %v1296_v45 = vadd.f32 %v3140_v17, %v1295_v43 }
 0x1a4   : > { %1872 = vst.msk [vmem:[%s2783_s5 + $0x3b8] sm:$0xff] %vm1752_vm2, %v1699_v39 }
 0x1a5   : > { %1915 = vst.msk [vmem:[%s2783_s5 + $0x510] sm:$0xff] %vm1752_vm2, %v1742_v41  ;;  %v1614_v46 = vmax.f32 %v1167_v44, 0.0  ;;  %v1657_v47 = vmax.f32 %v1296_v45, 0.0 }
 0x1a7   : > { %1787 = vst.msk [vmem:[%s2783_s5 + $0x110] sm:$0xff] %vm1752_vm2, %v1614_v46  ;;  %v1424_v48 = vpop.f32.mrf.mxu2  ;;  %v1553_v49 = vpop.f32.mrf.mxu3 }
 0x1a8   : > { %1830 = vst.msk [vmem:[%s2783_s5 + $0x268] sm:$0xff] %vm1752_vm2, %v1657_v47  ;;  %v1425_v50 = vadd.f32 %v3140_v17, %v1424_v48  ;;  %v1554_v51 = vadd.f32 %v3140_v17, %v1553_v49 }
 0x1aa   : > { %v1700_v52 = vmax.f32 %v1425_v50, 0.0  ;;  %v1743_v53 = vmax.f32 %v1554_v51, 0.0  ;;  %v1169_v54 = vpop.f32.mrf.mxu0  ;;  %v1298_v55 = vpop.f32.mrf.mxu1 }
 0x1ab   : > { %v1170_v56 = vadd.f32 %v3140_v17, %v1169_v54  ;;  %v1299_v57 = vadd.f32 %v3140_v17, %v1298_v55 }
 0x1ac   : > { %1873 = vst.msk [vmem:[%s2783_s5 + $0x3c0] sm:$0xff] %vm1752_vm2, %v1700_v52 }
 0x1ad   : > { %1916 = vst.msk [vmem:[%s2783_s5 + $0x518] sm:$0xff] %vm1752_vm2, %v1743_v53  ;;  %v1615_v58 = vmax.f32 %v1170_v56, 0.0  ;;  %v1658_v59 = vmax.f32 %v1299_v57, 0.0 }
 0x1af   : > { %1788 = vst.msk [vmem:[%s2783_s5 + $0x118] sm:$0xff] %vm1752_vm2, %v1615_v58  ;;  %v1427_v60 = vpop.f32.mrf.mxu2  ;;  %v1556_v61 = vpop.f32.mrf.mxu3 }
 0x1b0   : > { %1831 = vst.msk [vmem:[%s2783_s5 + $0x270] sm:$0xff] %vm1752_vm2, %v1658_v59  ;;  %v1428_v62 = vadd.f32 %v3140_v17, %v1427_v60  ;;  %v1557_v63 = vadd.f32 %v3140_v17, %v1556_v61 }
 0x1b2   : > { %v1701_v0 = vmax.f32 %v1428_v62, 0.0  ;;  %v1744_v1 = vmax.f32 %v1557_v63, 0.0  ;;  %v1172_v2 = vpop.f32.mrf.mxu0  ;;  %v1301_v3 = vpop.f32.mrf.mxu1 }
 0x1b3   : > { %v1173_v4 = vadd.f32 %v3140_v17, %v1172_v2  ;;  %v1302_v5 = vadd.f32 %v3140_v17, %v1301_v3 }
 0x1b4   : > { %1874 = vst.msk [vmem:[%s2783_s5 + $0x3c8] sm:$0xff] %vm1752_vm2, %v1701_v0 }
 0x1b5   : > { %1917 = vst.msk [vmem:[%s2783_s5 + $0x520] sm:$0xff] %vm1752_vm2, %v1744_v1  ;;  %v1616_v6 = vmax.f32 %v1173_v4, 0.0  ;;  %v1659_v7 = vmax.f32 %v1302_v5, 0.0 }
 0x1b7   : > { %1789 = vst.msk [vmem:[%s2783_s5 + $0x120] sm:$0xff] %vm1752_vm2, %v1616_v6  ;;  %v1430_v8 = vpop.f32.mrf.mxu2  ;;  %v1559_v9 = vpop.f32.mrf.mxu3 }
 0x1b8   : > { %1832 = vst.msk [vmem:[%s2783_s5 + $0x278] sm:$0xff] %vm1752_vm2, %v1659_v7  ;;  %v1431_v10 = vadd.f32 %v3140_v17, %v1430_v8  ;;  %v1560_v11 = vadd.f32 %v3140_v17, %v1559_v9 }
 0x1ba   : > { %v1702_v12 = vmax.f32 %v1431_v10, 0.0  ;;  %v1745_v13 = vmax.f32 %v1560_v11, 0.0  ;;  %v1175_v14 = vpop.f32.mrf.mxu0  ;;  %v1304_v15 = vpop.f32.mrf.mxu1 }
 0x1bb   : > { %v1176_v16 = vadd.f32 %v3140_v17, %v1175_v14  ;;  %v1305_v40 = vadd.f32 %v3140_v17, %v1304_v15 }
 0x1bc   : > { %1875 = vst.msk [vmem:[%s2783_s5 + $0x3d0] sm:$0xff] %vm1752_vm2, %v1702_v12 }
 0x1bd   : > { %1918 = vst.msk [vmem:[%s2783_s5 + $0x528] sm:$0xff] %vm1752_vm2, %v1745_v13  ;;  %v1617_v18 = vmax.f32 %v1176_v16, 0.0  ;;  %v1660_v19 = vmax.f32 %v1305_v40, 0.0 }
 0x1bf   : > { %1790 = vst.msk [vmem:[%s2783_s5 + $0x128] sm:$0xff] %vm1752_vm2, %v1617_v18  ;;  %v1433_v20 = vpop.f32.mrf.mxu2  ;;  %v1562_v21 = vpop.f32.mrf.mxu3 }
 0x1c0   : > { %1833 = vst.msk [vmem:[%s2783_s5 + $0x280] sm:$0xff] %vm1752_vm2, %v1660_v19  ;;  %v1434_v22 = vadd.f32 %v3140_v17, %v1433_v20  ;;  %v1563_v23 = vadd.f32 %v3140_v17, %v1562_v21 }
 0x1c2   : > { %v1703_v24 = vmax.f32 %v1434_v22, 0.0  ;;  %v1746_v25 = vmax.f32 %v1563_v23, 0.0  ;;  %v1178_v26 = vpop.f32.mrf.mxu0  ;;  %v1307_v27 = vpop.f32.mrf.mxu1 }
 0x1c3   : > { %v1179_v28 = vadd.f32 %v3140_v17, %v1178_v26  ;;  %v1308_v29 = vadd.f32 %v3140_v17, %v1307_v27 }
 0x1c4   : > { %1876 = vst.msk [vmem:[%s2783_s5 + $0x3d8] sm:$0xff] %vm1752_vm2, %v1703_v24 }
 0x1c5   : > { %1919 = vst.msk [vmem:[%s2783_s5 + $0x530] sm:$0xff] %vm1752_vm2, %v1746_v25  ;;  %v1618_v30 = vmax.f32 %v1179_v28, 0.0  ;;  %v1661_v31 = vmax.f32 %v1308_v29, 0.0 }
 0x1c7   : > { %1791 = vst.msk [vmem:[%s2783_s5 + $0x130] sm:$0xff] %vm1752_vm2, %v1618_v30  ;;  %v1436_v32 = vpop.f32.mrf.mxu2  ;;  %v1565_v33 = vpop.f32.mrf.mxu3 }
 0x1c8   : > { %1834 = vst.msk [vmem:[%s2783_s5 + $0x288] sm:$0xff] %vm1752_vm2, %v1661_v31  ;;  %v1437_v34 = vadd.f32 %v3140_v17, %v1436_v32  ;;  %v1566_v35 = vadd.f32 %v3140_v17, %v1565_v33 }
 0x1ca   : > { %v1704_v36 = vmax.f32 %v1437_v34, 0.0  ;;  %v1747_v37 = vmax.f32 %v1566_v35, 0.0  ;;  %v1181_v38 = vpop.f32.mrf.mxu0  ;;  %v1310_v39 = vpop.f32.mrf.mxu1 }
 0x1cb   : > { %v1182_v41 = vadd.f32 %v3140_v17, %v1181_v38  ;;  %v1311_v42 = vadd.f32 %v3140_v17, %v1310_v39 }
 0x1cc   : > { %1877 = vst.msk [vmem:[%s2783_s5 + $0x3e0] sm:$0xff] %vm1752_vm2, %v1704_v36 }
 0x1cd   : > { %1920 = vst.msk [vmem:[%s2783_s5 + $0x538] sm:$0xff] %vm1752_vm2, %v1747_v37  ;;  %v1619_v43 = vmax.f32 %v1182_v41, 0.0  ;;  %v1662_v44 = vmax.f32 %v1311_v42, 0.0 }
 0x1cf   : > { %1792 = vst.msk [vmem:[%s2783_s5 + $0x138] sm:$0xff] %vm1752_vm2, %v1619_v43  ;;  %v1439_v45 = vpop.f32.mrf.mxu2  ;;  %v1568_v46 = vpop.f32.mrf.mxu3 }
 0x1d0   : > { %1835 = vst.msk [vmem:[%s2783_s5 + $0x290] sm:$0xff] %vm1752_vm2, %v1662_v44  ;;  %v1440_v47 = vadd.f32 %v3140_v17, %v1439_v45  ;;  %v1569_v48 = vadd.f32 %v3140_v17, %v1568_v46 }
 0x1d2   : > { %v1705_v49 = vmax.f32 %v1440_v47, 0.0  ;;  %v1748_v50 = vmax.f32 %v1569_v48, 0.0  ;;  %v1184_v51 = vpop.f32.mrf.mxu0  ;;  %v1313_v52 = vpop.f32.mrf.mxu1 }
 0x1d3   : > { %v1185_v53 = vadd.f32 %v3140_v17, %v1184_v51  ;;  %v1314_v54 = vadd.f32 %v3140_v17, %v1313_v52 }
 0x1d4   : > { %1878 = vst.msk [vmem:[%s2783_s5 + $0x3e8] sm:$0xff] %vm1752_vm2, %v1705_v49 }
 0x1d5   : > { %1921 = vst.msk [vmem:[%s2783_s5 + $0x540] sm:$0xff] %vm1752_vm2, %v1748_v50  ;;  %v1620_v55 = vmax.f32 %v1185_v53, 0.0  ;;  %v1663_v56 = vmax.f32 %v1314_v54, 0.0 }
 0x1d7   : > { %1793 = vst.msk [vmem:[%s2783_s5 + $0x140] sm:$0xff] %vm1752_vm2, %v1620_v55  ;;  %v1442_v57 = vpop.f32.mrf.mxu2  ;;  %v1571_v58 = vpop.f32.mrf.mxu3 }
 0x1d8   : > { %1836 = vst.msk [vmem:[%s2783_s5 + $0x298] sm:$0xff] %vm1752_vm2, %v1663_v56  ;;  %v1443_v59 = vadd.f32 %v3140_v17, %v1442_v57  ;;  %v1572_v60 = vadd.f32 %v3140_v17, %v1571_v58 }
 0x1da   : > { %v1706_v61 = vmax.f32 %v1443_v59, 0.0  ;;  %v1749_v62 = vmax.f32 %v1572_v60, 0.0  ;;  %v1187_v63 = vpop.f32.mrf.mxu0  ;;  %v1316_v0 = vpop.f32.mrf.mxu1 }
 0x1db   : > { %v1188_v1 = vadd.f32 %v3140_v17, %v1187_v63  ;;  %v1317_v2 = vadd.f32 %v3140_v17, %v1316_v0 }
 0x1dc   : > { %1879 = vst.msk [vmem:[%s2783_s5 + $0x3f0] sm:$0xff] %vm1752_vm2, %v1706_v61 }
 0x1dd   : > { %1922 = vst.msk [vmem:[%s2783_s5 + $0x548] sm:$0xff] %vm1752_vm2, %v1749_v62  ;;  %v1621_v3 = vmax.f32 %v1188_v1, 0.0  ;;  %v1664_v4 = vmax.f32 %v1317_v2, 0.0 }
 0x1df   : > { %1794 = vst.msk [vmem:[%s2783_s5 + $0x148] sm:$0xff] %vm1752_vm2, %v1621_v3  ;;  %v1445_v5 = vpop.f32.mrf.mxu2  ;;  %v1574_v6 = vpop.f32.mrf.mxu3 }
 0x1e0   : > { %1837 = vst.msk [vmem:[%s2783_s5 + $0x2a0] sm:$0xff] %vm1752_vm2, %v1664_v4  ;;  %v1446_v7 = vadd.f32 %v3140_v17, %v1445_v5  ;;  %v1575_v8 = vadd.f32 %v3140_v17, %v1574_v6 }
 0x1e2   : > { %v1707_v9 = vmax.f32 %v1446_v7, 0.0  ;;  %v1750_v10 = vmax.f32 %v1575_v8, 0.0  ;;  %v1190_v11 = vpop.f32.mrf.mxu0  ;;  %v1319_v12 = vpop.f32.mrf.mxu1 }
 0x1e3   : > { %v1191_v13 = vadd.f32 %v3140_v17, %v1190_v11  ;;  %v1320_v14 = vadd.f32 %v3140_v17, %v1319_v12 }
 0x1e4   : > { %1880 = vst.msk [vmem:[%s2783_s5 + $0x3f8] sm:$0xff] %vm1752_vm2, %v1707_v9 }
 0x1e5   : > { %1923 = vst.msk [vmem:[%s2783_s5 + $0x550] sm:$0xff] %vm1752_vm2, %v1750_v10  ;;  %v1622_v15 = vmax.f32 %v1191_v13, 0.0  ;;  %v1665_v16 = vmax.f32 %v1320_v14, 0.0 }
 0x1e7   : > { %1795 = vst.msk [vmem:[%s2783_s5 + $0x150] sm:$0xff] %vm1752_vm2, %v1622_v15  ;;  %v1448_v40 = vpop.f32.mrf.mxu2  ;;  %v1577_v18 = vpop.f32.mrf.mxu3 }
 0x1e8   : > { %1838 = vst.msk [vmem:[%s2783_s5 + $0x2a8] sm:$0xff] %vm1752_vm2, %v1665_v16  ;;  %v1449_v19 = vadd.f32 %v3140_v17, %v1448_v40  ;;  %v1578_v20 = vadd.f32 %v3140_v17, %v1577_v18 }
 0x1ea   : > { %v1708_v21 = vmax.f32 %v1449_v19, 0.0  ;;  %v1751_v22 = vmax.f32 %v1578_v20, 0.0 }
 0x1ec   : > { %1881 = vst.msk [vmem:[%s2783_s5 + $0x400] sm:$0xff] %vm1752_vm2, %v1708_v21 }
 0x1ed   : > { %1924 = vst.msk [vmem:[%s2783_s5 + $0x558] sm:$0xff] %vm1752_vm2, %v1751_v22 }
 0x1ee PF: > { %s13_s12 = sadd.s32 1, %s2622_s12  }
 0x1ef   : > { %p10_p4 = scmp.ge.s32.totalorder %s13_s12, 4  }
 0x1f1   :  { %12 = sbr.rel (!%p10_p4) target bundleno = 1 (0x1), region = 62 }

// kernel: dqn_forward.3
= control target key start
LH: loop header
LB: loop body
LE: loop exit
PB: predicated region body
PF: predicated region fallthrough
CT: control target
= control target key end

     0   :  { %vm128_vm0 = vcmask 1045504   ;;  %vm100_vm1 = vcmask 113664   ;;  %s2968_s0 = inlined_call_operand.vmem [shape: f32[4,72,270], index: 0, kind: input, shape index: {}]   ;;  %s2969_s1 = inlined_call_operand.vmem [shape: f32[270,60], index: 1, kind: input, shape index: {}]   ;;  %s2970_s2 = inlined_call_operand.vmem [shape: f32[1,60], index: 2, kind: input, shape index: {}]   ;;  %s2971_s3 = inlined_call_operand.vmem [shape: f32[9,60,90], index: 3, kind: input, shape index: {}]   ;;  %s2972_s4 = inlined_call_operand.vmem [shape: f32[1,90], index: 4, kind: input, shape index: {}]   ;;  %s2973_s5 = inlined_call_operand.vmem [shape: f32[90,128], index: 5, kind: input, shape index: {}]   ;;  %s2974_s6 = inlined_call_operand.vmem [shape: f32[1,128], index: 6, kind: input, shape index: {}]   ;;  %s2975_s7 = inlined_call_operand.vmem [shape: f32[128,64], index: 7, kind: input, shape index: {}]   ;;  %s2976_s8 = inlined_call_operand.vmem [shape: f32[1,64], index: 8, kind: input, shape index: {}]   ;;  %s2977_s9 = inlined_call_operand.vmem [shape: f32[64,4], index: 9, kind: input, shape index: {}]   ;;  %s2978_s10 = inlined_call_operand.vmem [shape: f32[1,4], index: 10, kind: input, shape index: {}]   ;;  %s2979_s11 = inlined_call_operand.hbm [shape: f32[2,4], index: 11, kind: output, shape index: {}]  }
   0x1   :  { %v1687_v0 = vld [vmem:[%s2969_s1 + $0x78] sm:$0xff]  ;;  %v1697_v2 = vld [vmem:[%s2969_s1 + $0x108] sm:$0x3f]  ;;  %v1704_v3 = vld [vmem:[%s2969_s1 + $0x70] sm:$0xff] }
   0x2   :  { %v1692_v1 = vld [vmem:[%s2969_s1 + $0xf8] sm:$0xff]  ;;  %132 = vmatpush.msra.mxu0 %v1687_v0  ;;  %v1709_v4 = vld [vmem:[%s2969_s1 + $0xf0] sm:$0xff]  ;;  %v1714_v5 = vld [vmem:[%s2969_s1 + $0x100] sm:$0xff]  ;;  %1369 = vmatpush.msk.msra.mxu2 %vm128_vm0, %v1697_v2 }
   0x3   :  { %176 = vmatpush.msra.mxu1 %v1692_v1  ;;  %319 = vmatpush.msra.mxu3 %v1687_v0  ;;  %v41_v6 = vld [vmem:[%s2968_s0 + $0x10] sm:$0xff]  ;;  %v1725_v7 = vld [vmem:[%s2969_s1 + $0x68] sm:$0xff]  ;;  %v1739_v9 = vld [vmem:[%s2969_s1 + $0x60] sm:$0xff] }
   0x4   :  { %133 = vmatpush.msra.mxu0 %v1704_v3  ;;  %v1732_v8 = vld [vmem:[%s2969_s1 + $0xe8] sm:$0xff]  ;;  %235 = vmatpush.msra.mxu2 %v1714_v5  ;;  %v1746_v10 = vld [vmem:[%s2969_s1 + $0xe0] sm:$0xff]  ;;  %v1753_v11 = vld [vmem:[%s2969_s1 + $0x58] sm:$0xff] }
   0x5   :  { %177 = vmatpush.msra.mxu1 %v1709_v4  ;;  %320 = vmatpush.msra.mxu3 %v1704_v3  ;;  %v1759_v12 = vld [vmem:[%s2969_s1 + $0xd8] sm:$0xff]  ;;  %v1767_v13 = vld [vmem:[%s2969_s1 + $0x50] sm:$0xff]  ;;  %v44_v15 = vld [vmem:[%s2968_s0 + $0x28] sm:$0xff] }
   0x6   :  { %1370 = vmatmul.msk.f32.vlgmr.msra.gmra.mxu2 %vm100_vm1, %v41_v6  ;;  %134 = vmatpush.msra.mxu0 %v1725_v7  ;;  %v1773_v14 = vld [vmem:[%s2969_s1 + $0xd0] sm:$0xff]  ;;  %v1784_v16 = vld [vmem:[%s2969_s1 + $0x48] sm:$0xff]  ;;  %v1798_v18 = vld [vmem:[%s2969_s1 + $0x40] sm:$0xff] }
   0x7   :  { %178 = vmatpush.msra.mxu1 %v1732_v8  ;;  %321 = vmatpush.msra.mxu3 %v1725_v7  ;;  %v1790_v17 = vld [vmem:[%s2969_s1 + $0xc8] sm:$0xff]  ;;  %v1805_v19 = vld [vmem:[%s2969_s1 + $0xc0] sm:$0xff]  ;;  %v1812_v20 = vld [vmem:[%s2969_s1 + $0x38] sm:$0xff] }
   0x8   :  { %135 = vmatpush.msra.mxu0 %v1739_v9  ;;  %363 = vmatpush.msrb.mxu2 %v1692_v1  ;;  %v1818_v21 = vld [vmem:[%s2969_s1 + $0xb8] sm:$0xff]  ;;  %v1823_v22 = vld [vmem:[%s2969_s1 + $0x30] sm:$0xff]  ;;  %v47_v24 = vld [vmem:[%s2968_s0 + $0x40] sm:$0xff] }
   0x9   :  { %179 = vmatpush.msra.mxu1 %v1746_v10  ;;  %322 = vmatpush.msra.mxu3 %v1739_v9  ;;  %v1832_v23 = vld [vmem:[%s2969_s1 + $0xb0] sm:$0xff]  ;;  %v1843_v25 = vld [vmem:[%s2969_s1 + $0x28] sm:$0xff] }
   0xa   :  { %136 = vmatpush.msra.mxu0 %v1753_v11  ;;  %364 = vmatpush.msrb.mxu2 %v1709_v4 }
   0xb   :  { %180 = vmatpush.msra.mxu1 %v1759_v12  ;;  %323 = vmatpush.msra.mxu3 %v1753_v11 }
   0xc   :  { %137 = vmatpush.msra.mxu0 %v1767_v13  ;;  %365 = vmatpush.msrb.mxu2 %v1732_v8 }
   0xd   :  { %181 = vmatpush.msra.mxu1 %v1773_v14  ;;  %324 = vmatpush.msra.mxu3 %v1767_v13 }
   0xe   :  { %1371 = vmatmul.msk.f32.gmra.mxu2 %vm100_vm1, %v44_v15  ;;  %138 = vmatpush.msra.mxu0 %v1784_v16 }
   0xf   :  { %182 = vmatpush.msra.mxu1 %v1790_v17  ;;  %325 = vmatpush.msra.mxu3 %v1784_v16 }
  0x10   :  { %139 = vmatpush.msra.mxu0 %v1798_v18  ;;  %366 = vmatpush.msrb.mxu2 %v1746_v10 }
  0x11   :  { %183 = vmatpush.msra.mxu1 %v1805_v19  ;;  %326 = vmatpush.msra.mxu3 %v1798_v18 }
  0x12   :  { %140 = vmatpush.msra.mxu0 %v1812_v20  ;;  %367 = vmatpush.msrb.mxu2 %v1759_v12 }
  0x13   :  { %184 = vmatpush.msra.mxu1 %v1818_v21  ;;  %327 = vmatpush.msra.mxu3 %v1812_v20 }
  0x14   :  { %16 = vsyncpa [#allocation5], 0  ;;  %141 = vmatpush.msra.mxu0 %v1823_v22  ;;  %v1849_v26 = vld [vmem:[%s2969_s1 + $0xa8] sm:$0xff]  ;;  %368 = vmatpush.msrb.mxu2 %v1773_v14  ;;  %v1857_v27 = vld [vmem:[%s2969_s1 + $0x20] sm:$0xff]  ;;  %vm906_vm2 = vcmask 1043456   ;;  %vm874_vm3 = vcmask 490496  }
  0x15   :  { %185 = vmatpush.msra.mxu1 %v1832_v23  ;;  %328 = vmatpush.msra.mxu3 %v1823_v22  ;;  %v1864_v28 = vld [vmem:[%s2969_s1 + $0xa0] sm:$0xff]  ;;  %v1871_v29 = vld [vmem:[%s2969_s1 + $0x18] sm:$0xff]  ;;  %v1885_v31 = vld [vmem:[%s2969_s1 + $0x10] sm:$0xff]  ;;  %vm1249_vm4 = vcmask 1041408   ;;  %vm1221_vm5 = vcmask 736256   ;;  %vm1327_vm6 = vcmask 523264  }
  0x16   :  { %1372 = vmatmul.msk.f32.gmra.mxu2 %vm100_vm1, %v47_v24  ;;  %142 = vmatpush.msra.mxu0 %v1843_v25  ;;  %v1877_v30 = vld [vmem:[%s2969_s1 + $0x98] sm:$0xff]  ;;  %v1891_v32 = vld [vmem:[%s2969_s1 + $0x90] sm:$0xff]  ;;  %v1902_v34 = vld [vmem:[%s2969_s1 + $0x8] sm:$0xff]  ;;  %s1623_s23 = smov [#allocation4]   ;;  %vm1351_vm7 = vcmask 25600  }
  0x17   :  { %186 = vmatpush.msra.mxu1 %v1849_v26  ;;  %329 = vmatpush.msra.mxu3 %v1843_v25  ;;  %v50_v33 = vld [vmem:[%s2968_s0 + $0x58] sm:$0xff]  ;;  %v1908_v35 = vld [vmem:[%s2969_s1 + $0x88] sm:$0xff]  ;;  %v1916_v36 = vld [vmem:[%s2969_s1] sm:$0xff] }
  0x18   :  { %143 = vmatpush.msra.mxu0 %v1857_v27  ;;  %369 = vmatpush.msrb.mxu2 %v1790_v17  ;;  %v1923_v37 = vld [vmem:[%s2969_s1 + $0x80] sm:$0xff]  ;;  %v40_v39 = vld [vmem:[%s2968_s0 + $0x8] sm:$0xff]  ;;  %v1379_v40 = vld [vmem:[%s2968_s0 + $0xd8] sm:$0xff] }
  0x19   :  { %187 = vmatpush.msra.mxu1 %v1864_v28  ;;  %330 = vmatpush.msra.mxu3 %v1857_v27  ;;  %v39_v38 = vld [vmem:[%s2968_s0] sm:$0xff]  ;;  %v53_v41 = vld [vmem:[%s2968_s0 + $0x70] sm:$0xff]  ;;  %v42_v42 = vld [vmem:[%s2968_s0 + $0x18] sm:$0xff] }
  0x1a   :  { %144 = vmatpush.msra.mxu0 %v1871_v29  ;;  %370 = vmatpush.msrb.mxu2 %v1805_v19  ;;  %v43_v43 = vld [vmem:[%s2968_s0 + $0x20] sm:$0xff]  ;;  %v1382_v44 = vld [vmem:[%s2968_s0 + $0xf0] sm:$0xff]  ;;  %v56_v45 = vld [vmem:[%s2968_s0 + $0x88] sm:$0xff] }
  0x1b   :  { %188 = vmatpush.msra.mxu1 %v1877_v30  ;;  %331 = vmatpush.msra.mxu3 %v1871_v29  ;;  %v45_v46 = vld [vmem:[%s2968_s0 + $0x30] sm:$0xff]  ;;  %v46_v47 = vld [vmem:[%s2968_s0 + $0x38] sm:$0xff]  ;;  %v1385_v48 = vld [vmem:[%s2968_s0 + $0x108] sm:$0xff] }
  0x1c   :  { %145 = vmatpush.msra.mxu0 %v1885_v31  ;;  %371 = vmatpush.msrb.mxu2 %v1818_v21  ;;  %v59_v49 = vld [vmem:[%s2968_s0 + $0xa0] sm:$0xff]  ;;  %v48_v50 = vld [vmem:[%s2968_s0 + $0x48] sm:$0xff]  ;;  %v49_v51 = vld [vmem:[%s2968_s0 + $0x50] sm:$0xff] }
  0x1d   :  { %189 = vmatpush.msra.mxu1 %v1891_v32  ;;  %332 = vmatpush.msra.mxu3 %v1885_v31  ;;  %v1388_v52 = vld [vmem:[%s2968_s0 + $0x120] sm:$0xff]  ;;  %v62_v53 = vld [vmem:[%s2968_s0 + $0xb8] sm:$0xff]  ;;  %v52_v55 = vld [vmem:[%s2968_s0 + $0x68] sm:$0xff] }
  0x1e   :  { %1373 = vmatmul.msk.f32.gmra.mxu2 %vm100_vm1, %v50_v33  ;;  %146 = vmatpush.msra.mxu0 %v1902_v34  ;;  %v51_v54 = vld [vmem:[%s2968_s0 + $0x60] sm:$0xff]  ;;  %v1391_v56 = vld [vmem:[%s2968_s0 + $0x138] sm:$0xff]  ;;  %v65_v57 = vld [vmem:[%s2968_s0 + $0xd0] sm:$0xff] }
  0x1f   :  { %190 = vmatpush.msra.mxu1 %v1908_v35  ;;  %333 = vmatpush.msra.mxu3 %v1902_v34  ;;  %v54_v58 = vld [vmem:[%s2968_s0 + $0x78] sm:$0xff]  ;;  %v55_v59 = vld [vmem:[%s2968_s0 + $0x80] sm:$0xff]  ;;  %v1394_v60 = vld [vmem:[%s2968_s0 + $0x150] sm:$0xff] }
  0x20   :  { %147 = vmatpush.msra.mxu0 %v1916_v36  ;;  %372 = vmatpush.msrb.mxu2 %v1832_v23  ;;  %v1380_v61 = vld [vmem:[%s2968_s0 + $0xe0] sm:$0xff]  ;;  %v57_v62 = vld [vmem:[%s2968_s0 + $0x90] sm:$0xff]  ;;  %v58_v63 = vld [vmem:[%s2968_s0 + $0x98] sm:$0xff] }
  0x21   :  { %191 = vmatpush.msra.mxu1 %v1923_v37  ;;  %334 = vmatpush.msra.mxu3 %v1916_v36  ;;  %v1400_v6 = vld [vmem:[%s2968_s0 + $0x180] sm:$0xff]  ;;  %v1432_v33 = vld [vmem:[%s2968_s0 + $0x230] sm:$0xff] }
  0x22   :  { %148 = vmatmul.f32.vlgmr.msra.gmra.mxu0 %v39_v38  ;;  %192 = vmatmul.f32.vlgmr.msra.gmra.mxu1 %v40_v39  ;;  %v1392_v15 = vld [vmem:[%s2968_s0 + $0x140] sm:$0xff]  ;;  %v1435_v38 = vld [vmem:[%s2968_s0 + $0x248] sm:$0xff] }
  0x23   :  { %335 = vmatmul.f32.vlgmr.msra.gmra.mxu3 %v1379_v40  ;;  %515 = vmatpush.msrb.mxu1 %v1687_v0  ;;  %v1426_v24 = vld [vmem:[%s2968_s0 + $0x200] sm:$0xff]  ;;  %v1421_v40 = vld [vmem:[%s2968_s0 + $0x1d8] sm:$0xff] }
  0x24   :  { %559 = vmatpush.msrb.mxu3 %v1692_v1  ;;  %373 = vmatpush.msrb.mxu2 %v1849_v26 }
  0x25   :  { %516 = vmatpush.msrb.mxu1 %v1704_v3  ;;  %1406 = vmatpush.msk.msrb.mxu0 %vm128_vm0, %v1697_v2 }
  0x26   :  { %1374 = vmatmul.msk.f32.gmra.mxu2 %vm100_vm1, %v53_v41  ;;  %560 = vmatpush.msrb.mxu3 %v1709_v4 }
  0x27   :  { %517 = vmatpush.msrb.mxu1 %v1725_v7  ;;  %374 = vmatpush.msrb.mxu2 %v1864_v28 }
  0x28   :  { %561 = vmatpush.msrb.mxu3 %v1732_v8  ;;  %422 = vmatpush.msrb.mxu0 %v1714_v5 }
  0x29   :  { %518 = vmatpush.msrb.mxu1 %v1739_v9  ;;  %375 = vmatpush.msrb.mxu2 %v1877_v30 }
  0x2a   :  { %151 = vmatmul.f32.gmra.mxu0 %v42_v42  ;;  %195 = vmatmul.f32.gmra.mxu1 %v43_v43  ;;  %v1402_v43 = vld [vmem:[%s2968_s0 + $0x190] sm:$0xff] }
  0x2b   :  { %338 = vmatmul.f32.gmra.mxu3 %v1382_v44  ;;  %519 = vmatpush.msrb.mxu1 %v1753_v11  ;;  %v1437_v44 = vld [vmem:[%s2968_s0 + $0x258] sm:$0xff] }
  0x2c   :  { %562 = vmatpush.msrb.mxu3 %v1746_v10  ;;  %376 = vmatpush.msrb.mxu2 %v1891_v32 }
  0x2d   :  { %520 = vmatpush.msrb.mxu1 %v1767_v13  ;;  %711 = vmatpush.msra.mxu0 %v1687_v0 }
  0x2e   :  { %1375 = vmatmul.msk.f32.gmra.mxu2 %vm100_vm1, %v56_v45  ;;  %563 = vmatpush.msrb.mxu3 %v1759_v12  ;;  %v1438_v45 = vld [vmem:[%s2968_s0 + $0x260] sm:$0xff] }
  0x2f   :  { %377 = vmatpush.msrb.mxu2 %v1908_v35  ;;  %521 = vmatpush.msrb.mxu1 %v1784_v16 }
  0x30   :  { %564 = vmatpush.msrb.mxu3 %v1773_v14  ;;  %712 = vmatpush.msra.mxu0 %v1704_v3 }
  0x31   :  { %378 = vmatpush.msrb.mxu2 %v1923_v37  ;;  %522 = vmatpush.msrb.mxu1 %v1798_v18 }
  0x32   :  { %154 = vmatmul.f32.gmra.mxu0 %v45_v46  ;;  %198 = vmatmul.f32.gmra.mxu1 %v46_v47  ;;  %v1424_v47 = vld [vmem:[%s2968_s0 + $0x1f0] sm:$0xff] }
  0x33   :  { %341 = vmatmul.f32.gmra.mxu3 %v1385_v48  ;;  %523 = vmatpush.msrb.mxu1 %v1812_v20 }
  0x34   :  { %565 = vmatpush.msrb.mxu3 %v1790_v17  ;;  %1443 = vmatpush.msk.msra.mxu2 %vm128_vm0, %v1697_v2 }
  0x35   :  { %524 = vmatpush.msrb.mxu1 %v1823_v22  ;;  %713 = vmatpush.msra.mxu0 %v1725_v7 }
  0x36   :  { %1376 = vmatmul.msk.f32.gmra.mxu2 %vm100_vm1, %v59_v49  ;;  %566 = vmatpush.msrb.mxu3 %v1805_v19 }
  0x37   :  { %525 = vmatpush.msrb.mxu1 %v1843_v25  ;;  %618 = vmatpush.msra.mxu2 %v1714_v5 }
  0x38   :  { %567 = vmatpush.msrb.mxu3 %v1818_v21  ;;  %714 = vmatpush.msra.mxu0 %v1739_v9 }
  0x39   :  { %526 = vmatpush.msrb.mxu1 %v1857_v27 }
  0x3a   :  { %157 = vmatmul.f32.gmra.mxu0 %v48_v50  ;;  %201 = vmatmul.f32.gmra.mxu1 %v49_v51  ;;  %v1405_v51 = vld [vmem:[%s2968_s0 + $0x1a8] sm:$0xff] }
  0x3b   :  { %344 = vmatmul.f32.gmra.mxu3 %v1388_v52  ;;  %527 = vmatpush.msrb.mxu1 %v1871_v29  ;;  %v1440_v52 = vld [vmem:[%s2968_s0 + $0x270] sm:$0xff] }
  0x3c   :  { %568 = vmatpush.msrb.mxu3 %v1832_v23  ;;  %715 = vmatpush.msra.mxu0 %v1753_v11 }
  0x3d   :  { %528 = vmatpush.msrb.mxu1 %v1885_v31 }
  0x3e   :  { %1377 = vmatmul.msk.f32.gmra.mxu2 %vm100_vm1, %v62_v53  ;;  %569 = vmatpush.msrb.mxu3 %v1849_v26  ;;  %v1441_v53 = vld [vmem:[%s2968_s0 + $0x278] sm:$0xff] }
  0x3f   :  { %529 = vmatpush.msrb.mxu1 %v1902_v34  ;;  %716 = vmatpush.msra.mxu0 %v1767_v13 }
  0x40   :  { %570 = vmatpush.msrb.mxu3 %v1864_v28 }
  0x41   :  { %530 = vmatpush.msrb.mxu1 %v1916_v36  ;;  %717 = vmatpush.msra.mxu0 %v1784_v16 }
  0x42   :  { %160 = vmatmul.f32.gmra.mxu0 %v51_v54  ;;  %204 = vmatmul.f32.gmra.mxu1 %v52_v55  ;;  %v1427_v55 = vld [vmem:[%s2968_s0 + $0x208] sm:$0xff] }
  0x43   :  { %347 = vmatmul.f32.gmra.mxu3 %v1391_v56  ;;  %755 = vmatpush.msra.mxu1 %v1692_v1  ;;  %v1383_v1 = vld [vmem:[%s2968_s0 + $0xf8] sm:$0xff] }
  0x44   :  { %571 = vmatpush.msrb.mxu3 %v1877_v30  ;;  %718 = vmatpush.msra.mxu0 %v1798_v18 }
  0x45   :  { %756 = vmatpush.msra.mxu1 %v1709_v4  ;;  %v61_v4 = vld [vmem:[%s2968_s0 + $0xb0] sm:$0xff] }
  0x46   :  { %1378 = vmatmul.msk.f32.gmra.mxu2 %vm100_vm1, %v65_v57  ;;  %572 = vmatpush.msrb.mxu3 %v1891_v32 }
  0x47   :  { %757 = vmatpush.msra.mxu1 %v1732_v8  ;;  %719 = vmatpush.msra.mxu0 %v1812_v20  ;;  %v63_v8 = vld [vmem:[%s2968_s0 + $0xc0] sm:$0xff] }
  0x48   :  { %573 = vmatpush.msrb.mxu3 %v1908_v35 }
  0x49   :  { %758 = vmatpush.msra.mxu1 %v1746_v10  ;;  %720 = vmatpush.msra.mxu0 %v1823_v22  ;;  %v1403_v10 = vld [vmem:[%s2968_s0 + $0x198] sm:$0xff] }
  0x4a   :  { %163 = vmatmul.f32.gmra.mxu0 %v54_v58  ;;  %207 = vmatmul.f32.gmra.mxu1 %v55_v59  ;;  %v1454_v59 = vld [vmem:[%s2968_s0 + $0x290] sm:$0xff] }
  0x4b   :  { %350 = vmatmul.f32.gmra.mxu3 %v1394_v60  ;;  %759 = vmatpush.msra.mxu1 %v1759_v12  ;;  %v1381_v12 = vld [vmem:[%s2968_s0 + $0xe8] sm:$0xff] }
  0x4c   :  { %574 = vmatpush.msrb.mxu3 %v1923_v37  ;;  %721 = vmatpush.msra.mxu0 %v1843_v25  ;;  %v1453_v60 = vld [vmem:[%s2968_s0 + $0x288] sm:$0xff] }
  0x4d   :  { %760 = vmatpush.msra.mxu1 %v1773_v14  ;;  %v1417_v14 = vld [vmem:[%s2968_s0 + $0x1b8] sm:$0xff] }
  0x4e   :  { %1575 = vmatpush.msra.mxu3 %v1687_v0  ;;  %379 = vmatmul.f32.vlgmr.msrb.gmra.mxu2 %v1380_v61  ;;  %v1397_v0 = vld [vmem:[%s2968_s0 + $0x168] sm:$0xff]  ;;  %v1474_v61 = vld [vmem:[%s2968_s0 + $0x330] sm:$0xff] }
  0x4f   :  { %722 = vmatpush.msra.mxu0 %v1857_v27  ;;  %761 = vmatpush.msra.mxu1 %v1790_v17  ;;  %v1419_v17 = vld [vmem:[%s2968_s0 + $0x1c8] sm:$0xff] }
  0x50   :  { %1576 = vmatpush.msra.mxu3 %v1704_v3  ;;  %v60_v3 = vld [vmem:[%s2968_s0 + $0xa8] sm:$0xff] }
  0x51   :  { %723 = vmatpush.msra.mxu0 %v1871_v29  ;;  %762 = vmatpush.msra.mxu1 %v1805_v19  ;;  %v1395_v19 = vld [vmem:[%s2968_s0 + $0x158] sm:$0xff] }
  0x52   :  { %1577 = vmatpush.msra.mxu3 %v1725_v7  ;;  %166 = vmatmul.f32.gmra.mxu0 %v57_v62  ;;  %v1386_v7 = vld [vmem:[%s2968_s0 + $0x110] sm:$0xff] }
  0x53   :  { %210 = vmatmul.f32.gmra.mxu1 %v58_v63  ;;  %353 = vmatmul.f32.gmra.mxu3 %v1397_v0  ;;  %v1430_v63 = vld [vmem:[%s2968_s0 + $0x220] sm:$0xff] }
  0x54   :  { %763 = vmatpush.msra.mxu1 %v1818_v21  ;;  %1578 = vmatpush.msra.mxu3 %v1739_v9  ;;  %v64_v9 = vld [vmem:[%s2968_s0 + $0xc8] sm:$0xff]  ;;  %v1422_v21 = vld [vmem:[%s2968_s0 + $0x1e0] sm:$0xff] }
  0x55   :  { %724 = vmatpush.msra.mxu0 %v1885_v31 }
  0x56   :  { %764 = vmatpush.msra.mxu1 %v1832_v23  ;;  %382 = vmatmul.f32.gmra.mxu2 %v1383_v1  ;;  %v1390_v23 = vld [vmem:[%s2968_s0 + $0x130] sm:$0xff] }
  0x57   :  { %1579 = vmatpush.msra.mxu3 %v1753_v11  ;;  %725 = vmatpush.msra.mxu0 %v1902_v34  ;;  %v1389_v11 = vld [vmem:[%s2968_s0 + $0x128] sm:$0xff] }
  0x58   :  { %765 = vmatpush.msra.mxu1 %v1849_v26  ;;  %v1393_v26 = vld [vmem:[%s2968_s0 + $0x148] sm:$0xff] }
  0x59   :  { %1580 = vmatpush.msra.mxu3 %v1767_v13  ;;  %726 = vmatpush.msra.mxu0 %v1916_v36  ;;  %v1416_v13 = vld [vmem:[%s2968_s0 + $0x1b0] sm:$0xff] }
  0x5a   :  { %766 = vmatpush.msra.mxu1 %v1864_v28  ;;  %169 = vmatmul.f32.gmra.mxu0 %v60_v3  ;;  %v1429_v28 = vld [vmem:[%s2968_s0 + $0x218] sm:$0xff] }
  0x5b   :  { %213 = vmatmul.f32.gmra.mxu1 %v61_v4  ;;  %356 = vmatmul.f32.gmra.mxu3 %v1400_v6  ;;  %v1457_v4 = vld [vmem:[%s2968_s0 + $0x2a8] sm:$0xff]  ;;  %v1456_v6 = vld [vmem:[%s2968_s0 + $0x2a0] sm:$0xff] }
  0x5c   :  { %767 = vmatpush.msra.mxu1 %v1877_v30  ;;  %1581 = vmatpush.msra.mxu3 %v1784_v16  ;;  %v1384_v16 = vld [vmem:[%s2968_s0 + $0x100] sm:$0xff] }
  0x5d   :  { %v1404_v30 = vld [vmem:[%s2968_s0 + $0x1a0] sm:$0xff] }
  0x5e   :  { %768 = vmatpush.msra.mxu1 %v1891_v32  ;;  %385 = vmatmul.f32.gmra.mxu2 %v1386_v7  ;;  %v1431_v32 = vld [vmem:[%s2968_s0 + $0x228] sm:$0xff] }
  0x5f   :  { %1582 = vmatpush.msra.mxu3 %v1798_v18  ;;  %v1420_v18 = vld [vmem:[%s2968_s0 + $0x1d0] sm:$0xff]  ;;  %v1477_v7 = vld [vmem:[%s2968_s0 + $0x348] sm:$0xff] }
  0x60   :  { %769 = vmatpush.msra.mxu1 %v1908_v35  ;;  %v1418_v35 = vld [vmem:[%s2968_s0 + $0x1c0] sm:$0xff] }
  0x61   :  { %1583 = vmatpush.msra.mxu3 %v1812_v20  ;;  %v1387_v20 = vld [vmem:[%s2968_s0 + $0x118] sm:$0xff] }
  0x62   :  { %770 = vmatpush.msra.mxu1 %v1923_v37  ;;  %172 = vmatmul.f32.gmra.mxu0 %v63_v8  ;;  %v1434_v37 = vld [vmem:[%s2968_s0 + $0x240] sm:$0xff] }
  0x63   :  { %216 = vmatmul.f32.gmra.mxu1 %v64_v9  ;;  %359 = vmatmul.f32.gmra.mxu3 %v1403_v10  ;;  %v1433_v9 = vld [vmem:[%s2968_s0 + $0x238] sm:$0xff] }
  0x64   :  { %1584 = vmatpush.msra.mxu3 %v1823_v22  ;;  %v1423_v22 = vld [vmem:[%s2968_s0 + $0x1e8] sm:$0xff] }
  0x66   :  { %388 = vmatmul.f32.gmra.mxu2 %v1389_v11  ;;  %1585 = vmatpush.msra.mxu3 %v1843_v25  ;;  %v1401_v25 = vld [vmem:[%s2968_s0 + $0x188] sm:$0xff] }
  0x68   :  { %1586 = vmatpush.msra.mxu3 %v1857_v27  ;;  %v1428_v27 = vld [vmem:[%s2968_s0 + $0x210] sm:$0xff] }
  0x6a   :  { %1407 = vmatmul.msk.f32.vlgmr.msrb.gmra.mxu0 %vm100_vm1, %v1381_v12  ;;  %1587 = vmatpush.msra.mxu3 %v1871_v29 }
  0x6b   :  { %531 = vmatmul.f32.vlgmr.msrb.gmra.mxu1 %v1416_v13  ;;  %575 = vmatmul.f32.vlgmr.msrb.gmra.mxu3 %v1417_v14  ;;  %v1460_v13 = vld [vmem:[%s2968_s0 + $0x2c0] sm:$0xff]  ;;  %v1459_v14 = vld [vmem:[%s2968_s0 + $0x2b8] sm:$0xff] }
  0x6c   :  { %1588 = vmatpush.msra.mxu3 %v1885_v31  ;;  %v1396_v31 = vld [vmem:[%s2968_s0 + $0x160] sm:$0xff] }
  0x6e   :  { %391 = vmatmul.f32.gmra.mxu2 %v1392_v15  ;;  %1589 = vmatpush.msra.mxu3 %v1902_v34  ;;  %v1455_v15 = vld [vmem:[%s2968_s0 + $0x298] sm:$0xff] }
  0x70   :  { %1590 = vmatpush.msra.mxu3 %v1916_v36  ;;  %v1399_v36 = vld [vmem:[%s2968_s0 + $0x178] sm:$0xff] }
  0x72   :  { %1408 = vmatmul.msk.f32.gmra.mxu0 %vm100_vm1, %v1384_v16  ;;  %1480 = vmatpush.msk.msrb.mxu3 %vm128_vm0, %v1697_v2  ;;  %v1398_v2 = vld [vmem:[%s2968_s0 + $0x170] sm:$0xff] }
  0x73   :  { %534 = vmatmul.f32.gmra.mxu1 %v1419_v17  ;;  %578 = vmatmul.f32.gmra.mxu3 %v1420_v18  ;;  %v1436_v17 = vld [vmem:[%s2968_s0 + $0x250] sm:$0xff] }
  0x74   :  { %814 = vmatpush.msrb.mxu3 %v1714_v5  ;;  %v1425_v5 = vld [vmem:[%s2968_s0 + $0x1f8] sm:$0xff] }
  0x76   :  { %394 = vmatmul.f32.gmra.mxu2 %v1395_v19 }
  0x7a   :  { %1409 = vmatmul.msk.f32.gmra.mxu0 %vm100_vm1, %v1387_v20 }
  0x7b   :  { %537 = vmatmul.f32.gmra.mxu1 %v1422_v21  ;;  %581 = vmatmul.f32.gmra.mxu3 %v1423_v22  ;;  %v1463_v21 = vld [vmem:[%s2968_s0 + $0x2d8] sm:$0xff]  ;;  %v1462_v22 = vld [vmem:[%s2968_s0 + $0x2d0] sm:$0xff] }
  0x7e   :  { %397 = vmatmul.f32.gmra.mxu2 %v1398_v2  ;;  %v1458_v2 = vld [vmem:[%s2968_s0 + $0x2b0] sm:$0xff] }
  0x82   :  { %1410 = vmatmul.msk.f32.gmra.mxu0 %vm100_vm1, %v1390_v23 }
  0x83   :  { %540 = vmatmul.f32.gmra.mxu1 %v1425_v5  ;;  %584 = vmatmul.f32.gmra.mxu3 %v1426_v24  ;;  %v1439_v5 = vld [vmem:[%s2968_s0 + $0x268] sm:$0xff] }
  0x86   :  { %400 = vmatmul.f32.gmra.mxu2 %v1401_v25 }
  0x89   :  { %v2200_v29 = vpop.f32.mrf.mxu2 }
  0x8a   :  { %1411 = vmatmul.msk.f32.gmra.mxu0 %vm100_vm1, %v1393_v26 }
  0x8b   :  { %543 = vmatmul.f32.gmra.mxu1 %v1428_v27  ;;  %587 = vmatmul.f32.gmra.mxu3 %v1429_v28  ;;  %v1466_v27 = vld [vmem:[%s2968_s0 + $0x2f0] sm:$0xff]  ;;  %v1465_v28 = vld [vmem:[%s2968_s0 + $0x2e8] sm:$0xff] }
  0x8e   :  { %403 = vmatmul.f32.gmra.mxu2 %v1404_v30 }
  0x91   :  { %v2215_v34 = vpop.f32.mrf.mxu2 }
  0x92   :  { %1412 = vmatmul.msk.f32.gmra.mxu0 %vm100_vm1, %v1396_v31  ;;  %v1461_v31 = vld [vmem:[%s2968_s0 + $0x2c8] sm:$0xff] }
  0x93   :  { %546 = vmatmul.f32.gmra.mxu1 %v1431_v32  ;;  %590 = vmatmul.f32.gmra.mxu3 %v1432_v33 }
  0x96   :  { %1444 = vmatmul.msk.f32.vlgmr.msra.gmra.mxu2 %vm100_vm1, %v1418_v35  ;;  %v1442_v35 = vld [vmem:[%s2968_s0 + $0x280] sm:$0xff] }
  0x99   :  { %v2231_v39 = vpop.f32.mrf.mxu2 }
  0x9a   :  { %1413 = vmatmul.msk.f32.gmra.mxu0 %vm100_vm1, %v1399_v36 }
  0x9b   :  { %549 = vmatmul.f32.gmra.mxu1 %v1434_v37  ;;  %593 = vmatmul.f32.gmra.mxu3 %v1435_v38 }
  0x9e   :  { %1445 = vmatmul.msk.f32.gmra.mxu2 %vm100_vm1, %v1421_v40  ;;  %v1469_v40 = vld [vmem:[%s2968_s0 + $0x308] sm:$0xff] }
  0x9f   :  { %v2238_v41 = vpop.f32.mrf.mxu0  ;;  %v2240_v42 = vpop.f32.mrf.mxu1 }
  0xa1   :  { %v2251_v46 = vpop.f32.mrf.mxu2 }
  0xa2   :  { %1414 = vmatmul.msk.f32.gmra.mxu0 %vm100_vm1, %v1402_v43  ;;  %v1468_v43 = vld [vmem:[%s2968_s0 + $0x300] sm:$0xff] }
  0xa3   :  { %552 = vmatmul.f32.gmra.mxu1 %v1437_v44  ;;  %596 = vmatmul.f32.gmra.mxu3 %v1438_v45  ;;  %v1464_v45 = vld [vmem:[%s2968_s0 + $0x2e0] sm:$0xff] }
  0xa6   :  { %v2257_v48 = vpop.f32.mrf.mxu3  ;;  %1446 = vmatmul.msk.f32.gmra.mxu2 %vm100_vm1, %v1424_v47 }
  0xa7   :  { %v2260_v49 = vpop.f32.mrf.mxu0  ;;  %v2262_v50 = vpop.f32.mrf.mxu1 }
  0xa9   :  { %v2273_v54 = vpop.f32.mrf.mxu2 }
  0xaa   :  { %1415 = vmatmul.msk.f32.gmra.mxu0 %vm100_vm1, %v1405_v51 }
  0xab   :  { %555 = vmatmul.f32.gmra.mxu1 %v1440_v52  ;;  %599 = vmatmul.f32.gmra.mxu3 %v1441_v53 }
  0xae   :  { %v2279_v56 = vpop.f32.mrf.mxu3  ;;  %1447 = vmatmul.msk.f32.gmra.mxu2 %vm100_vm1, %v1427_v55 }
  0xaf   :  { %v2282_v57 = vpop.f32.mrf.mxu0  ;;  %v2284_v58 = vpop.f32.mrf.mxu1 }
  0xb1   :  { %v2295_v62 = vpop.f32.mrf.mxu2 }
  0xb2   :  { %727 = vmatmul.f32.vlgmr.msra.gmra.mxu0 %v1453_v60  ;;  %v1471_v60 = vld [vmem:[%s2968_s0 + $0x318] sm:$0xff] }
  0xb3   :  { %771 = vmatmul.f32.vlgmr.msra.gmra.mxu1 %v1454_v59  ;;  %748 = vmatmul.f32.vlgmr.msra.gmra.mxu3 %v1474_v61  ;;  %v1472_v59 = vld [vmem:[%s2968_s0 + $0x320] sm:$0xff] }
  0xb6   :  { %v2300_v0 = vpop.f32.mrf.mxu3  ;;  %1448 = vmatmul.msk.f32.gmra.mxu2 %vm100_vm1, %v1430_v63 }
  0xb7   :  { %v2303_v1 = vpop.f32.mrf.mxu0  ;;  %v2305_v3 = vpop.f32.mrf.mxu1 }
  0xb9   :  { %v2316_v8 = vpop.f32.mrf.mxu2 }
  0xba   :  { %730 = vmatmul.f32.gmra.mxu0 %v1456_v6 }
  0xbb   :  { %774 = vmatmul.f32.gmra.mxu1 %v1457_v4  ;;  %751 = vmatmul.f32.gmra.mxu3 %v1477_v7  ;;  %v194_v7 = vadd.f32 %v2240_v42, %v2238_v41 }
  0xbe   :  { %v2321_v10 = vpop.f32.mrf.mxu3  ;;  %1449 = vmatmul.msk.f32.gmra.mxu2 %vm100_vm1, %v1433_v9 }
  0xbf   :  { %v2324_v11 = vpop.f32.mrf.mxu0  ;;  %v2326_v12 = vpop.f32.mrf.mxu1 }
  0xc1   :  { %v258_v16 = vpop.f32.mrf.mxu2 }
  0xc2   :  { %733 = vmatmul.f32.gmra.mxu0 %v1459_v14 }
  0xc3   :  { %777 = vmatmul.f32.gmra.mxu1 %v1460_v13  ;;  %1481 = vmatmul.msk.f32.vlgmr.msrb.gmra.mxu3 %vm100_vm1, %v1455_v15  ;;  %v1475_v15 = vld [vmem:[%s2968_s0 + $0x338] sm:$0xff] }
  0xc6   :  { %v2341_v18 = vpop.f32.mrf.mxu3  ;;  %1450 = vmatmul.msk.f32.gmra.mxu2 %vm100_vm1, %v1436_v17 }
  0xc7   :  { %v2344_v19 = vpop.f32.mrf.mxu0  ;;  %v2346_v20 = vpop.f32.mrf.mxu1 }
  0xc9   :  { %v261_v23 = vpop.f32.mrf.mxu2 }
  0xca   :  { %736 = vmatmul.f32.gmra.mxu0 %v1462_v22  ;;  %v197_v22 = vadd.f32 %v2262_v50, %v2260_v49 }
  0xcb   :  { %780 = vmatmul.f32.gmra.mxu1 %v1463_v21  ;;  %1482 = vmatmul.msk.f32.gmra.mxu3 %vm100_vm1, %v1458_v2 }
  0xce   :  { %v2361_v24 = vpop.f32.mrf.mxu3  ;;  %1451 = vmatmul.msk.f32.gmra.mxu2 %vm100_vm1, %v1439_v5 }
  0xcf   :  { %v167_v25 = vpop.f32.mrf.mxu0 }
  0xd0   :  { %v211_v26 = vpop.f32.mrf.mxu1 }
  0xd1   :  { %v2370_v30 = vadd.f32 %v211_v26, %v167_v25  ;;  %v380_v32 = vpop.f32.mrf.mxu2  ;;  %v1478_v25 = vld [vmem:[%s2968_s0 + $0x350] sm:$0xff]  ;;  %v2438_v26 = vadd.f32 %v2215_v34, %v197_v22 }
  0xd2   :  { %v381_v33 = vadd.f32 %v380_v32, %v2257_v48  ;;  %739 = vmatmul.f32.gmra.mxu0 %v1465_v28 }
  0xd3   :  { %783 = vmatmul.f32.gmra.mxu1 %v1466_v27  ;;  %1483 = vmatmul.msk.f32.gmra.mxu3 %vm100_vm1, %v1461_v31  ;;  %v200_v31 = vadd.f32 %v2284_v58, %v2282_v57 }
  0xd6   :  { %v2380_v36 = vpop.f32.mrf.mxu3  ;;  %1452 = vmatmul.msk.f32.gmra.mxu2 %vm100_vm1, %v1442_v35 }
  0xd7   :  { %v170_v37 = vpop.f32.mrf.mxu0 }
  0xd8   :  { %v214_v38 = vpop.f32.mrf.mxu1 }
  0xd9   :  { %v215_v44 = vadd.f32 %v214_v38, %v170_v37  ;;  %v383_v47 = vpop.f32.mrf.mxu2  ;;  %v2452_v37 = vadd.f32 %v2231_v39, %v200_v31  ;;  %v1479_v39 = vld [vmem:[%s2968_s0 + $0x358] sm:$0xff] }
  0xda   :  { %v384_v51 = vadd.f32 %v383_v47, %v2279_v56  ;;  %742 = vmatmul.f32.gmra.mxu0 %v1468_v43  ;;  %v1467_v56 = vld [vmem:[%s2968_s0 + $0x2f8] sm:$0xff] }
  0xdb   :  { %v2392_v48 = vadd.f32 %v258_v16, %v215_v44  ;;  %786 = vmatmul.f32.gmra.mxu1 %v1469_v40  ;;  %1484 = vmatmul.msk.f32.gmra.mxu3 %vm100_vm1, %v1464_v45  ;;  %v2419_v16 = vadd.f32 %v2200_v29, %v194_v7  ;;  %v1476_v40 = vld [vmem:[%s2968_s0 + $0x340] sm:$0xff] }
  0xde   :  { %v2396_v52 = vpop.f32.mrf.mxu3 }
  0xdf   :  { %v173_v53 = vpop.f32.mrf.mxu0 }
  0xe0   :  { %v217_v55 = vpop.f32.mrf.mxu1 }
  0xe1   :  { %v218_v61 = vadd.f32 %v217_v55, %v173_v53  ;;  %v386_v63 = vpop.f32.mrf.mxu2  ;;  %v206_v53 = vadd.f32 %v2326_v12, %v2324_v11 }
  0xe2   :  { %v387_v6 = vadd.f32 %v386_v63, %v2300_v0  ;;  %745 = vmatmul.f32.gmra.mxu0 %v1471_v60  ;;  %v1470_v0 = vld [vmem:[%s2968_s0 + $0x310] sm:$0xff] }
  0xe3   :  { %v2407_v4 = vadd.f32 %v261_v23, %v218_v61  ;;  %789 = vmatmul.f32.gmra.mxu1 %v1472_v59  ;;  %1485 = vmatmul.msk.f32.gmra.mxu3 %vm100_vm1, %v1467_v56  ;;  %v2473_v56 = vadd.f32 %v2273_v54, %v206_v53 }
  0xe6   :  { %v2413_v9 = vpop.f32.mrf.mxu3 }
  0xe7   :  { %v424_v13 = vpop.f32.mrf.mxu0 }
  0xe8   :  { %v532_v14 = vpop.f32.mrf.mxu1  ;;  %v2421_v17 = vadd.f32 %v424_v13, %v381_v33 }
  0xe9   :  { %v389_v21 = vpop.f32.mrf.mxu2 }
  0xea   :  { %v451_v41 = vmax.f32 %v2419_v16, %v2421_v17  ;;  %v390_v42 = vadd.f32 %v389_v21, %v2321_v10  ;;  %v1473_v10 = vld [vmem:[%s2968_s0 + $0x328] sm:$0xff]  ;;  %v1496_v16 = vld [vmem:[%s2971_s3 + $0x70] sm:$0xff]  ;;  %s1358_s0 = sshll.u32 %s1623_s23, 4  ;;  %s1359_s0 = int_to_ptr.vmem [resolvable:$true] %s1358_s0 }
  0xeb   :  { %792 = vmatmul.f32.gmra.mxu1 %v1475_v15  ;;  %1486 = vmatmul.msk.f32.gmra.mxu3 %vm100_vm1, %v1470_v0 }
  0xee   :  { %v576_v29 = vpop.f32.mrf.mxu3 }
  0xef   :  { %v2432_v2 = vadd.f32 %v576_v29, %v532_v14  ;;  %v427_v23 = vpop.f32.mrf.mxu0  ;;  %v209_v14 = vadd.f32 %v2346_v20, %v2344_v19 }
  0xf0   :  { %v535_v5 = vpop.f32.mrf.mxu1  ;;  %v2440_v27 = vadd.f32 %v427_v23, %v384_v51 }
  0xf1   :  { %v392_v28 = vpop.f32.mrf.mxu2  ;;  %v2486_v54 = vadd.f32 %v2295_v62, %v209_v14  ;;  %v1497_v62 = vld [vmem:[%s2971_s3 + $0x78] sm:$0xf] }
  0xf2   :  { %v452_v49 = vmax.f32 %v2438_v26, %v2440_v27  ;;  %v393_v50 = vadd.f32 %v392_v28, %v2341_v18  ;;  %1498 = vmatpush.msk.msrb.mxu2 %vm906_vm2, %v1497_v62  ;;  %v203_v26 = vadd.f32 %v2305_v3, %v2303_v1  ;;  %v1529_v1 = vld [vmem:[%s2971_s3 + $0x138] sm:$0xf]  ;;  %v1507_v62 = vld [vmem:[%s2971_s3 + $0xa8] sm:$0xff] }
  0xf3   :  { %795 = vmatmul.f32.gmra.mxu1 %v1478_v25  ;;  %1487 = vmatmul.msk.f32.gmra.mxu3 %vm100_vm1, %v1473_v10  ;;  %v2501_v25 = vadd.f32 %v2316_v8, %v2370_v30  ;;  %v1519_v3 = vld [vmem:[%s2971_s3 + $0xf8] sm:$0xf] }
  0xf4   :  { %919 = vmatpush.msrb.mxu2 %v1496_v16  ;;  %1530 = vmatpush.msk.msra.mxu3 %vm906_vm2, %v1529_v1  ;;  %v887_v16 = vld [vmem:[%s2971_s3 + $0x10] sm:$0xff] }
  0xf5   :  { %1520 = vmatpush.msk.msrb.mxu1 %vm906_vm2, %v1519_v3  ;;  %v1515_v3 = vld [vmem:[%s2971_s3 + $0xd8] sm:$0xff] }
  0xf6   :  { %v579_v34 = vpop.f32.mrf.mxu3 }
  0xf7   :  { %v580_v32 = vadd.f32 %v579_v34, %v535_v5  ;;  %v430_v33 = vpop.f32.mrf.mxu0 }
  0xf8   :  { %v538_v35 = vpop.f32.mrf.mxu1  ;;  %v2454_v38 = vadd.f32 %v430_v33, %v387_v6 }
  0xf9   :  { %v395_v18 = vpop.f32.mrf.mxu2 }
  0xfa   :  { %v453_v43 = vmax.f32 %v2452_v37, %v2454_v38  ;;  %v396_v11 = vadd.f32 %v395_v18, %v2361_v24  ;;  %v247_v37 = vadd.f32 %v2251_v46, %v203_v26  ;;  %v1493_v38 = vld [vmem:[%s2971_s3 + $0x58] sm:$0xff] }
  0xfb   :  { %1488 = vmatmul.msk.f32.gmra.mxu3 %vm100_vm1, %v1476_v40 }
  0xfe   :  { %v582_v57 = vpop.f32.mrf.mxu3 }
  0xff   :  { %v583_v58 = vadd.f32 %v582_v57, %v538_v35  ;;  %v433_v44 = vpop.f32.mrf.mxu0 }
 0x100   :  { %v541_v45 = vpop.f32.mrf.mxu1  ;;  %v2462_v47 = vadd.f32 %v433_v44, %v390_v42 }
 0x101   :  { %v398_v51 = vpop.f32.mrf.mxu2 }
 0x102   :  { %v399_v19 = vadd.f32 %v398_v51, %v2380_v36 }
 0x103   :  { %1489 = vmatmul.msk.f32.gmra.mxu3 %vm100_vm1, %v1479_v39 }
 0x106   :  { %v585_v55 = vpop.f32.mrf.mxu3 }
 0x107   :  { %v2470_v59 = vadd.f32 %v585_v55, %v541_v45  ;;  %v436_v60 = vpop.f32.mrf.mxu0  ;;  %v1494_v55 = vld [vmem:[%s2971_s3 + $0x60] sm:$0xff] }
 0x108   :  { %v544_v61 = vpop.f32.mrf.mxu1  ;;  %v2475_v63 = vadd.f32 %v436_v60, %v393_v50 }
 0x109   :  { %v401_v6 = vpop.f32.mrf.mxu2 }
 0x10a   :  { %v455_v7 = vmax.f32 %v2473_v56, %v2475_v63  ;;  %v402_v13 = vadd.f32 %v401_v6, %v2396_v52  ;;  %v1517_v56 = vld [vmem:[%s2971_s3 + $0xe8] sm:$0xff]  ;;  %v888_v63 = vld [vmem:[%s2971_s3 + $0x18] sm:$0xff] }
 0x10e   :  { %v588_v12 = vpop.f32.mrf.mxu3 }
 0x10f   :  { %v2483_v15 = vadd.f32 %v588_v12, %v544_v61  ;;  %v439_v0 = vpop.f32.mrf.mxu0 }
 0x110   :  { %v547_v21 = vpop.f32.mrf.mxu1  ;;  %v2488_v42 = vadd.f32 %v439_v0, %v396_v11  ;;  %v1491_v11 = vld [vmem:[%s2971_s3 + $0x48] sm:$0xff]  ;;  %v1518_v0 = vld [vmem:[%s2971_s3 + $0xf0] sm:$0xff] }
 0x111   :  { %v404_v22 = vpop.f32.mrf.mxu2  ;;  %1018 = vmatpush.msrb.mxu1 %v1518_v0  ;;  %v1525_v0 = vld [vmem:[%s2971_s3 + $0x118] sm:$0xff] }
 0x112   :  { %v456_v29 = vmax.f32 %v2486_v54, %v2488_v42  ;;  %v405_v52 = vadd.f32 %v404_v22, %v2413_v9  ;;  %v1509_v22 = vld [vmem:[%s2971_s3 + $0xb8] sm:$0xf]  ;;  %v2658_v42 = vld [vmem:[%s2970_s2] ss:$0 sm:$0xff] }
 0x113   :  { %1510 = vmatpush.msk.msrb.mxu0 %vm906_vm2, %v1509_v22  ;;  %1019 = vmatpush.msrb.mxu1 %v1517_v56 }
 0x116   :  { %v591_v20 = vpop.f32.mrf.mxu3 }
 0x117   :  { %v2494_v24 = vadd.f32 %v591_v20, %v547_v21  ;;  %v442_v23 = vpop.f32.mrf.mxu0  ;;  %v892_v21 = vld [vmem:[%s2971_s3 + $0x38] sm:$0xf]  ;;  %v1508_v20 = vld [vmem:[%s2971_s3 + $0xb0] sm:$0xff] }
 0x118   :  { %v550_v5 = vpop.f32.mrf.mxu1  ;;  %v2503_v10 = vadd.f32 %v442_v23, %v399_v19  ;;  %v891_v19 = vld [vmem:[%s2971_s3 + $0x30] sm:$0xff]  ;;  %981 = vmatpush.msrb.mxu0 %v1508_v20 }
 0x119   :  { %v620_v9 = vpop.f32.mrf.mxu2 }
 0x11a   :  { %v457_v36 = vmax.f32 %v2501_v25, %v2503_v10  ;;  %v621_v28 = vadd.f32 %v620_v9, %v2432_v2  ;;  %982 = vmatpush.msrb.mxu0 %v1507_v62 }
 0x11c   :  { %v2512_v50 = vmax.f32 %v451_v41, %v621_v28 }
 0x11e   :  { %v594_v31 = vpop.f32.mrf.mxu3 }
 0x11f   :  { %v2514_v34 = vadd.f32 %v594_v31, %v550_v5  ;;  %v445_v8 = vpop.f32.mrf.mxu0  ;;  %v890_v5 = vld [vmem:[%s2971_s3 + $0x28] sm:$0xff]  ;;  %v1506_v31 = vld [vmem:[%s2971_s3 + $0xa0] sm:$0xff] }
 0x120   :  { %v553_v30 = vpop.f32.mrf.mxu1  ;;  %v2516_v33 = vadd.f32 %v445_v8, %v402_v13  ;;  %v1492_v13 = vld [vmem:[%s2971_s3 + $0x50] sm:$0xff]  ;;  %983 = vmatpush.msrb.mxu0 %v1506_v31 }
 0x121   :  { %v623_v35 = vpop.f32.mrf.mxu2 }
 0x122   :  { %v458_v40 = vmax.f32 %v2392_v48, %v2516_v33  ;;  %v624_v18 = vadd.f32 %v623_v35, %v580_v32  ;;  %v1527_v35 = vld [vmem:[%s2971_s3 + $0x128] sm:$0xff] }
 0x124   :  { %v2523_v2 = vmax.f32 %v452_v49, %v624_v18  ;;  %v1495_v49 = vld [vmem:[%s2971_s3 + $0x68] sm:$0xff] }
 0x125   :  { %920 = vmatpush.msrb.mxu2 %v1495_v49  ;;  %v1502_v49 = vld [vmem:[%s2971_s3 + $0x80] sm:$0xff] }
 0x126   :  { %v597_v17 = vpop.f32.mrf.mxu3 }
 0x127   :  { %v2528_v41 = vadd.f32 %v597_v17, %v553_v30  ;;  %v448_v57 = vpop.f32.mrf.mxu0  ;;  %921 = vmatpush.msrb.mxu2 %v1494_v55  ;;  %v1504_v17 = vld [vmem:[%s2971_s3 + $0x90] sm:$0xff] }
 0x128   :  { %v2530_v44 = vadd.f32 %v448_v57, %v405_v52  ;;  %v556_v45 = vpop.f32.mrf.mxu1 }
 0x129   :  { %v626_v39 = vpop.f32.mrf.mxu2  ;;  %922 = vmatpush.msrb.mxu2 %v1493_v38 }
 0x12a   :  { %v459_v32 = vmax.f32 %v2407_v4, %v2530_v44  ;;  %v627_v51 = vadd.f32 %v626_v39, %v583_v58  ;;  %v454_v58 = vmax.f32 %v247_v37, %v2462_v47  ;;  %v1490_v47 = vld [vmem:[%s2971_s3 + $0x40] sm:$0xff]  ;;  %v886_v39 = vld [vmem:[%s2971_s3 + $0x8] sm:$0xff]  ;;  %v1538_v4 = vld [vmem:[%s2971_s3 + $0x170] sm:$0xff] }
 0x12b   :  { %923 = vmatpush.msrb.mxu2 %v1492_v13  ;;  %v1545_v44 = vld [vmem:[%s2971_s3 + $0x198] sm:$0xff] }
 0x12c   :  { %v2539_v27 = vmax.f32 %v453_v43, %v627_v51  ;;  %v1503_v51 = vld [vmem:[%s2971_s3 + $0x88] sm:$0xff] }
 0x12d   :  { %924 = vmatpush.msrb.mxu2 %v1491_v11 }
 0x12e   :  { %v600_v53 = vpop.f32.mrf.mxu3 }
 0x12f   :  { %v2547_v60 = vadd.f32 %v600_v53, %v556_v45  ;;  %v728_v14 = vpop.f32.mrf.mxu0  ;;  %925 = vmatpush.msrb.mxu2 %v1490_v47  ;;  %v1516_v53 = vld [vmem:[%s2971_s3 + $0xe0] sm:$0xff] }
 0x130   :  { %v772_v61 = vpop.f32.mrf.mxu1  ;;  %1020 = vmatpush.msrb.mxu1 %v1516_v53 }
 0x131   :  { %v629_v43 = vpop.f32.mrf.mxu2  ;;  %1500 = vmatpush.msk.msra.mxu2 %vm906_vm2, %v892_v21  ;;  %v773_v45 = vadd.f32 %v772_v61, %v728_v14  ;;  %v1513_v14 = vld [vmem:[%s2971_s3 + $0xc8] sm:$0xff] }
 0x132   :  { %v630_v6 = vadd.f32 %v629_v43, %v2470_v59  ;;  %v1528_v59 = vld [vmem:[%s2971_s3 + $0x130] sm:$0xff]  ;;  %1021 = vmatpush.msrb.mxu1 %v1515_v3 }
 0x133   :  { %1055 = vmatpush.msra.mxu3 %v1528_v59  ;;  %945 = vmatpush.msra.mxu2 %v891_v19 }
 0x134   :  { %v2566_v46 = vmax.f32 %v454_v58, %v630_v6  ;;  %v1514_v58 = vld [vmem:[%s2971_s3 + $0xd0] sm:$0xff] }
 0x135   :  { %946 = vmatpush.msra.mxu2 %v890_v5  ;;  %1056 = vmatpush.msra.mxu3 %v1527_v35 }
 0x136   :  { %v2571_v12 = vpop.f32.mrf.mxu3  ;;  %1022 = vmatpush.msrb.mxu1 %v1514_v58 }
 0x137   :  { %v731_v30 = vpop.f32.mrf.mxu0 }
 0x138   :  { %v775_v9 = vpop.f32.mrf.mxu1  ;;  %1023 = vmatpush.msrb.mxu1 %v1513_v14 }
 0x139   :  { %v632_v52 = vpop.f32.mrf.mxu2  ;;  %v776_v13 = vadd.f32 %v775_v9, %v731_v30 }
 0x13a   :  { %v633_v23 = vadd.f32 %v632_v52, %v2483_v15  ;;  %v889_v15 = vld [vmem:[%s2971_s3 + $0x20] sm:$0xff] }
 0x13b   :  { %947 = vmatpush.msra.mxu2 %v889_v15  ;;  %v1549_v15 = vld [vmem:[%s2971_s3 + $0x1b8] sm:$0xf] }
 0x13c   :  { %v2606_v28 = vmax.f32 %v455_v7, %v633_v23  ;;  %v1505_v7 = vld [vmem:[%s2971_s3 + $0x98] sm:$0xff]  ;;  %v1523_v23 = vld [vmem:[%s2971_s3 + $0x108] sm:$0xff] }
 0x13d   :  { %948 = vmatpush.msra.mxu2 %v888_v63  ;;  %984 = vmatpush.msrb.mxu0 %v1505_v7  ;;  %v1547_v63 = vld [vmem:[%s2971_s3 + $0x1a8] sm:$0xff] }
 0x13e   :  { %v2614_v8 = vpop.f32.mrf.mxu3 }
 0x13f   :  { %949 = vmatpush.msra.mxu2 %v887_v16  ;;  %985 = vmatpush.msrb.mxu0 %v1504_v17  ;;  %v734_v37 = vpop.f32.mrf.mxu0  ;;  %v1546_v16 = vld [vmem:[%s2971_s3 + $0x1a0] sm:$0xff] }
 0x140   :  { %v778_v55 = vpop.f32.mrf.mxu1 }
 0x141   :  { %v635_v18 = vpop.f32.mrf.mxu2  ;;  %950 = vmatpush.msra.mxu2 %v886_v39  ;;  %986 = vmatpush.msrb.mxu0 %v1503_v51  ;;  %v779_v20 = vadd.f32 %v778_v55, %v734_v37  ;;  %v1537_v51 = vld [vmem:[%s2971_s3 + $0x168] sm:$0xff]  ;;  %v1535_v37 = vld [vmem:[%s2971_s3 + $0x158] sm:$0xff] }
 0x142   :  { %v636_v57 = vadd.f32 %v635_v18, %v2494_v24  ;;  %v885_v24 = vld [vmem:[%s2971_s3] sm:$0xff] }
 0x143   :  { %951 = vmatpush.msra.mxu2 %v885_v24  ;;  %987 = vmatpush.msrb.mxu0 %v1502_v49  ;;  %v1544_v24 = vld [vmem:[%s2971_s3 + $0x190] sm:$0xff] }
 0x144   :  { %v2644_v26 = vmax.f32 %v456_v29, %v636_v57  ;;  %v1526_v29 = vld [vmem:[%s2971_s3 + $0x120] sm:$0xff]  ;;  %v1558_v49 = vld [vmem:[%s2971_s3 + $0x1f0] sm:$0xff] }
 0x145   :  { %1057 = vmatpush.msra.mxu3 %v1526_v29  ;;  %1550 = vmatpush.msk.msra.mxu0 %vm906_vm2, %v1549_v15  ;;  %v1565_v15 = vld [vmem:[%s2971_s3 + $0x218] sm:$0xff] }
 0x146   :  { %v816_v1 = vpop.f32.mrf.mxu3 }
 0x147   :  { %v817_v54 = vadd.f32 %v816_v1, %v773_v45  ;;  %1058 = vmatpush.msra.mxu3 %v1525_v0  ;;  %v737_v52 = vpop.f32.mrf.mxu0  ;;  %v1543_v1 = vld [vmem:[%s2971_s3 + $0x188] sm:$0xff] }
 0x148   :  { %v781_v21 = vpop.f32.mrf.mxu1  ;;  %v1533_v0 = vld [vmem:[%s2971_s3 + $0x148] sm:$0xff] }
 0x149   :  { %v843_v38 = vmax.f32 %v2512_v50, %v817_v54  ;;  %v638_v43 = vpop.f32.mrf.mxu2  ;;  %v782_v56 = vadd.f32 %v781_v21, %v737_v52  ;;  %v1557_v54 = vld [vmem:[%s2971_s3 + $0x1e8] sm:$0xff]  ;;  %v1554_v21 = vld [vmem:[%s2971_s3 + $0x1d0] sm:$0xff] }
 0x14a   :  { %v639_v61 = vadd.f32 %v638_v43, %v2514_v34  ;;  %v1512_v34 = vld [vmem:[%s2971_s3 + $0xc0] sm:$0xff]  ;;  %v1567_v52 = vld [vmem:[%s2971_s3 + $0x228] sm:$0xff] }
 0x14b   :  { %v856_v6 = vadd.f32 %v2658_v42, %v843_v38  ;;  %1024 = vmatpush.msrb.mxu1 %v1512_v34  ;;  %v1542_v38 = vld [vmem:[%s2971_s3 + $0x180] sm:$0xff]  ;;  %v1555_v34 = vld [vmem:[%s2971_s3 + $0x1d8] sm:$0xff] }
 0x14c   :  { %v2678_v50 = vmax.f32 %v457_v36, %v639_v61  ;;  %v1524_v36 = vld [vmem:[%s2971_s3 + $0x110] sm:$0xff]  ;;  %v1556_v43 = vld [vmem:[%s2971_s3 + $0x1e0] sm:$0xff] }
 0x14d   :  { %v865_v11 = vmax.f32 %v856_v6, 0.0  ;;  %1059 = vmatpush.msra.mxu3 %v1524_v36 }
 0x14e   :  { %v819_v47 = vpop.f32.mrf.mxu3 }
 0x14f   :  { %875 = vst.msk [vmem:[#allocation2] sm:$0xff] %vm874_vm3, %v865_v11  ;;  %v820_v59 = vadd.f32 %v819_v47, %v776_v13  ;;  %1060 = vmatpush.msra.mxu3 %v1523_v23  ;;  %v740_v7 = vpop.f32.mrf.mxu0  ;;  %v1534_v11 = vld [vmem:[%s2971_s3 + $0x150] sm:$0xff]  ;;  %v1569_v47 = vld [vmem:[%s2971_s3 + $0x238] sm:$0xf]  ;;  %v1566_v23 = vld [vmem:[%s2971_s3 + $0x220] sm:$0xff] }
 0x150   :  { %v784_v31 = vpop.f32.mrf.mxu1 }
 0x151   :  { %v844_v25 = vmax.f32 %v2523_v2, %v820_v59  ;;  %v641_v10 = vpop.f32.mrf.mxu2  ;;  %v785_v55 = vadd.f32 %v784_v31, %v740_v7  ;;  %v1563_v31 = vld [vmem:[%s2971_s3 + $0x208] sm:$0xff] }
 0x152   :  { %v642_v22 = vadd.f32 %v641_v10, %v2528_v41  ;;  %v1522_v41 = vld [vmem:[%s2971_s3 + $0x100] sm:$0xff] }
 0x153   :  { %v857_v19 = vadd.f32 %v2658_v42, %v844_v25  ;;  %1061 = vmatpush.msra.mxu3 %v1522_v41  ;;  %v1568_v25 = vld [vmem:[%s2971_s3 + $0x230] sm:$0xff] }
 0x154   :  { %v2699_v2 = vmax.f32 %v458_v40, %v642_v22  ;;  %v1548_v40 = vld [vmem:[%s2971_s3 + $0x1b0] sm:$0xff]  ;;  %v1553_v22 = vld [vmem:[%s2971_s3 + $0x1c8] sm:$0xff] }
 0x155   :  { %v866_v5 = vmax.f32 %v857_v19, 0.0  ;;  %1129 = vmatpush.msra.mxu0 %v1548_v40  ;;  %1570 = vmatpush.msk.msrb.mxu3 %vm906_vm2, %v1569_v47 }
 0x156   :  { %v822_v62 = vpop.f32.mrf.mxu3  ;;  %v884_v61 = vld [vmem:[#allocation2] sm:$0xff] }
 0x157   :  { %876 = vst.msk [vmem:[#allocation2 + $0x8] sm:$0xff] %vm874_vm3, %v866_v5  ;;  %v823_v9 = vadd.f32 %v822_v62, %v779_v20  ;;  %1130 = vmatpush.msra.mxu0 %v1547_v63  ;;  %v743_v13 = vpop.f32.mrf.mxu0  ;;  %1203 = vmatpush.msrb.mxu3 %v1568_v25  ;;  %v1552_v20 = vld [vmem:[%s2971_s3 + $0x1c0] sm:$0xff] }
 0x158   :  { %v787_v29 = vpop.f32.mrf.mxu1  ;;  %v1562_v63 = vld [vmem:[%s2971_s3 + $0x200] sm:$0xff] }
 0x159   :  { %v845_v48 = vmax.f32 %v2539_v27, %v823_v9  ;;  %v644_v33 = vpop.f32.mrf.mxu2  ;;  %1131 = vmatpush.msra.mxu0 %v1546_v16  ;;  %v788_v36 = vadd.f32 %v787_v29, %v743_v13  ;;  %1204 = vmatpush.msrb.mxu3 %v1567_v52  ;;  %v1233_v13 = vld [vmem:[%s2973_s5 + $0x18] sm:$0xff] }
 0x15a   :  { %v645_v30 = vadd.f32 %v644_v33, %v2547_v60  ;;  %v1539_v60 = vld [vmem:[%s2971_s3 + $0x178] sm:$0xf]  ;;  %v1564_v33 = vld [vmem:[%s2971_s3 + $0x210] sm:$0xff] }
 0x15b   :  { %v858_v35 = vadd.f32 %v2658_v42, %v845_v48  ;;  %1132 = vmatpush.msra.mxu0 %v1545_v44  ;;  %1205 = vmatpush.msrb.mxu3 %v1566_v23  ;;  %v1286_v23 = vld [vmem:[%s2975_s7 + $0x60] sm:$0xff] }
 0x15c   :  { %v2721_v27 = vmax.f32 %v459_v32, %v645_v30  ;;  %v1559_v32 = vld [vmem:[%s2971_s3 + $0x1f8] sm:$0xf] }
 0x15d   :  { %v867_v18 = vmax.f32 %v858_v35, 0.0  ;;  %1560 = vmatpush.msk.msra.mxu1 %vm906_vm2, %v1559_v32  ;;  %1133 = vmatpush.msra.mxu0 %v1544_v24 }
 0x15e   :  { %v825_v17 = vpop.f32.mrf.mxu3  ;;  %v893_v57 = vld [vmem:[#allocation2 + $0x8] sm:$0xff]  ;;  %1206 = vmatpush.msrb.mxu3 %v1565_v15  ;;  %v1284_v15 = vld [vmem:[%s2975_s7 + $0x50] sm:$0xff] }
 0x15f   :  { %877 = vst.msk [vmem:[#allocation2 + $0x10] sm:$0xff] %vm874_vm3, %v867_v18  ;;  %v826_v45 = vadd.f32 %v825_v17, %v782_v56  ;;  %1499 = vmatmul.msk.f32.vlgmr.msrb.gmra.mxu2 %vm874_vm3, %v893_v57  ;;  %1166 = vmatpush.msra.mxu1 %v1558_v49  ;;  %v746_v48 = vpop.f32.mrf.mxu0 }
 0x160   :  { %1540 = vmatpush.msk.msrb.mxu2 %vm906_vm2, %v1539_v60  ;;  %1134 = vmatpush.msra.mxu0 %v1543_v1  ;;  %v790_v5 = vpop.f32.mrf.mxu1 }
 0x161   :  { %v846_v39 = vmax.f32 %v2566_v46, %v826_v45  ;;  %v1536_v46 = vld [vmem:[%s2971_s3 + $0x160] sm:$0xff]  ;;  %1167 = vmatpush.msra.mxu1 %v1557_v54  ;;  %v791_v35 = vadd.f32 %v790_v5, %v746_v48  ;;  %1207 = vmatpush.msrb.mxu3 %v1564_v33 }
 0x162   :  { %1092 = vmatpush.msrb.mxu2 %v1538_v4  ;;  %1135 = vmatpush.msra.mxu0 %v1542_v38  ;;  %v1237_v38 = vld [vmem:[%s2973_s5 + $0x38] sm:$0xff]  ;;  %v1593_v33 = vld [vmem:[%s2972_s4] ss:$0 sm:$0xff] }
 0x163   :  { %v859_v53 = vadd.f32 %v2658_v42, %v846_v39  ;;  %1168 = vmatpush.msra.mxu1 %v1556_v43  ;;  %1208 = vmatpush.msrb.mxu3 %v1563_v31  ;;  %v1236_v43 = vld [vmem:[%s2973_s5 + $0x30] sm:$0xff] }
 0x164   :  { %1093 = vmatpush.msrb.mxu2 %v1537_v51 }
 0x165   :  { %v868_v3 = vmax.f32 %v859_v53, 0.0  ;;  %1169 = vmatpush.msra.mxu1 %v1555_v34  ;;  %1209 = vmatpush.msrb.mxu3 %v1562_v63  ;;  %v1231_v34 = vld [vmem:[%s2973_s5 + $0x8] sm:$0xff]  ;;  %v1281_v63 = vld [vmem:[%s2975_s7 + $0x38] sm:$0xff] }
 0x166   :  { %v828_v58 = vpop.f32.mrf.mxu3  ;;  %v956_v6 = vld [vmem:[#allocation2 + $0x10] sm:$0xff]  ;;  %1094 = vmatpush.msrb.mxu2 %v1536_v46 }
 0x167   :  { %878 = vst.msk [vmem:[#allocation2 + $0x18] sm:$0xff] %vm874_vm3, %v868_v3  ;;  %v829_v14 = vadd.f32 %v828_v58, %v785_v55  ;;  %1501 = vmatmul.msk.f32.vlgmr.msra.gmra.mxu2 %vm874_vm3, %v884_v61  ;;  %1511 = vmatmul.msk.f32.vlgmr.msrb.gmra.mxu0 %vm874_vm3, %v956_v6  ;;  %v1239_v3 = vld [vmem:[%s2973_s5 + $0x48] sm:$0xff]  ;;  %v1234_v61 = vld [vmem:[%s2973_s5 + $0x20] sm:$0xff] }
 0x168   :  { %1095 = vmatpush.msrb.mxu2 %v1535_v37  ;;  %1170 = vmatpush.msra.mxu1 %v1554_v21  ;;  %v793_v60 = vpop.f32.mrf.mxu1  ;;  %v1238_v37 = vld [vmem:[%s2973_s5 + $0x40] sm:$0xff]  ;;  %v1235_v58 = vld [vmem:[%s2973_s5 + $0x28] sm:$0xff] }
 0x169   :  { %v847_v59 = vmax.f32 %v2606_v28, %v829_v14  ;;  %v1532_v28 = vld [vmem:[%s2971_s3 + $0x140] sm:$0xff]  ;;  %v794_v57 = vadd.f32 %v793_v60, %v2571_v12 }
 0x16a   :  { %1096 = vmatpush.msrb.mxu2 %v1534_v11  ;;  %1171 = vmatpush.msra.mxu1 %v1553_v22  ;;  %v1232_v11 = vld [vmem:[%s2973_s5 + $0x10] sm:$0xff]  ;;  %v1278_v60 = vld [vmem:[%s2975_s7 + $0x20] sm:$0xff] }
 0x16b   :  { %v860_v10 = vadd.f32 %v2658_v42, %v847_v59 }
 0x16c   :  { %1097 = vmatpush.msrb.mxu2 %v1533_v0  ;;  %1172 = vmatpush.msra.mxu1 %v1552_v20  ;;  %v1230_v0 = vld [vmem:[%s2973_s5] sm:$0xff] }
 0x16d   :  { %v869_v19 = vmax.f32 %v860_v10, 0.0 }
 0x16e   :  { %v831_v41 = vpop.f32.mrf.mxu3  ;;  %v993_v62 = vld [vmem:[#allocation2 + $0x18] sm:$0xff]  ;;  %1098 = vmatpush.msrb.mxu2 %v1532_v28  ;;  %v1288_v28 = vld [vmem:[%s2975_s7 + $0x70] sm:$0xff] }
 0x16f   :  { %879 = vst.msk [vmem:[#allocation2 + $0x20] sm:$0xff] %vm874_vm3, %v869_v19  ;;  %v832_v9 = vadd.f32 %v831_v41, %v788_v36  ;;  %1521 = vmatmul.msk.f32.vlgmr.msrb.gmra.mxu1 %vm874_vm3, %v993_v62  ;;  %v1289_v36 = vld [vmem:[%s2975_s7 + $0x78] sm:$0xff]  ;;  %v1287_v19 = vld [vmem:[%s2975_s7 + $0x68] sm:$0xff] }
 0x170   :  { %v796_v51 = vpop.f32.mrf.mxu1  ;;  %1294 = vmatpush.msrb.mxu0 %v1289_v36  ;;  %v1285_v41 = vld [vmem:[%s2975_s7 + $0x58] sm:$0xff] }
 0x171   :  { %v848_v40 = vmax.f32 %v2644_v26, %v832_v9  ;;  %v797_v49 = vadd.f32 %v796_v51, %v2614_v8  ;;  %v1241_v8 = vld [vmem:[%s2973_s5 + $0x58] sm:$0x3]  ;;  %v1276_v51 = vld [vmem:[%s2975_s7 + $0x10] sm:$0xff] }
 0x172   :  { %1572 = vmatpush.msk.msra.mxu2 %vm1249_vm4, %v1241_v8  ;;  %1295 = vmatpush.msrb.mxu0 %v1288_v28  ;;  %v1317_v8 = vld [vmem:[%s2977_s9 + $0x10] sm:$0xff] }
 0x173   :  { %v861_v30 = vadd.f32 %v2658_v42, %v848_v40  ;;  %v1283_v40 = vld [vmem:[%s2975_s7 + $0x48] sm:$0xff] }
 0x174   :  { %1296 = vmatpush.msrb.mxu0 %v1287_v19 }
 0x175   :  { %v870_v56 = vmax.f32 %v861_v30, 0.0 }
 0x176   :  { %v834_v7 = vpop.f32.mrf.mxu3  ;;  %v1030_v18 = vld [vmem:[#allocation2 + $0x20] sm:$0xff]  ;;  %1297 = vmatpush.msrb.mxu0 %v1286_v23 }
 0x177   :  { %880 = vst.msk [vmem:[#allocation2 + $0x28] sm:$0xff] %vm874_vm3, %v870_v56  ;;  %v835_v26 = vadd.f32 %v834_v7, %v791_v35  ;;  %1531 = vmatmul.msk.f32.vlgmr.msra.gmra.mxu3 %vm874_vm3, %v1030_v18  ;;  %v1282_v35 = vld [vmem:[%s2975_s7 + $0x40] sm:$0xff]  ;;  %v1280_v18 = vld [vmem:[%s2975_s7 + $0x30] sm:$0xff] }
 0x178   :  { %1298 = vmatpush.msrb.mxu0 %v1285_v41 }
 0x179   :  { %v849_v16 = vmax.f32 %v2678_v50, %v835_v26  ;;  %v1279_v26 = vld [vmem:[%s2975_s7 + $0x28] sm:$0xff] }
 0x17a   :  { %1299 = vmatpush.msrb.mxu0 %v1284_v15 }
 0x17b   :  { %v862_v17 = vadd.f32 %v2658_v42, %v849_v16  ;;  %v1277_v16 = vld [vmem:[%s2975_s7 + $0x18] sm:$0xff] }
 0x17c   :  { %1300 = vmatpush.msrb.mxu0 %v1283_v40 }
 0x17d   :  { %v871_v45 = vmax.f32 %v862_v17, 0.0 }
 0x17e   :  { %v837_v4 = vpop.f32.mrf.mxu3  ;;  %v1067_v44 = vld [vmem:[#allocation2 + $0x28] sm:$0xff]  ;;  %1301 = vmatpush.msrb.mxu0 %v1282_v35 }
 0x17f   :  { %881 = vst.msk [vmem:[#allocation2 + $0x30] sm:$0xff] %vm874_vm3, %v871_v45  ;;  %v838_v32 = vadd.f32 %v837_v4, %v794_v57  ;;  %1541 = vmatmul.msk.f32.vlgmr.msrb.gmra.mxu2 %vm874_vm3, %v1067_v44 }
 0x180   :  { %1302 = vmatpush.msrb.mxu0 %v1281_v63 }
 0x181   :  { %v850_v39 = vmax.f32 %v2699_v2, %v838_v32 }
 0x182   :  { %1303 = vmatpush.msrb.mxu0 %v1280_v18 }
 0x183   :  { %v863_v24 = vadd.f32 %v2658_v42, %v850_v39 }
 0x184   :  { %1304 = vmatpush.msrb.mxu0 %v1279_v26 }
 0x185   :  { %v872_v50 = vmax.f32 %v863_v24, 0.0  ;;  %v1275_v24 = vld [vmem:[%s2975_s7 + $0x8] sm:$0xff] }
 0x186   :  { %v840_v53 = vpop.f32.mrf.mxu3  ;;  %v1104_v55 = vld [vmem:[#allocation2 + $0x30] sm:$0xff]  ;;  %1305 = vmatpush.msrb.mxu0 %v1278_v60 }
 0x187   :  { %882 = vst.msk [vmem:[#allocation2 + $0x38] sm:$0xff] %vm874_vm3, %v872_v50  ;;  %v841_v12 = vadd.f32 %v840_v53, %v797_v49  ;;  %1551 = vmatmul.msk.f32.vlgmr.msra.gmra.mxu0 %vm874_vm3, %v1104_v55  ;;  %v1274_v49 = vld [vmem:[%s2975_s7] sm:$0xff]  ;;  %v1322_v50 = vld [vmem:[%s2977_s9 + $0x38] sm:$0xff]  ;;  %v1321_v53 = vld [vmem:[%s2977_s9 + $0x30] sm:$0xff] }
 0x188   :  { %1306 = vmatpush.msrb.mxu0 %v1277_v16  ;;  %1339 = vmatpush.msrb.mxu1 %v1322_v50  ;;  %v1320_v55 = vld [vmem:[%s2977_s9 + $0x28] sm:$0xff] }
 0x189   :  { %v851_v46 = vmax.f32 %v2721_v27, %v841_v12  ;;  %v1240_v27 = vld [vmem:[%s2973_s5 + $0x50] sm:$0xff]  ;;  %v1319_v12 = vld [vmem:[%s2977_s9 + $0x20] sm:$0xff] }
 0x18a   :  { %1258 = vmatpush.msra.mxu2 %v1240_v27  ;;  %1307 = vmatpush.msrb.mxu0 %v1276_v51  ;;  %v1316_v27 = vld [vmem:[%s2977_s9 + $0x8] sm:$0xff] }
 0x18b   :  { %v864_v1 = vadd.f32 %v2658_v42, %v851_v46  ;;  %1340 = vmatpush.msrb.mxu1 %v1321_v53  ;;  %v1318_v46 = vld [vmem:[%s2977_s9 + $0x18] sm:$0xff] }
 0x18c   :  { %1259 = vmatpush.msra.mxu2 %v1239_v3  ;;  %1308 = vmatpush.msrb.mxu0 %v1275_v24  ;;  %v1595_v3 = vld [vmem:[%s2976_s8] ss:$0 sm:$0xff] }
 0x18d   :  { %v873_v54 = vmax.f32 %v864_v1, 0.0  ;;  %1341 = vmatpush.msrb.mxu1 %v1320_v55  ;;  %v1594_v1 = vld [vmem:[%s2974_s6] ss:$0 sm:$0xff] }
 0x18e   :  { %v1141_v29 = vld [vmem:[#allocation2 + $0x38] sm:$0xff]  ;;  %1260 = vmatpush.msra.mxu2 %v1238_v37  ;;  %1309 = vmatpush.msrb.mxu0 %v1274_v49 }
 0x18f   :  { %883 = vst.msk [vmem:[#allocation2 + $0x40] sm:$0xff] %vm874_vm3, %v873_v54  ;;  %1561 = vmatmul.msk.f32.vlgmr.msra.gmra.mxu1 %vm874_vm3, %v1141_v29 }
 0x190   :  { %1261 = vmatpush.msra.mxu2 %v1237_v38  ;;  %1342 = vmatpush.msrb.mxu1 %v1319_v12 }
 0x192   :  { %1262 = vmatpush.msra.mxu2 %v1236_v43  ;;  %1343 = vmatpush.msrb.mxu1 %v1318_v46 }
 0x194   :  { %1263 = vmatpush.msra.mxu2 %v1235_v58  ;;  %1344 = vmatpush.msrb.mxu1 %v1317_v8  ;;  %v1596_v58 = vld [vmem:[%s2978_s10] ss:$0 sm:$0xff] }
 0x196   :  { %v1178_v2 = vld [vmem:[#allocation2 + $0x40] sm:$0xff]  ;;  %1264 = vmatpush.msra.mxu2 %v1234_v61  ;;  %1345 = vmatpush.msrb.mxu1 %v1316_v27 }
 0x197   :  { %1571 = vmatmul.msk.f32.vlgmr.msrb.gmra.mxu3 %vm874_vm3, %v1178_v2 }
 0x198   :  { %1265 = vmatpush.msra.mxu2 %v1233_v13 }
 0x19a   :  { %1266 = vmatpush.msra.mxu2 %v1232_v11 }
 0x19c   :  { %1267 = vmatpush.msra.mxu2 %v1231_v34 }
 0x19e   :  { %1268 = vmatpush.msra.mxu2 %v1230_v0 }
 0x1e2   :  { %v927_v42 = vpop.f32.mrf.mxu2 }
 0x1e4   :  { %v989_v47 = vpop.f32.mrf.mxu0 }
 0x1ea   :  { %v953_v6 = vpop.f32.mrf.mxu2 }
 0x1eb   :  { %v954_v14 = vadd.f32 %v953_v6, %v927_v42  ;;  %v1315_v42 = vld [vmem:[%s2977_s9] sm:$0xff]  ;;  %s1360_s9 = sshll.u32 %s2979_s11, 4  ;;  %s1361_s9 = int_to_ptr.hbm [resolvable:$true] %s1360_s9 }
 0x1ec   :  { %v1026_v21 = vpop.f32.mrf.mxu1  ;;  %1346 = vmatpush.msrb.mxu1 %v1315_v42 }
 0x1ed   :  { %v992_v59 = vadd.f32 %v989_v47, %v954_v14 }
 0x1ef   :  { %v1029_v10 = vadd.f32 %v1026_v21, %v992_v59 }
 0x1fa   :  { %v1063_v25 = vpop.f32.mrf.mxu3 }
 0x1fb   :  { %v1066_v52 = vadd.f32 %v1063_v25, %v1029_v10 }
 0x202   :  { %v1100_v22 = vpop.f32.mrf.mxu2 }
 0x203   :  { %v1103_v20 = vadd.f32 %v1100_v22, %v1066_v52 }
 0x204   :  { %v1137_v5 = vpop.f32.mrf.mxu0 }
 0x205   :  { %v1140_v9 = vadd.f32 %v1137_v5, %v1103_v20 }
 0x20c   :  { %v1174_v62 = vpop.f32.mrf.mxu1 }
 0x20d   :  { %v1177_v48 = vadd.f32 %v1174_v62, %v1140_v9 }
 0x21a   :  { %v1211_v31 = vpop.f32.mrf.mxu3 }
 0x21b   :  { %v1214_v30 = vadd.f32 %v1211_v31, %v1177_v48 }
 0x21d   :  { %v1219_v56 = vadd.f32 %v1593_v33, %v1214_v30 }
 0x21f   :  { %v1220_v7 = vmax.f32 %v1219_v56, 0.0 }
 0x221   :  { %1222 = vst.msk [vmem:[#allocation3] sm:$0xff] %vm1221_vm5, %v1220_v7 }
 0x228   :  { %v1223_v17 = vld [vmem:[#allocation3] sm:$0x3]  ;;  %v1224_v57 = vld [vmem:[#allocation3 + $0x2] sm:$0x3]  ;;  %v1226_v4 = vld [vmem:[#allocation3 + $0x4] sm:$0x3] }
 0x229   :  { %v1225_v45 = vmax.f32 %v1223_v17, %v1224_v57  ;;  %v1228_v32 = vld [vmem:[#allocation3 + $0x6] sm:$0x3] }
 0x22b   :  { %v1227_v44 = vmax.f32 %v1225_v45, %v1226_v4 }
 0x22d   :  { %v1229_v39 = vmax.f32 %v1227_v44, %v1228_v32 }
 0x22f   :  { %1573 = vmatmul.msk.f32.vlgmr.msra.gmra.mxu2 %vm1221_vm5, %v1229_v39 }
 0x2b2   :  { %v1270_v54 = vpop.f32.mrf.mxu2 }
 0x2b3   :  { %v1271_v29 = vadd.f32 %v1594_v1, %v1270_v54 }
 0x2b5   :  { %v1273_v2 = vmax.f32 %v1271_v29, 0.0 }
 0x2b7   :  { %1310 = vmatmul.f32.vlgmr.msrb.gmra.mxu0 %v1273_v2 }
 0x334   :  { %v1311_v37 = vpop.f32.mrf.mxu0 }
 0x335   :  { %v1312_v38 = vadd.f32 %v1595_v3, %v1311_v37 }
 0x337   :  { %v1314_v43 = vmax.f32 %v1312_v38, 0.0 }
 0x339   :  { %1574 = vmatmul.msk.f32.vlgmr.msrb.gmra.mxu1 %vm1327_vm6, %v1314_v43 }
 0x3b6   :  { %v1348_v61 = vpop.f32.mrf.mxu1 }
 0x3b7   :  { %v1349_v6 = vadd.f32 %v1596_v58, %v1348_v61 }
 0x3b9   :  { %1352 = vst.msk [vmem:[#allocation4] sm:$0x3] %vm1351_vm7, %v1349_v6 }
 0x3ba   :  { %1363 = dma.vmem_to_hbm [thread:$0]  %s1359_s0, 32, %s1361_s9, [#allocation5]  }
 0x3bb   :  { %1621 = dma.done.wait [#allocation5], 32  }
 0x3bc   :  { %1622 = vsyncadd [#allocation5], 4294967264 }
 0x3bd   :  { %1368 = vsyncpa [#allocation5], 1 }

</bundles_post_ra>
